<compile_context>
chip_gen: v7x
topology: tpu7x:2x2x1
jax: 0.10.0
libtpu: 0.0.40
codegen_flags: <defaults>
</compile_context>

<pallas_src>
import math
import functools

import jax
import jax.numpy as jnp
from jax.experimental import pallas as pl
from jax.experimental.pallas import tpu as pltpu

BF16 = jnp.bfloat16
F32 = jnp.float32
_NEG_INF = -1000000000.0  # matches torch masked_fill(mask == 0, -1e9)


# ---------------------------------------------------------------------------
# shared math helpers
# ---------------------------------------------------------------------------
def _layer_norm(v, w, b, eps=1e-5):
    mu = jnp.mean(v, axis=-1, keepdims=True)
    var = jnp.mean(jnp.square(v - mu), axis=-1, keepdims=True)
    return (v - mu) * jax.lax.rsqrt(var + eps) * w + b


# ---------------------------------------------------------------------------
# in-kernel multi-head attention: heads batched on the leading dim, online
# softmax over key tiles, K/V read from pre-projected VMEM scratch.
# ---------------------------------------------------------------------------
def _mha_flash(q_norm, kv_ref, keep_fn, q_w, q_b, o_w, o_b, *, h, d_k, Lk, block_k):
    """q_norm: (bq, D) f32, already LayerNormed; 1/sqrt(d_k) folded into q_w/q_b.
    kv_ref: VMEM scratch (2, h, Lk, d_k) bf16 holding projected K (0) / V (1).
    keep_fn(ks, bk) -> bool (bq, bk) or (1, bk) keep-mask for key cols [ks, ks+bk).
    o_w: (h, d_k, D) bf16 (output projection pre-reshaped per head in wrapper).
    """
    bq = q_norm.shape[0]

    q = jnp.dot(q_norm.astype(BF16), q_w[...], preferred_element_type=F32) + q_b[...]
    # split heads onto the leading dim via lane slices + stack (no sublane transpose)
    qh = jnp.stack([q[:, i * d_k:(i + 1) * d_k] for i in range(h)], axis=0).astype(BF16)

    m = jnp.full((h, bq, 1), -jnp.inf, F32)
    l = jnp.zeros((h, bq, 1), F32)
    acc = jnp.zeros((h, bq, d_k), F32)

    for kt in range(Lk // block_k):                       # static, small trip count
        ks = kt * block_k
        kh = kv_ref[0, :, ks:ks + block_k, :]             # (h, bk, d_k) bf16
        vh = kv_ref[1, :, ks:ks + block_k, :]
        s = jnp.einsum('hqd,hkd->hqk', qh, kh, preferred_element_type=F32)
        keep = keep_fn(ks, block_k)
        s = jnp.where(keep[None], s, _NEG_INF)
        m_new = jnp.maximum(m, jnp.max(s, axis=-1, keepdims=True))
        alpha = jnp.exp(m - m_new)
        p = jnp.exp(s - m_new)
        l = alpha * l + jnp.sum(p, axis=-1, keepdims=True)
        acc = alpha * acc + jnp.einsum('hqk,hkd->hqd', p.astype(BF16), vh,
                                       preferred_element_type=F32)
        m = m_new

    ctx = acc * pl.reciprocal(l, approx=True)             # (h, bq, d_k)
    # per-head output projection (batch-leading matmul) + sum over heads;
    # avoids the (h,bq,d_k) -> (bq, h*d_k) transpose/reshape relayout.
    outp = jnp.einsum('hqd,hde->hqe', ctx.astype(BF16), o_w[...],
                      preferred_element_type=F32)         # (h, bq, D)
    return jnp.sum(outp, axis=0) + o_b[...]


# ---------------------------------------------------------------------------
# Pallas kernel: grid = (batch, query-tile)
# ---------------------------------------------------------------------------
def _decoder_kernel(x_ref, mem_ref, tmask_ref, smask_ref,
                    sa_q_w, sa_q_b, sa_kv_w, sa_kv_b, sa_o_w, sa_o_b,
                    ca_q_w, ca_q_b, ca_kv_w, ca_kv_b, ca_o_w, ca_o_b,
                    ff_w1, ff_b1, ff_w2, ff_b2,
                    ln_w, ln_b,
                    out_ref, kv_self, kv_cross,
                    *, h, d_k, block_q, bk_self, bk_cross, causal):
    D = h * d_k
    T = kv_self.shape[2]       # (padded) target length
    S = kv_cross.shape[2]
    q_idx = pl.program_id(1)
    q_start = pl.multiple_of(q_idx * block_q, block_q)

    lnw = ln_w[...]            # (4, 1, D)
    lnb = ln_b[...]

    # --- once per batch: project K/V for self- and cross-attn into scratch ---
    @pl.when(q_idx == 0)
    def _():
        xf_n = _layer_norm(x_ref[0].astype(F32), lnw[0], lnb[0]).astype(BF16)   # (T, D)
        kvs = (jnp.dot(xf_n, sa_kv_w[...], preferred_element_type=F32)
               + sa_kv_b[...]).astype(BF16)                                     # (T, 2D)
        kvc = (jnp.dot(mem_ref[0], ca_kv_w[...], preferred_element_type=F32)
               + ca_kv_b[...]).astype(BF16)                                     # (S, 2D)
        for i in range(h):     # head-major layout; lane slices only, no transpose
            kv_self[0, i] = kvs[:, i * d_k:(i + 1) * d_k]
            kv_self[1, i] = kvs[:, D + i * d_k:D + (i + 1) * d_k]
            kv_cross[0, i] = kvc[:, i * d_k:(i + 1) * d_k]
            kv_cross[1, i] = kvc[:, D + i * d_k:D + (i + 1) * d_k]

    xq = x_ref[0, pl.ds(q_start, block_q), :].astype(F32)                       # (bq, D)

    def self_keep(ks, bk):
        if causal:             # in-kernel causal mask: no (B,T,T) HBM traffic
            rows = q_start + jax.lax.broadcasted_iota(jnp.int32, (block_q, bk), 0)
            cols = ks + jax.lax.broadcasted_iota(jnp.int32, (block_q, bk), 1)
            return rows >= cols
        return tmask_ref[0, :, ks:ks + bk] != 0

    def cross_keep(ks, bk):
        return smask_ref[0, :, ks:ks + bk] != 0

    # sublayer 0: self-attention.  SublayerConnection returns y + y (reference).
    y = _mha_flash(_layer_norm(xq, lnw[0], lnb[0]), kv_self, self_keep,
                   sa_q_w, sa_q_b, sa_o_w, sa_o_b,
                   h=h, d_k=d_k, Lk=T, block_k=bk_self)
    x1 = y + y

    # sublayer 1: cross-attention (K/V from raw memory, as in the reference).
    y = _mha_flash(_layer_norm(x1, lnw[1], lnb[1]), kv_cross, cross_keep,
                   ca_q_w, ca_q_b, ca_o_w, ca_o_b,
                   h=h, d_k=d_k, Lk=S, block_k=bk_cross)
    x2 = y + y

    # sublayer 2: feed-forward (dropout = identity in eval mode).
    yn = _layer_norm(x2, lnw[2], lnb[2])
    hdn = jnp.maximum(
        jnp.dot(yn.astype(BF16), ff_w1[...], preferred_element_type=F32) + ff_b1[...],
        0.0)
    y = jnp.dot(hdn.astype(BF16), ff_w2[...], preferred_element_type=F32) + ff_b2[...]
    x3 = y + y

    out_ref[0] = _layer_norm(x3, lnw[3], lnb[3]).astype(out_ref.dtype)


# ---------------------------------------------------------------------------
# tile selection (generation-aware, padding instead of silently untiling)
# ---------------------------------------------------------------------------
def _choose_q_tile(T, cap):
    """Return (block_q, padded_T); block_q is either T or a multiple of 32."""
    if T <= cap:
        return T, T
    t = (cap // 32) * 32
    while t >= 32:
        if T % t == 0:
            return t, T
        t -= 32
    t = (cap // 32) * 32
    return t, ((T + t - 1) // t) * t


def _choose_k_tile(L, cap):
    if L <= cap:
        return L
    t = cap
    while t >= 8:
        if L % t == 0:
            return t
        t -= 8
    return L


# ---------------------------------------------------------------------------
# wrapper: weight prep (fuse KV, fold 1/sqrt(d_k) into Q, head-major out proj)
# ---------------------------------------------------------------------------
def _prep_attn(w, b, h, d_k):
    """w: (4, D, D) as (in, out) for [q, k, v, out]; b: (4, 1, D)."""
    D = h * d_k
    scale = 1.0 / math.sqrt(d_k)
    q_w = (w[0] * scale).astype(BF16)                            # (D, D)
    q_b = (b[0] * scale).astype(F32)                             # (1, D)
    kv_w = jnp.concatenate([w[1], w[2]], axis=1).astype(BF16)    # (D, 2D)
    kv_b = jnp.concatenate([b[1], b[2]], axis=1).astype(F32)     # (1, 2D)
    o_w = w[3].reshape(h, d_k, D).astype(BF16)                   # (h, d_k, D)
    o_b = b[3].astype(F32)                                       # (1, D)
    return q_w, q_b, kv_w, kv_b, o_w, o_b


def decoder_forward(params, x, memory, src_mask, tgt_mask, *, h,
                    causal_tgt=False, out_dtype=F32, block_q=None, block_k=None):
    B, T, D = x.shape
    S = memory.shape[1]
    d_k = D // h

    # generation-aware tiling / VMEM budget
    vmem_cap = 64 * 1024 * 1024
    try:
        vmem_cap = int(getattr(pltpu.get_tpu_info(), "vmem_capacity_bytes", vmem_cap))
    except Exception:
        pass
    small_vmem = vmem_cap <= 96 * 1024 * 1024                    # v7x-like (64 MiB/TC)
    q_cap = block_q if block_q is not None else (128 if small_vmem else 256)
    k_cap = block_k if block_k is not None else 512
    vmem_limit = max(32 * 1024 * 1024,
                     min(vmem_cap - 16 * 1024 * 1024, 100 * 1024 * 1024))

    bq, T_pad = _choose_q_tile(T, q_cap)
    if T_pad != T:
        x = jnp.pad(x, ((0, 0), (0, T_pad - T), (0, 0)))
        if not causal_tgt:
            tgt_mask = jnp.pad(tgt_mask, ((0, 0), (0, T_pad - T), (0, T_pad - T)))
    n_q = T_pad // bq
    bk_self = _choose_k_tile(T_pad, k_cap)
    bk_cross = _choose_k_tile(S, k_cap)

    sa = _prep_attn(params["sa_w"], params["sa_b"], h, d_k)
    ca = _prep_attn(params["ca_w"], params["ca_b"], h, d_k)
    weights = (*sa, *ca,
               params["ff_w1"].astype(BF16), params["ff_b1"].astype(F32),
               params["ff_w2"].astype(BF16), params["ff_b2"].astype(F32),
               params["ln_w"].reshape(4, 1, D).astype(F32),
               params["ln_b"].reshape(4, 1, D).astype(F32))
    w_spec = pl.BlockSpec(memory_space=pltpu.MemorySpace.VMEM)   # resident, single copy

    inputs = [x.astype(BF16), memory.astype(BF16)]               # bf16 transport
    in_specs = [pl.BlockSpec((1, T_pad, D), lambda b, q: (b, 0, 0)),
                pl.BlockSpec((1, S, D), lambda b, q: (b, 0, 0))]
    if not causal_tgt:
        inputs.append(tgt_mask.astype(jnp.int8))                 # int8 transport
        in_specs.append(pl.BlockSpec((1, bq, T_pad), lambda b, q: (b, q, 0)))
    inputs.append(src_mask.astype(jnp.int8))
    in_specs.append(pl.BlockSpec((1, 1, S), lambda b, q: (b, 0, 0)))
    inputs.extend(weights)
    in_specs.extend([w_spec] * len(weights))

    body = functools.partial(_decoder_kernel, h=h, d_k=d_k, block_q=bq,
                             bk_self=bk_self, bk_cross=bk_cross, causal=causal_tgt)
    if causal_tgt:
        def kernel(x_r, mem_r, smask_r, *rest):
            body(x_r, mem_r, None, smask_r, *rest)
    else:
        kernel = body

    grid_spec = pltpu.PrefetchScalarGridSpec(
        num_scalar_prefetch=0,
        grid=(B, n_q),                    # batch parallel (megacore); q-tiles sequential
        in_specs=in_specs,
        out_specs=pl.BlockSpec((1, bq, D), lambda b, q: (b, q, 0)),
        scratch_shapes=[pltpu.VMEM((2, h, T_pad, d_k), BF16),    # self-attn K/V per batch
                        pltpu.VMEM((2, h, S, d_k), BF16)])       # cross-attn K/V per batch

    out = pl.pallas_call(
        kernel,
        out_shape=jax.ShapeDtypeStruct((B, T_pad, D), out_dtype),
        grid_spec=grid_spec,
        compiler_params=pltpu.CompilerParams(
            dimension_semantics=("parallel", "arbitrary"),
            vmem_limit_bytes=int(vmem_limit)),
    )(*inputs)
    return out[:, :T] if T_pad != T else out


# ---------------------------------------------------------------------------
# pure-jnp reference: original unfused math (same mixed bf16/f32 precision)
# ---------------------------------------------------------------------------
def decoder_reference(params, x, memory, src_mask, tgt_mask, *, h):
    D = x.shape[-1]
    d_k = D // h

    def mm(a, w):
        return jnp.dot(a.astype(BF16), w.astype(BF16), preferred_element_type=F32)

    def mha(q_in, kv_in, mask, w, b):
        Lq, Lk = q_in.shape[0], kv_in.shape[0]
        q = mm(q_in, w[0]) + b[0]
        k = mm(kv_in, w[1]) + b[1]
        v = mm(kv_in, w[2]) + b[2]
        qh = q.reshape(Lq, h, d_k).transpose(1, 0, 2)
        kh = k.reshape(Lk, h, d_k).transpose(1, 0, 2)
        vh = v.reshape(Lk, h, d_k).transpose(1, 0, 2)
        s = jnp.einsum("hqd,hkd->hqk", qh.astype(BF16), kh.astype(BF16),
                       preferred_element_type=F32) / math.sqrt(d_k)
        s = jnp.where(mask[None] == 0, _NEG_INF, s)
        p = jax.nn.softmax(s, axis=-1)
        ctx = jnp.einsum("hqk,hkd->hqd", p.astype(BF16), vh.astype(BF16),
                         preferred_element_type=F32)
        ctx = ctx.transpose(1, 0, 2).reshape(Lq, D)
        return mm(ctx, w[3]) + b[3]

    def one(xb, mb, sm, tm):
        lnw, lnb = params["ln_w"], params["ln_b"]
        y = mha(_layer_norm(xb, lnw[0], lnb[0]),
                _layer_norm(xb, lnw[0], lnb[0]), tm,
                params["sa_w"], params["sa_b"])
        x1 = y + y
        y = mha(_layer_norm(x1, lnw[1], lnb[1]), mb, sm,
                params["ca_w"], params["ca_b"])
        x2 = y + y
        y = _layer_norm(x2, lnw[2], lnb[2])
        hdn = jnp.maximum(mm(y, params["ff_w1"]) + params["ff_b1"], 0.0)
        y = mm(hdn, params["ff_w2"]) + params["ff_b2"]
        x3 = y + y
        return _layer_norm(x3, lnw[3], lnb[3])

    return jax.vmap(one)(x, memory, src_mask, tgt_mask)


# ---------------------------------------------------------------------------
def init_params(key, d_model, d_ff):
    ks = jax.random.split(key, 10)
    scale = 0.1
    return {
        "sa_w": scale * jax.random.normal(ks[0], (4, d_model, d_model), F32),
        "sa_b": scale * jax.random.normal(ks[1], (4, 1, d_model), F32),
        "ca_w": scale * jax.random.normal(ks[2], (4, d_model, d_model), F32),
        "ca_b": scale * jax.random.normal(ks[3], (4, 1, d_model), F32),
        "ff_w1": scale * jax.random.normal(ks[4], (d_model, d_ff), F32),
        "ff_b1": scale * jax.random.normal(ks[5], (1, d_ff), F32),
        "ff_w2": scale * jax.random.normal(ks[6], (d_ff, d_model), F32),
        "ff_b2": scale * jax.random.normal(ks[7], (1, d_model), F32),
        # 4 LayerNorms: sublayer[0..2] norms + final norm
        "ln_w": 1.0 + scale * jax.random.normal(ks[8], (4, d_model), F32),
        "ln_b": scale * jax.random.normal(ks[9], (4, d_model), F32),
    }


if __name__ == "__main__":
    B, T, S = 2, 8, 8
    h, d_model, d_ff = 4, 32, 64

    key = jax.random.PRNGKey(0)
    kx, km, kp, kx2, km2 = jax.random.split(key, 5)

    x = jax.random.normal(kx, (B, T, d_model), F32)
    memory = jax.random.normal(km, (B, S, d_model), F32)
    tgt_mask = jnp.broadcast_to(jnp.tril(jnp.ones((T, T), F32)), (B, T, T))
    src_mask = jnp.concatenate([jnp.ones((B, 1, S - 2), F32),
                                jnp.zeros((B, 1, 2), F32)], axis=-1)
    params = init_params(kp, d_model, d_ff)

    ref = jax.block_until_ready(
        decoder_reference(params, x, memory, src_mask, tgt_mask, h=h))

    tol = dict(rtol=5e-2, atol=5e-2)  # bf16 matmuls + approx reciprocal

    # 1) general path: arbitrary masks shipped as int8
    out = jax.block_until_ready(
        decoder_forward(params, x, memory, src_mask, tgt_mask, h=h))
    assert out.shape == (B, T, d_model)
    assert jnp.allclose(out, ref, **tol)

    # 2) causal path: target mask generated in-kernel from iota (no mask traffic)
    out_c = jax.block_until_ready(
        decoder_forward(params, x, memory, src_mask, tgt_mask, h=h, causal_tgt=True))
    assert jnp.allclose(out_c, ref, **tol)

    # 3) tiled path: multiple query tiles + multi-tile online-softmax key loop
    T2 = S2 = 64
    x2 = jax.random.normal(kx2, (B, T2, d_model), F32)
    mem2 = jax.random.normal(km2, (B, S2, d_model), F32)
    tgt2 = jnp.broadcast_to(jnp.tril(jnp.ones((T2, T2), F32)), (B, T2, T2))
    src2 = jnp.ones((B, 1, S2), F32)
    ref2 = jax.block_until_ready(
        decoder_reference(params, x2, mem2, src2, tgt2, h=h))
    out2 = jax.block_until_ready(
        decoder_forward(params, x2, mem2, src2, tgt2, h=h, block_q=32, block_k=16))
    assert jnp.allclose(out2, ref2, **tol)

    print("KERNEL_OK")
</pallas_src>

<mosaic_0001>
module attributes {stable_mosaic.version = 11 : i64} {
  func.func @_decoder_kernel(%arg0: i32, %arg1: i32, %arg2: memref<1x8x32xbf16, #tpu.memory_space<vmem>>, %arg3: memref<1x8x32xbf16, #tpu.memory_space<vmem>>, %arg4: memref<1x8x8xi8, #tpu.memory_space<vmem>>, %arg5: memref<1x1x8xi8, #tpu.memory_space<vmem>>, %arg6: memref<32x32xbf16, #tpu.memory_space<vmem>>, %arg7: memref<1x32xf32, #tpu.memory_space<vmem>>, %arg8: memref<32x64xbf16, #tpu.memory_space<vmem>>, %arg9: memref<1x64xf32, #tpu.memory_space<vmem>>, %arg10: memref<4x8x32xbf16, #tpu.memory_space<vmem>>, %arg11: memref<1x32xf32, #tpu.memory_space<vmem>>, %arg12: memref<32x32xbf16, #tpu.memory_space<vmem>>, %arg13: memref<1x32xf32, #tpu.memory_space<vmem>>, %arg14: memref<32x64xbf16, #tpu.memory_space<vmem>>, %arg15: memref<1x64xf32, #tpu.memory_space<vmem>>, %arg16: memref<4x8x32xbf16, #tpu.memory_space<vmem>>, %arg17: memref<1x32xf32, #tpu.memory_space<vmem>>, %arg18: memref<32x64xbf16, #tpu.memory_space<vmem>>, %arg19: memref<1x64xf32, #tpu.memory_space<vmem>>, %arg20: memref<64x32xbf16, #tpu.memory_space<vmem>>, %arg21: memref<1x32xf32, #tpu.memory_space<vmem>>, %arg22: memref<4x1x32xf32, #tpu.memory_space<vmem>>, %arg23: memref<4x1x32xf32, #tpu.memory_space<vmem>>, %arg24: memref<1x8x32xf32, #tpu.memory_space<vmem>>, %arg25: memref<2x4x8x8xbf16, #tpu.memory_space<vmem>>, %arg26: memref<2x4x8x8xbf16, #tpu.memory_space<vmem>>) attributes {dimension_semantics = [#tpu.dimension_semantics<parallel>, #tpu.dimension_semantics<arbitrary>], iteration_bounds = array<i64: 2, 1>, scalar_prefetch = 0 : i64, scratch_operands = 2 : i64, tpu.core_type = #tpu.core_type<tc>, window_params = [{transform_indices = @transform_0, window_bounds = array<i64: 1, 8, 32>}, {transform_indices = @transform_1, window_bounds = array<i64: 1, 8, 32>}, {transform_indices = @transform_2, window_bounds = array<i64: 1, 8, 8>}, {transform_indices = @transform_3, window_bounds = array<i64: 1, 1, 8>}, {pipeline_mode = #tpu.pipeline_mode<synchronous>, transform_indices = @transform_4, window_bounds = array<i64: 32, 32>}, {pipeline_mode = #tpu.pipeline_mode<synchronous>, transform_indices = @transform_5, window_bounds = array<i64: 1, 32>}, {pipeline_mode = #tpu.pipeline_mode<synchronous>, transform_indices = @transform_6, window_bounds = array<i64: 32, 64>}, {pipeline_mode = #tpu.pipeline_mode<synchronous>, transform_indices = @transform_7, window_bounds = array<i64: 1, 64>}, {pipeline_mode = #tpu.pipeline_mode<synchronous>, transform_indices = @transform_8, window_bounds = array<i64: 4, 8, 32>}, {pipeline_mode = #tpu.pipeline_mode<synchronous>, transform_indices = @transform_9, window_bounds = array<i64: 1, 32>}, {pipeline_mode = #tpu.pipeline_mode<synchronous>, transform_indices = @transform_10, window_bounds = array<i64: 32, 32>}, {pipeline_mode = #tpu.pipeline_mode<synchronous>, transform_indices = @transform_11, window_bounds = array<i64: 1, 32>}, {pipeline_mode = #tpu.pipeline_mode<synchronous>, transform_indices = @transform_12, window_bounds = array<i64: 32, 64>}, {pipeline_mode = #tpu.pipeline_mode<synchronous>, transform_indices = @transform_13, window_bounds = array<i64: 1, 64>}, {pipeline_mode = #tpu.pipeline_mode<synchronous>, transform_indices = @transform_14, window_bounds = array<i64: 4, 8, 32>}, {pipeline_mode = #tpu.pipeline_mode<synchronous>, transform_indices = @transform_15, window_bounds = array<i64: 1, 32>}, {pipeline_mode = #tpu.pipeline_mode<synchronous>, transform_indices = @transform_16, window_bounds = array<i64: 32, 64>}, {pipeline_mode = #tpu.pipeline_mode<synchronous>, transform_indices = @transform_17, window_bounds = array<i64: 1, 64>}, {pipeline_mode = #tpu.pipeline_mode<synchronous>, transform_indices = @transform_18, window_bounds = array<i64: 64, 32>}, {pipeline_mode = #tpu.pipeline_mode<synchronous>, transform_indices = @transform_19, window_bounds = array<i64: 1, 32>}, {pipeline_mode = #tpu.pipeline_mode<synchronous>, transform_indices = @transform_20, window_bounds = array<i64: 4, 1, 32>}, {pipeline_mode = #tpu.pipeline_mode<synchronous>, transform_indices = @transform_21, window_bounds = array<i64: 4, 1, 32>}, {transform_indices = @transform_22, window_bounds = array<i64: 1, 8, 32>}]} {
    %c8_i32 = arith.constant 8 : i32
    %0 = arith.muli %arg1, %c8_i32 : i32
    %1 = tpu.assume_multiple %0, 8 : i32
    %c0 = arith.constant 0 : index
    %c0_0 = arith.constant 0 : index
    %c0_1 = arith.constant 0 : index
    %2 = vector.load %arg22[%c0, %c0_0, %c0_1] : memref<4x1x32xf32, #tpu.memory_space<vmem>>, vector<4x1x32xf32>
    %c0_2 = arith.constant 0 : index
    %c0_3 = arith.constant 0 : index
    %c0_4 = arith.constant 0 : index
    %3 = vector.load %arg23[%c0_2, %c0_3, %c0_4] : memref<4x1x32xf32, #tpu.memory_space<vmem>>, vector<4x1x32xf32>
    %c0_i32 = arith.constant 0 : i32
    %4 = arith.cmpi eq, %arg1, %c0_i32 : i32
    %5 = arith.extui %4 : i1 to i32
    %c0_i32_5 = arith.constant 0 : i32
    %6 = arith.cmpi ne, %5, %c0_i32_5 : i32
    scf.if %6 {
      %c0_103 = arith.constant 0 : index
      %c0_104 = arith.constant 0 : index
      %c0_105 = arith.constant 0 : index
      %255 = vector.load %arg2[%c0_103, %c0_104, %c0_105] : memref<1x8x32xbf16, #tpu.memory_space<vmem>>, vector<1x8x32xbf16>
      %256 = vector.shape_cast %255 : vector<1x8x32xbf16> to vector<8x32xbf16>
      %257 = arith.extf %256 : vector<8x32xbf16> to vector<8x32xf32>
      %258 = vector.extract_strided_slice %2 {offsets = [0, 0, 0], sizes = [1, 1, 32], strides = [1, 1, 1]} : vector<4x1x32xf32> to vector<1x1x32xf32>
      %259 = vector.shape_cast %258 : vector<1x1x32xf32> to vector<1x32xf32>
      %260 = vector.extract_strided_slice %3 {offsets = [0, 0, 0], sizes = [1, 1, 32], strides = [1, 1, 1]} : vector<4x1x32xf32> to vector<1x1x32xf32>
      %261 = vector.shape_cast %260 : vector<1x1x32xf32> to vector<1x32xf32>
      %cst_106 = arith.constant dense<0.000000e+00> : vector<8xf32>
      %262 = vector.multi_reduction <add>, %257, %cst_106 [1] : vector<8x32xf32> to vector<8xf32>
      %263 = vector.shape_cast %262 : vector<8xf32> to vector<8x1xf32>
      %cst_107 = arith.constant 3.200000e+01 : f32
      %264 = vector.broadcast %cst_107 : f32 to vector<8x1xf32>
      %265 = arith.divf %263, %264 : vector<8x1xf32>
      %266 = vector.broadcast %265 : vector<8x1xf32> to vector<8x32xf32>
      %267 = arith.subf %257, %266 : vector<8x32xf32>
      %268 = arith.mulf %267, %267 : vector<8x32xf32>
      %cst_108 = arith.constant dense<0.000000e+00> : vector<8xf32>
      %269 = vector.multi_reduction <add>, %268, %cst_108 [1] : vector<8x32xf32> to vector<8xf32>
      %270 = vector.shape_cast %269 : vector<8xf32> to vector<8x1xf32>
      %cst_109 = arith.constant 3.200000e+01 : f32
      %271 = vector.broadcast %cst_109 : f32 to vector<8x1xf32>
      %272 = arith.divf %270, %271 : vector<8x1xf32>
      %273 = vector.broadcast %265 : vector<8x1xf32> to vector<8x32xf32>
      %274 = arith.subf %257, %273 : vector<8x32xf32>
      %cst_110 = arith.constant 9.99999974E-6 : f32
      %275 = vector.broadcast %cst_110 : f32 to vector<8x1xf32>
      %276 = arith.addf %272, %275 : vector<8x1xf32>
      %277 = math.rsqrt %276 : vector<8x1xf32>
      %278 = vector.broadcast %277 : vector<8x1xf32> to vector<8x32xf32>
      %279 = arith.mulf %274, %278 : vector<8x32xf32>
      %280 = vector.broadcast %259 : vector<1x32xf32> to vector<8x32xf32>
      %281 = arith.mulf %279, %280 : vector<8x32xf32>
      %282 = vector.broadcast %261 : vector<1x32xf32> to vector<8x32xf32>
      %283 = arith.addf %281, %282 : vector<8x32xf32>
      %284 = arith.truncf %283 : vector<8x32xf32> to vector<8x32xbf16>
      %c0_111 = arith.constant 0 : index
      %c0_112 = arith.constant 0 : index
      %285 = vector.load %arg8[%c0_111, %c0_112] : memref<32x64xbf16, #tpu.memory_space<vmem>>, vector<32x64xbf16>
      %cst_113 = arith.constant dense<0.000000e+00> : vector<8x64xf32>
      %286 = tpu.matmul %284, %285, %cst_113 {dimension_numbers = #tpu.dot_dimension_numbers<[1], [0], [0], [1], [0, 0, 1, 1], [], []>} : vector<8x32xbf16>, vector<32x64xbf16>, vector<8x64xf32> -> vector<8x64xf32>
      %c0_114 = arith.constant 0 : index
      %c0_115 = arith.constant 0 : index
      %287 = vector.load %arg9[%c0_114, %c0_115] : memref<1x64xf32, #tpu.memory_space<vmem>>, vector<1x64xf32>
      %288 = vector.broadcast %287 : vector<1x64xf32> to vector<8x64xf32>
      %289 = arith.addf %286, %288 : vector<8x64xf32>
      %290 = arith.truncf %289 : vector<8x64xf32> to vector<8x64xbf16>
      %c0_116 = arith.constant 0 : index
      %c0_117 = arith.constant 0 : index
      %c0_118 = arith.constant 0 : index
      %291 = vector.load %arg3[%c0_116, %c0_117, %c0_118] : memref<1x8x32xbf16, #tpu.memory_space<vmem>>, vector<1x8x32xbf16>
      %292 = vector.shape_cast %291 : vector<1x8x32xbf16> to vector<8x32xbf16>
      %c0_119 = arith.constant 0 : index
      %c0_120 = arith.constant 0 : index
      %293 = vector.load %arg14[%c0_119, %c0_120] : memref<32x64xbf16, #tpu.memory_space<vmem>>, vector<32x64xbf16>
      %cst_121 = arith.constant dense<0.000000e+00> : vector<8x64xf32>
      %294 = tpu.matmul %292, %293, %cst_121 {dimension_numbers = #tpu.dot_dimension_numbers<[1], [0], [0], [1], [0, 0, 1, 1], [], []>} : vector<8x32xbf16>, vector<32x64xbf16>, vector<8x64xf32> -> vector<8x64xf32>
      %c0_122 = arith.constant 0 : index
      %c0_123 = arith.constant 0 : index
      %295 = vector.load %arg15[%c0_122, %c0_123] : memref<1x64xf32, #tpu.memory_space<vmem>>, vector<1x64xf32>
      %296 = vector.broadcast %295 : vector<1x64xf32> to vector<8x64xf32>
      %297 = arith.addf %294, %296 : vector<8x64xf32>
      %298 = arith.truncf %297 : vector<8x64xf32> to vector<8x64xbf16>
      %299 = vector.extract_strided_slice %290 {offsets = [0, 0], sizes = [8, 8], strides = [1, 1]} : vector<8x64xbf16> to vector<8x8xbf16>
      %c0_124 = arith.constant 0 : index
      %c0_125 = arith.constant 0 : index
      %c0_126 = arith.constant 0 : index
      %c0_127 = arith.constant 0 : index
      %300 = vector.load %arg25[%c0_124, %c0_125, %c0_126, %c0_127] : memref<2x4x8x8xbf16, #tpu.memory_space<vmem>>, vector<1x1x8x8xbf16>
      %301 = vector.shape_cast %300 : vector<1x1x8x8xbf16> to vector<8x8xbf16>
      %302 = vector.shape_cast %299 : vector<8x8xbf16> to vector<1x1x8x8xbf16>
      tpu.vector_store %arg25[%c0_124, %c0_125, %c0_126, %c0_127], %302 {strides = array<i32>} : memref<2x4x8x8xbf16, #tpu.memory_space<vmem>>, vector<1x1x8x8xbf16>,
      %303 = vector.extract_strided_slice %290 {offsets = [0, 32], sizes = [8, 8], strides = [1, 1]} : vector<8x64xbf16> to vector<8x8xbf16>
      %c1_128 = arith.constant 1 : index
      %c0_129 = arith.constant 0 : index
      %c0_130 = arith.constant 0 : index
      %c0_131 = arith.constant 0 : index
      %304 = vector.load %arg25[%c1_128, %c0_129, %c0_130, %c0_131] : memref<2x4x8x8xbf16, #tpu.memory_space<vmem>>, vector<1x1x8x8xbf16>
      %305 = vector.shape_cast %304 : vector<1x1x8x8xbf16> to vector<8x8xbf16>
      %306 = vector.shape_cast %303 : vector<8x8xbf16> to vector<1x1x8x8xbf16>
      tpu.vector_store %arg25[%c1_128, %c0_129, %c0_130, %c0_131], %306 {strides = array<i32>} : memref<2x4x8x8xbf16, #tpu.memory_space<vmem>>, vector<1x1x8x8xbf16>,
      %307 = vector.extract_strided_slice %298 {offsets = [0, 0], sizes = [8, 8], strides = [1, 1]} : vector<8x64xbf16> to vector<8x8xbf16>
      %c0_132 = arith.constant 0 : index
      %c0_133 = arith.constant 0 : index
      %c0_134 = arith.constant 0 : index
      %c0_135 = arith.constant 0 : index
      %308 = vector.load %arg26[%c0_132, %c0_133, %c0_134, %c0_135] : memref<2x4x8x8xbf16, #tpu.memory_space<vmem>>, vector<1x1x8x8xbf16>
      %309 = vector.shape_cast %308 : vector<1x1x8x8xbf16> to vector<8x8xbf16>
      %310 = vector.shape_cast %307 : vector<8x8xbf16> to vector<1x1x8x8xbf16>
      tpu.vector_store %arg26[%c0_132, %c0_133, %c0_134, %c0_135], %310 {strides = array<i32>} : memref<2x4x8x8xbf16, #tpu.memory_space<vmem>>, vector<1x1x8x8xbf16>,
      %311 = vector.extract_strided_slice %298 {offsets = [0, 32], sizes = [8, 8], strides = [1, 1]} : vector<8x64xbf16> to vector<8x8xbf16>
      %c1_136 = arith.constant 1 : index
      %c0_137 = arith.constant 0 : index
      %c0_138 = arith.constant 0 : index
      %c0_139 = arith.constant 0 : index
      %312 = vector.load %arg26[%c1_136, %c0_137, %c0_138, %c0_139] : memref<2x4x8x8xbf16, #tpu.memory_space<vmem>>, vector<1x1x8x8xbf16>
      %313 = vector.shape_cast %312 : vector<1x1x8x8xbf16> to vector<8x8xbf16>
      %314 = vector.shape_cast %311 : vector<8x8xbf16> to vector<1x1x8x8xbf16>
      tpu.vector_store %arg26[%c1_136, %c0_137, %c0_138, %c0_139], %314 {strides = array<i32>} : memref<2x4x8x8xbf16, #tpu.memory_space<vmem>>, vector<1x1x8x8xbf16>,
      %315 = vector.extract_strided_slice %290 {offsets = [0, 8], sizes = [8, 8], strides = [1, 1]} : vector<8x64xbf16> to vector<8x8xbf16>
      %c0_140 = arith.constant 0 : index
      %c1_141 = arith.constant 1 : index
      %c0_142 = arith.constant 0 : index
      %c0_143 = arith.constant 0 : index
      %316 = vector.load %arg25[%c0_140, %c1_141, %c0_142, %c0_143] : memref<2x4x8x8xbf16, #tpu.memory_space<vmem>>, vector<1x1x8x8xbf16>
      %317 = vector.shape_cast %316 : vector<1x1x8x8xbf16> to vector<8x8xbf16>
      %318 = vector.shape_cast %315 : vector<8x8xbf16> to vector<1x1x8x8xbf16>
      tpu.vector_store %arg25[%c0_140, %c1_141, %c0_142, %c0_143], %318 {strides = array<i32>} : memref<2x4x8x8xbf16, #tpu.memory_space<vmem>>, vector<1x1x8x8xbf16>,
      %319 = vector.extract_strided_slice %290 {offsets = [0, 40], sizes = [8, 8], strides = [1, 1]} : vector<8x64xbf16> to vector<8x8xbf16>
      %c1_144 = arith.constant 1 : index
      %c1_145 = arith.constant 1 : index
      %c0_146 = arith.constant 0 : index
      %c0_147 = arith.constant 0 : index
      %320 = vector.load %arg25[%c1_144, %c1_145, %c0_146, %c0_147] : memref<2x4x8x8xbf16, #tpu.memory_space<vmem>>, vector<1x1x8x8xbf16>
      %321 = vector.shape_cast %320 : vector<1x1x8x8xbf16> to vector<8x8xbf16>
      %322 = vector.shape_cast %319 : vector<8x8xbf16> to vector<1x1x8x8xbf16>
      tpu.vector_store %arg25[%c1_144, %c1_145, %c0_146, %c0_147], %322 {strides = array<i32>} : memref<2x4x8x8xbf16, #tpu.memory_space<vmem>>, vector<1x1x8x8xbf16>,
      %323 = vector.extract_strided_slice %298 {offsets = [0, 8], sizes = [8, 8], strides = [1, 1]} : vector<8x64xbf16> to vector<8x8xbf16>
      %c0_148 = arith.constant 0 : index
      %c1_149 = arith.constant 1 : index
      %c0_150 = arith.constant 0 : index
      %c0_151 = arith.constant 0 : index
      %324 = vector.load %arg26[%c0_148, %c1_149, %c0_150, %c0_151] : memref<2x4x8x8xbf16, #tpu.memory_space<vmem>>, vector<1x1x8x8xbf16>
      %325 = vector.shape_cast %324 : vector<1x1x8x8xbf16> to vector<8x8xbf16>
      %326 = vector.shape_cast %323 : vector<8x8xbf16> to vector<1x1x8x8xbf16>
      tpu.vector_store %arg26[%c0_148, %c1_149, %c0_150, %c0_151], %326 {strides = array<i32>} : memref<2x4x8x8xbf16, #tpu.memory_space<vmem>>, vector<1x1x8x8xbf16>,
      %327 = vector.extract_strided_slice %298 {offsets = [0, 40], sizes = [8, 8], strides = [1, 1]} : vector<8x64xbf16> to vector<8x8xbf16>
      %c1_152 = arith.constant 1 : index
      %c1_153 = arith.constant 1 : index
      %c0_154 = arith.constant 0 : index
      %c0_155 = arith.constant 0 : index
      %328 = vector.load %arg26[%c1_152, %c1_153, %c0_154, %c0_155] : memref<2x4x8x8xbf16, #tpu.memory_space<vmem>>, vector<1x1x8x8xbf16>
      %329 = vector.shape_cast %328 : vector<1x1x8x8xbf16> to vector<8x8xbf16>
      %330 = vector.shape_cast %327 : vector<8x8xbf16> to vector<1x1x8x8xbf16>
      tpu.vector_store %arg26[%c1_152, %c1_153, %c0_154, %c0_155], %330 {strides = array<i32>} : memref<2x4x8x8xbf16, #tpu.memory_space<vmem>>, vector<1x1x8x8xbf16>,
      %331 = vector.extract_strided_slice %290 {offsets = [0, 16], sizes = [8, 8], strides = [1, 1]} : vector<8x64xbf16> to vector<8x8xbf16>
      %c0_156 = arith.constant 0 : index
      %c2 = arith.constant 2 : index
      %c0_157 = arith.constant 0 : index
      %c0_158 = arith.constant 0 : index
      %332 = vector.load %arg25[%c0_156, %c2, %c0_157, %c0_158] : memref<2x4x8x8xbf16, #tpu.memory_space<vmem>>, vector<1x1x8x8xbf16>
      %333 = vector.shape_cast %332 : vector<1x1x8x8xbf16> to vector<8x8xbf16>
      %334 = vector.shape_cast %331 : vector<8x8xbf16> to vector<1x1x8x8xbf16>
      tpu.vector_store %arg25[%c0_156, %c2, %c0_157, %c0_158], %334 {strides = array<i32>} : memref<2x4x8x8xbf16, #tpu.memory_space<vmem>>, vector<1x1x8x8xbf16>,
      %335 = vector.extract_strided_slice %290 {offsets = [0, 48], sizes = [8, 8], strides = [1, 1]} : vector<8x64xbf16> to vector<8x8xbf16>
      %c1_159 = arith.constant 1 : index
      %c2_160 = arith.constant 2 : index
      %c0_161 = arith.constant 0 : index
      %c0_162 = arith.constant 0 : index
      %336 = vector.load %arg25[%c1_159, %c2_160, %c0_161, %c0_162] : memref<2x4x8x8xbf16, #tpu.memory_space<vmem>>, vector<1x1x8x8xbf16>
      %337 = vector.shape_cast %336 : vector<1x1x8x8xbf16> to vector<8x8xbf16>
      %338 = vector.shape_cast %335 : vector<8x8xbf16> to vector<1x1x8x8xbf16>
      tpu.vector_store %arg25[%c1_159, %c2_160, %c0_161, %c0_162], %338 {strides = array<i32>} : memref<2x4x8x8xbf16, #tpu.memory_space<vmem>>, vector<1x1x8x8xbf16>,
      %339 = vector.extract_strided_slice %298 {offsets = [0, 16], sizes = [8, 8], strides = [1, 1]} : vector<8x64xbf16> to vector<8x8xbf16>
      %c0_163 = arith.constant 0 : index
      %c2_164 = arith.constant 2 : index
      %c0_165 = arith.constant 0 : index
      %c0_166 = arith.constant 0 : index
      %340 = vector.load %arg26[%c0_163, %c2_164, %c0_165, %c0_166] : memref<2x4x8x8xbf16, #tpu.memory_space<vmem>>, vector<1x1x8x8xbf16>
      %341 = vector.shape_cast %340 : vector<1x1x8x8xbf16> to vector<8x8xbf16>
      %342 = vector.shape_cast %339 : vector<8x8xbf16> to vector<1x1x8x8xbf16>
      tpu.vector_store %arg26[%c0_163, %c2_164, %c0_165, %c0_166], %342 {strides = array<i32>} : memref<2x4x8x8xbf16, #tpu.memory_space<vmem>>, vector<1x1x8x8xbf16>,
      %343 = vector.extract_strided_slice %298 {offsets = [0, 48], sizes = [8, 8], strides = [1, 1]} : vector<8x64xbf16> to vector<8x8xbf16>
      %c1_167 = arith.constant 1 : index
      %c2_168 = arith.constant 2 : index
      %c0_169 = arith.constant 0 : index
      %c0_170 = arith.constant 0 : index
      %344 = vector.load %arg26[%c1_167, %c2_168, %c0_169, %c0_170] : memref<2x4x8x8xbf16, #tpu.memory_space<vmem>>, vector<1x1x8x8xbf16>
      %345 = vector.shape_cast %344 : vector<1x1x8x8xbf16> to vector<8x8xbf16>
      %346 = vector.shape_cast %343 : vector<8x8xbf16> to vector<1x1x8x8xbf16>
      tpu.vector_store %arg26[%c1_167, %c2_168, %c0_169, %c0_170], %346 {strides = array<i32>} : memref<2x4x8x8xbf16, #tpu.memory_space<vmem>>, vector<1x1x8x8xbf16>,
      %347 = vector.extract_strided_slice %290 {offsets = [0, 24], sizes = [8, 8], strides = [1, 1]} : vector<8x64xbf16> to vector<8x8xbf16>
      %c0_171 = arith.constant 0 : index
      %c3 = arith.constant 3 : index
      %c0_172 = arith.constant 0 : index
      %c0_173 = arith.constant 0 : index
      %348 = vector.load %arg25[%c0_171, %c3, %c0_172, %c0_173] : memref<2x4x8x8xbf16, #tpu.memory_space<vmem>>, vector<1x1x8x8xbf16>
      %349 = vector.shape_cast %348 : vector<1x1x8x8xbf16> to vector<8x8xbf16>
      %350 = vector.shape_cast %347 : vector<8x8xbf16> to vector<1x1x8x8xbf16>
      tpu.vector_store %arg25[%c0_171, %c3, %c0_172, %c0_173], %350 {strides = array<i32>} : memref<2x4x8x8xbf16, #tpu.memory_space<vmem>>, vector<1x1x8x8xbf16>,
      %351 = vector.extract_strided_slice %290 {offsets = [0, 56], sizes = [8, 8], strides = [1, 1]} : vector<8x64xbf16> to vector<8x8xbf16>
      %c1_174 = arith.constant 1 : index
      %c3_175 = arith.constant 3 : index
      %c0_176 = arith.constant 0 : index
      %c0_177 = arith.constant 0 : index
      %352 = vector.load %arg25[%c1_174, %c3_175, %c0_176, %c0_177] : memref<2x4x8x8xbf16, #tpu.memory_space<vmem>>, vector<1x1x8x8xbf16>
      %353 = vector.shape_cast %352 : vector<1x1x8x8xbf16> to vector<8x8xbf16>
      %354 = vector.shape_cast %351 : vector<8x8xbf16> to vector<1x1x8x8xbf16>
      tpu.vector_store %arg25[%c1_174, %c3_175, %c0_176, %c0_177], %354 {strides = array<i32>} : memref<2x4x8x8xbf16, #tpu.memory_space<vmem>>, vector<1x1x8x8xbf16>,
      %355 = vector.extract_strided_slice %298 {offsets = [0, 24], sizes = [8, 8], strides = [1, 1]} : vector<8x64xbf16> to vector<8x8xbf16>
      %c0_178 = arith.constant 0 : index
      %c3_179 = arith.constant 3 : index
      %c0_180 = arith.constant 0 : index
      %c0_181 = arith.constant 0 : index
      %356 = vector.load %arg26[%c0_178, %c3_179, %c0_180, %c0_181] : memref<2x4x8x8xbf16, #tpu.memory_space<vmem>>, vector<1x1x8x8xbf16>
      %357 = vector.shape_cast %356 : vector<1x1x8x8xbf16> to vector<8x8xbf16>
      %358 = vector.shape_cast %355 : vector<8x8xbf16> to vector<1x1x8x8xbf16>
      tpu.vector_store %arg26[%c0_178, %c3_179, %c0_180, %c0_181], %358 {strides = array<i32>} : memref<2x4x8x8xbf16, #tpu.memory_space<vmem>>, vector<1x1x8x8xbf16>,
      %359 = vector.extract_strided_slice %298 {offsets = [0, 56], sizes = [8, 8], strides = [1, 1]} : vector<8x64xbf16> to vector<8x8xbf16>
      %c1_182 = arith.constant 1 : index
      %c3_183 = arith.constant 3 : index
      %c0_184 = arith.constant 0 : index
      %c0_185 = arith.constant 0 : index
      %360 = vector.load %arg26[%c1_182, %c3_183, %c0_184, %c0_185] : memref<2x4x8x8xbf16, #tpu.memory_space<vmem>>, vector<1x1x8x8xbf16>
      %361 = vector.shape_cast %360 : vector<1x1x8x8xbf16> to vector<8x8xbf16>
      %362 = vector.shape_cast %359 : vector<8x8xbf16> to vector<1x1x8x8xbf16>
      tpu.vector_store %arg26[%c1_182, %c3_183, %c0_184, %c0_185], %362 {strides = array<i32>} : memref<2x4x8x8xbf16, #tpu.memory_space<vmem>>, vector<1x1x8x8xbf16>,
    } else {
    }
    %c0_6 = arith.constant 0 : index
    %7 = arith.index_cast %1 : i32 to index
    %c0_7 = arith.constant 0 : index
    %8 = vector.load %arg2[%c0_6, %7, %c0_7] : memref<1x8x32xbf16, #tpu.memory_space<vmem>>, vector<1x8x32xbf16>
    %9 = vector.shape_cast %8 : vector<1x8x32xbf16> to vector<8x32xbf16>
    %10 = arith.extf %9 : vector<8x32xbf16> to vector<8x32xf32>
    %11 = vector.extract_strided_slice %2 {offsets = [0, 0, 0], sizes = [1, 1, 32], strides = [1, 1, 1]} : vector<4x1x32xf32> to vector<1x1x32xf32>
    %12 = vector.shape_cast %11 : vector<1x1x32xf32> to vector<1x32xf32>
    %13 = vector.extract_strided_slice %3 {offsets = [0, 0, 0], sizes = [1, 1, 32], strides = [1, 1, 1]} : vector<4x1x32xf32> to vector<1x1x32xf32>
    %14 = vector.shape_cast %13 : vector<1x1x32xf32> to vector<1x32xf32>
    %cst = arith.constant dense<0.000000e+00> : vector<8xf32>
    %15 = vector.multi_reduction <add>, %10, %cst [1] : vector<8x32xf32> to vector<8xf32>
    %16 = vector.shape_cast %15 : vector<8xf32> to vector<8x1xf32>
    %cst_8 = arith.constant 3.200000e+01 : f32
    %17 = vector.broadcast %cst_8 : f32 to vector<8x1xf32>
    %18 = arith.divf %16, %17 : vector<8x1xf32>
    %19 = vector.broadcast %18 : vector<8x1xf32> to vector<8x32xf32>
    %20 = arith.subf %10, %19 : vector<8x32xf32>
    %21 = arith.mulf %20, %20 : vector<8x32xf32>
    %cst_9 = arith.constant dense<0.000000e+00> : vector<8xf32>
    %22 = vector.multi_reduction <add>, %21, %cst_9 [1] : vector<8x32xf32> to vector<8xf32>
    %23 = vector.shape_cast %22 : vector<8xf32> to vector<8x1xf32>
    %cst_10 = arith.constant 3.200000e+01 : f32
    %24 = vector.broadcast %cst_10 : f32 to vector<8x1xf32>
    %25 = arith.divf %23, %24 : vector<8x1xf32>
    %26 = vector.broadcast %18 : vector<8x1xf32> to vector<8x32xf32>
    %27 = arith.subf %10, %26 : vector<8x32xf32>
    %cst_11 = arith.constant 9.99999974E-6 : f32
    %28 = vector.broadcast %cst_11 : f32 to vector<8x1xf32>
    %29 = arith.addf %25, %28 : vector<8x1xf32>
    %30 = math.rsqrt %29 : vector<8x1xf32>
    %31 = vector.broadcast %30 : vector<8x1xf32> to vector<8x32xf32>
    %32 = arith.mulf %27, %31 : vector<8x32xf32>
    %33 = vector.broadcast %12 : vector<1x32xf32> to vector<8x32xf32>
    %34 = arith.mulf %32, %33 : vector<8x32xf32>
    %35 = vector.broadcast %14 : vector<1x32xf32> to vector<8x32xf32>
    %36 = arith.addf %34, %35 : vector<8x32xf32>
    %37 = arith.truncf %36 : vector<8x32xf32> to vector<8x32xbf16>
    %c0_12 = arith.constant 0 : index
    %c0_13 = arith.constant 0 : index
    %38 = vector.load %arg6[%c0_12, %c0_13] : memref<32x32xbf16, #tpu.memory_space<vmem>>, vector<32x32xbf16>
    %cst_14 = arith.constant dense<0.000000e+00> : vector<8x32xf32>
    %39 = tpu.matmul %37, %38, %cst_14 {dimension_numbers = #tpu.dot_dimension_numbers<[1], [0], [0], [1], [0, 0, 1, 1], [], []>} : vector<8x32xbf16>, vector<32x32xbf16>, vector<8x32xf32> -> vector<8x32xf32>
    %c0_15 = arith.constant 0 : index
    %c0_16 = arith.constant 0 : index
    %40 = vector.load %arg7[%c0_15, %c0_16] : memref<1x32xf32, #tpu.memory_space<vmem>>, vector<1x32xf32>
    %41 = vector.broadcast %40 : vector<1x32xf32> to vector<8x32xf32>
    %42 = arith.addf %39, %41 : vector<8x32xf32>
    %43 = vector.extract_strided_slice %42 {offsets = [0, 0], sizes = [8, 8], strides = [1, 1]} : vector<8x32xf32> to vector<8x8xf32>
    %44 = vector.extract_strided_slice %42 {offsets = [0, 8], sizes = [8, 8], strides = [1, 1]} : vector<8x32xf32> to vector<8x8xf32>
    %45 = vector.extract_strided_slice %42 {offsets = [0, 16], sizes = [8, 8], strides = [1, 1]} : vector<8x32xf32> to vector<8x8xf32>
    %46 = vector.extract_strided_slice %42 {offsets = [0, 24], sizes = [8, 8], strides = [1, 1]} : vector<8x32xf32> to vector<8x8xf32>
    %47 = vector.shape_cast %43 : vector<8x8xf32> to vector<1x8x8xf32>
    %48 = vector.shape_cast %44 : vector<8x8xf32> to vector<1x8x8xf32>
    %49 = vector.shape_cast %45 : vector<8x8xf32> to vector<1x8x8xf32>
    %50 = vector.shape_cast %46 : vector<8x8xf32> to vector<1x8x8xf32>
    %51 = tpu.concatenate %47, %48, %49, %50 in 0 : vector<1x8x8xf32>, vector<1x8x8xf32>, vector<1x8x8xf32>, vector<1x8x8xf32> -> vector<4x8x8xf32>
    %52 = arith.truncf %51 : vector<4x8x8xf32> to vector<4x8x8xbf16>
    %cst_17 = arith.constant 0xFF800000 : f32
    %53 = vector.broadcast %cst_17 : f32 to vector<4x8x1xf32>
    %cst_18 = arith.constant 0.000000e+00 : f32
    %54 = vector.broadcast %cst_18 : f32 to vector<4x8x1xf32>
    %cst_19 = arith.constant 0.000000e+00 : f32
    %55 = vector.broadcast %cst_19 : f32 to vector<4x8x8xf32>
    %c0_20 = arith.constant 0 : index
    %c0_21 = arith.constant 0 : index
    %c0_22 = arith.constant 0 : index
    %c0_23 = arith.constant 0 : index
    %56 = vector.load %arg25[%c0_20, %c0_21, %c0_22, %c0_23] : memref<2x4x8x8xbf16, #tpu.memory_space<vmem>>, vector<1x4x8x8xbf16>
    %57 = vector.shape_cast %56 : vector<1x4x8x8xbf16> to vector<4x8x8xbf16>
    %c1 = arith.constant 1 : index
    %c0_24 = arith.constant 0 : index
    %c0_25 = arith.constant 0 : index
    %c0_26 = arith.constant 0 : index
    %58 = vector.load %arg25[%c1, %c0_24, %c0_25, %c0_26] : memref<2x4x8x8xbf16, #tpu.memory_space<vmem>>, vector<1x4x8x8xbf16>
    %59 = vector.shape_cast %58 : vector<1x4x8x8xbf16> to vector<4x8x8xbf16>
    "tpu.trace_start"() <{level = 10 : i32, message = "hqd,hkd->hqk"}> : () -> ()
    %cst_27 = arith.constant dense<0.000000e+00> : vector<4x8x8xf32>
    %60 = tpu.matmul %52, %57, %cst_27 {dimension_numbers = #tpu.dot_dimension_numbers<[2], [2], [1], [1], [0, 0, 0, 1, 1, 1], [0], [0]>} : vector<4x8x8xbf16>, vector<4x8x8xbf16>, vector<4x8x8xf32> -> vector<4x8x8xf32>
    "tpu.trace_stop"() : () -> ()
    %c0_28 = arith.constant 0 : index
    %c0_29 = arith.constant 0 : index
    %c0_30 = arith.constant 0 : index
    %61 = vector.load %arg4[%c0_28, %c0_29, %c0_30] : memref<1x8x8xi8, #tpu.memory_space<vmem>>, vector<1x8x8xi8>
    %62 = vector.shape_cast %61 : vector<1x8x8xi8> to vector<8x8xi8>
    %c0_i8 = arith.constant 0 : i8
    %63 = vector.broadcast %c0_i8 : i8 to vector<8x8xi8>
    %64 = arith.cmpi ne, %62, %63 : vector<8x8xi8>
    %65 = vector.shape_cast %64 : vector<8x8xi1> to vector<1x8x8xi1>
    %cst_31 = arith.constant -1.000000e+09 : f32
    %66 = vector.shape_cast %65 : vector<1x8x8xi1> to vector<1x8x8xi1>
    %67 = vector.broadcast %66 : vector<1x8x8xi1> to vector<4x8x8xi1>
    %68 = vector.broadcast %cst_31 : f32 to vector<4x8x8xf32>
    %69 = arith.select %67, %60, %68 : vector<4x8x8xi1>, vector<4x8x8xf32>
    %cst_32 = arith.constant dense<0xFF800000> : vector<4x8xf32>
    %70 = vector.multi_reduction <maximumf>, %69, %cst_32 [2] : vector<4x8x8xf32> to vector<4x8xf32>
    %71 = vector.shape_cast %70 : vector<4x8xf32> to vector<4x8x1xf32>
    %72 = arith.maximumf %53, %71 : vector<4x8x1xf32>
    %73 = arith.subf %53, %72 : vector<4x8x1xf32>
    %74 = math.exp %73 : vector<4x8x1xf32>
    %75 = vector.broadcast %72 : vector<4x8x1xf32> to vector<4x8x8xf32>
    %76 = arith.subf %69, %75 : vector<4x8x8xf32>
    %77 = math.exp %76 : vector<4x8x8xf32>
    %78 = arith.mulf %74, %54 : vector<4x8x1xf32>
    %cst_33 = arith.constant dense<0.000000e+00> : vector<4x8xf32>
    %79 = vector.multi_reduction <add>, %77, %cst_33 [2] : vector<4x8x8xf32> to vector<4x8xf32>
    %80 = vector.shape_cast %79 : vector<4x8xf32> to vector<4x8x1xf32>
    %81 = arith.addf %78, %80 : vector<4x8x1xf32>
    %82 = vector.broadcast %74 : vector<4x8x1xf32> to vector<4x8x8xf32>
    %83 = arith.mulf %82, %55 : vector<4x8x8xf32>
    %84 = arith.truncf %77 : vector<4x8x8xf32> to vector<4x8x8xbf16>
    "tpu.trace_start"() <{level = 10 : i32, message = "hqk,hkd->hqd"}> : () -> ()
    %cst_34 = arith.constant dense<0.000000e+00> : vector<4x8x8xf32>
    %85 = tpu.matmul %84, %59, %cst_34 {dimension_numbers = #tpu.dot_dimension_numbers<[2], [1], [1], [2], [0, 0, 0, 1, 1, 2], [0], [0]>} : vector<4x8x8xbf16>, vector<4x8x8xbf16>, vector<4x8x8xf32> -> vector<4x8x8xf32>
    "tpu.trace_stop"() : () -> ()
    %86 = arith.addf %83, %85 : vector<4x8x8xf32>
    %87 = tpu.reciprocal %81 {approx = true} : vector<4x8x1xf32> -> vector<4x8x1xf32>
    %88 = vector.broadcast %87 : vector<4x8x1xf32> to vector<4x8x8xf32>
    %89 = arith.mulf %86, %88 : vector<4x8x8xf32>
    %90 = arith.truncf %89 : vector<4x8x8xf32> to vector<4x8x8xbf16>
    %c0_35 = arith.constant 0 : index
    %c0_36 = arith.constant 0 : index
    %c0_37 = arith.constant 0 : index
    %91 = vector.load %arg10[%c0_35, %c0_36, %c0_37] : memref<4x8x32xbf16, #tpu.memory_space<vmem>>, vector<4x8x32xbf16>
    "tpu.trace_start"() <{level = 10 : i32, message = "hqd,hde->hqe"}> : () -> ()
    %cst_38 = arith.constant dense<0.000000e+00> : vector<4x8x32xf32>
    %92 = tpu.matmul %90, %91, %cst_38 {dimension_numbers = #tpu.dot_dimension_numbers<[2], [1], [1], [2], [0, 0, 0, 1, 1, 2], [0], [0]>} : vector<4x8x8xbf16>, vector<4x8x32xbf16>, vector<4x8x32xf32> -> vector<4x8x32xf32>
    "tpu.trace_stop"() : () -> ()
    %cst_39 = arith.constant dense<0.000000e+00> : vector<8x32xf32>
    %93 = vector.multi_reduction <add>, %92, %cst_39 [0] : vector<4x8x32xf32> to vector<8x32xf32>
    %c0_40 = arith.constant 0 : index
    %c0_41 = arith.constant 0 : index
    %94 = vector.load %arg11[%c0_40, %c0_41] : memref<1x32xf32, #tpu.memory_space<vmem>>, vector<1x32xf32>
    %95 = vector.broadcast %94 : vector<1x32xf32> to vector<8x32xf32>
    %96 = arith.addf %93, %95 : vector<8x32xf32>
    %97 = arith.addf %96, %96 : vector<8x32xf32>
    %98 = vector.extract_strided_slice %2 {offsets = [1, 0, 0], sizes = [1, 1, 32], strides = [1, 1, 1]} : vector<4x1x32xf32> to vector<1x1x32xf32>
    %99 = vector.shape_cast %98 : vector<1x1x32xf32> to vector<1x32xf32>
    %100 = vector.extract_strided_slice %3 {offsets = [1, 0, 0], sizes = [1, 1, 32], strides = [1, 1, 1]} : vector<4x1x32xf32> to vector<1x1x32xf32>
    %101 = vector.shape_cast %100 : vector<1x1x32xf32> to vector<1x32xf32>
    %cst_42 = arith.constant dense<0.000000e+00> : vector<8xf32>
    %102 = vector.multi_reduction <add>, %97, %cst_42 [1] : vector<8x32xf32> to vector<8xf32>
    %103 = vector.shape_cast %102 : vector<8xf32> to vector<8x1xf32>
    %cst_43 = arith.constant 3.200000e+01 : f32
    %104 = vector.broadcast %cst_43 : f32 to vector<8x1xf32>
    %105 = arith.divf %103, %104 : vector<8x1xf32>
    %106 = vector.broadcast %105 : vector<8x1xf32> to vector<8x32xf32>
    %107 = arith.subf %97, %106 : vector<8x32xf32>
    %108 = arith.mulf %107, %107 : vector<8x32xf32>
    %cst_44 = arith.constant dense<0.000000e+00> : vector<8xf32>
    %109 = vector.multi_reduction <add>, %108, %cst_44 [1] : vector<8x32xf32> to vector<8xf32>
    %110 = vector.shape_cast %109 : vector<8xf32> to vector<8x1xf32>
    %cst_45 = arith.constant 3.200000e+01 : f32
    %111 = vector.broadcast %cst_45 : f32 to vector<8x1xf32>
    %112 = arith.divf %110, %111 : vector<8x1xf32>
    %113 = vector.broadcast %105 : vector<8x1xf32> to vector<8x32xf32>
    %114 = arith.subf %97, %113 : vector<8x32xf32>
    %cst_46 = arith.constant 9.99999974E-6 : f32
    %115 = vector.broadcast %cst_46 : f32 to vector<8x1xf32>
    %116 = arith.addf %112, %115 : vector<8x1xf32>
    %117 = math.rsqrt %116 : vector<8x1xf32>
    %118 = vector.broadcast %117 : vector<8x1xf32> to vector<8x32xf32>
    %119 = arith.mulf %114, %118 : vector<8x32xf32>
    %120 = vector.broadcast %99 : vector<1x32xf32> to vector<8x32xf32>
    %121 = arith.mulf %119, %120 : vector<8x32xf32>
    %122 = vector.broadcast %101 : vector<1x32xf32> to vector<8x32xf32>
    %123 = arith.addf %121, %122 : vector<8x32xf32>
    %124 = arith.truncf %123 : vector<8x32xf32> to vector<8x32xbf16>
    %c0_47 = arith.constant 0 : index
    %c0_48 = arith.constant 0 : index
    %125 = vector.load %arg12[%c0_47, %c0_48] : memref<32x32xbf16, #tpu.memory_space<vmem>>, vector<32x32xbf16>
    %cst_49 = arith.constant dense<0.000000e+00> : vector<8x32xf32>
    %126 = tpu.matmul %124, %125, %cst_49 {dimension_numbers = #tpu.dot_dimension_numbers<[1], [0], [0], [1], [0, 0, 1, 1], [], []>} : vector<8x32xbf16>, vector<32x32xbf16>, vector<8x32xf32> -> vector<8x32xf32>
    %c0_50 = arith.constant 0 : index
    %c0_51 = arith.constant 0 : index
    %127 = vector.load %arg13[%c0_50, %c0_51] : memref<1x32xf32, #tpu.memory_space<vmem>>, vector<1x32xf32>
    %128 = vector.broadcast %127 : vector<1x32xf32> to vector<8x32xf32>
    %129 = arith.addf %126, %128 : vector<8x32xf32>
    %130 = vector.extract_strided_slice %129 {offsets = [0, 0], sizes = [8, 8], strides = [1, 1]} : vector<8x32xf32> to vector<8x8xf32>
    %131 = vector.extract_strided_slice %129 {offsets = [0, 8], sizes = [8, 8], strides = [1, 1]} : vector<8x32xf32> to vector<8x8xf32>
    %132 = vector.extract_strided_slice %129 {offsets = [0, 16], sizes = [8, 8], strides = [1, 1]} : vector<8x32xf32> to vector<8x8xf32>
    %133 = vector.extract_strided_slice %129 {offsets = [0, 24], sizes = [8, 8], strides = [1, 1]} : vector<8x32xf32> to vector<8x8xf32>
    %134 = vector.shape_cast %130 : vector<8x8xf32> to vector<1x8x8xf32>
    %135 = vector.shape_cast %131 : vector<8x8xf32> to vector<1x8x8xf32>
    %136 = vector.shape_cast %132 : vector<8x8xf32> to vector<1x8x8xf32>
    %137 = vector.shape_cast %133 : vector<8x8xf32> to vector<1x8x8xf32>
    %138 = tpu.concatenate %134, %135, %136, %137 in 0 : vector<1x8x8xf32>, vector<1x8x8xf32>, vector<1x8x8xf32>, vector<1x8x8xf32> -> vector<4x8x8xf32>
    %139 = arith.truncf %138 : vector<4x8x8xf32> to vector<4x8x8xbf16>
    %cst_52 = arith.constant 0xFF800000 : f32
    %140 = vector.broadcast %cst_52 : f32 to vector<4x8x1xf32>
    %cst_53 = arith.constant 0.000000e+00 : f32
    %141 = vector.broadcast %cst_53 : f32 to vector<4x8x1xf32>
    %cst_54 = arith.constant 0.000000e+00 : f32
    %142 = vector.broadcast %cst_54 : f32 to vector<4x8x8xf32>
    %c0_55 = arith.constant 0 : index
    %c0_56 = arith.constant 0 : index
    %c0_57 = arith.constant 0 : index
    %c0_58 = arith.constant 0 : index
    %143 = vector.load %arg26[%c0_55, %c0_56, %c0_57, %c0_58] : memref<2x4x8x8xbf16, #tpu.memory_space<vmem>>, vector<1x4x8x8xbf16>
    %144 = vector.shape_cast %143 : vector<1x4x8x8xbf16> to vector<4x8x8xbf16>
    %c1_59 = arith.constant 1 : index
    %c0_60 = arith.constant 0 : index
    %c0_61 = arith.constant 0 : index
    %c0_62 = arith.constant 0 : index
    %145 = vector.load %arg26[%c1_59, %c0_60, %c0_61, %c0_62] : memref<2x4x8x8xbf16, #tpu.memory_space<vmem>>, vector<1x4x8x8xbf16>
    %146 = vector.shape_cast %145 : vector<1x4x8x8xbf16> to vector<4x8x8xbf16>
    "tpu.trace_start"() <{level = 10 : i32, message = "hqd,hkd->hqk"}> : () -> ()
    %cst_63 = arith.constant dense<0.000000e+00> : vector<4x8x8xf32>
    %147 = tpu.matmul %139, %144, %cst_63 {dimension_numbers = #tpu.dot_dimension_numbers<[2], [2], [1], [1], [0, 0, 0, 1, 1, 1], [0], [0]>} : vector<4x8x8xbf16>, vector<4x8x8xbf16>, vector<4x8x8xf32> -> vector<4x8x8xf32>
    "tpu.trace_stop"() : () -> ()
    %c0_64 = arith.constant 0 : index
    %c0_65 = arith.constant 0 : index
    %c0_66 = arith.constant 0 : index
    %148 = vector.load %arg5[%c0_64, %c0_65, %c0_66] : memref<1x1x8xi8, #tpu.memory_space<vmem>>, vector<1x1x8xi8>
    %149 = vector.shape_cast %148 : vector<1x1x8xi8> to vector<1x8xi8>
    %c0_i8_67 = arith.constant 0 : i8
    %150 = vector.broadcast %c0_i8_67 : i8 to vector<1x8xi8>
    %151 = arith.cmpi ne, %149, %150 : vector<1x8xi8>
    %152 = vector.shape_cast %151 : vector<1x8xi1> to vector<1x1x8xi1>
    %cst_68 = arith.constant -1.000000e+09 : f32
    %153 = vector.shape_cast %152 : vector<1x1x8xi1> to vector<1x1x8xi1>
    %154 = vector.broadcast %153 : vector<1x1x8xi1> to vector<4x8x8xi1>
    %155 = vector.broadcast %cst_68 : f32 to vector<4x8x8xf32>
    %156 = arith.select %154, %147, %155 : vector<4x8x8xi1>, vector<4x8x8xf32>
    %cst_69 = arith.constant dense<0xFF800000> : vector<4x8xf32>
    %157 = vector.multi_reduction <maximumf>, %156, %cst_69 [2] : vector<4x8x8xf32> to vector<4x8xf32>
    %158 = vector.shape_cast %157 : vector<4x8xf32> to vector<4x8x1xf32>
    %159 = arith.maximumf %140, %158 : vector<4x8x1xf32>
    %160 = arith.subf %140, %159 : vector<4x8x1xf32>
    %161 = math.exp %160 : vector<4x8x1xf32>
    %162 = vector.broadcast %159 : vector<4x8x1xf32> to vector<4x8x8xf32>
    %163 = arith.subf %156, %162 : vector<4x8x8xf32>
    %164 = math.exp %163 : vector<4x8x8xf32>
    %165 = arith.mulf %161, %141 : vector<4x8x1xf32>
    %cst_70 = arith.constant dense<0.000000e+00> : vector<4x8xf32>
    %166 = vector.multi_reduction <add>, %164, %cst_70 [2] : vector<4x8x8xf32> to vector<4x8xf32>
    %167 = vector.shape_cast %166 : vector<4x8xf32> to vector<4x8x1xf32>
    %168 = arith.addf %165, %167 : vector<4x8x1xf32>
    %169 = vector.broadcast %161 : vector<4x8x1xf32> to vector<4x8x8xf32>
    %170 = arith.mulf %169, %142 : vector<4x8x8xf32>
    %171 = arith.truncf %164 : vector<4x8x8xf32> to vector<4x8x8xbf16>
    "tpu.trace_start"() <{level = 10 : i32, message = "hqk,hkd->hqd"}> : () -> ()
    %cst_71 = arith.constant dense<0.000000e+00> : vector<4x8x8xf32>
    %172 = tpu.matmul %171, %146, %cst_71 {dimension_numbers = #tpu.dot_dimension_numbers<[2], [1], [1], [2], [0, 0, 0, 1, 1, 2], [0], [0]>} : vector<4x8x8xbf16>, vector<4x8x8xbf16>, vector<4x8x8xf32> -> vector<4x8x8xf32>
    "tpu.trace_stop"() : () -> ()
    %173 = arith.addf %170, %172 : vector<4x8x8xf32>
    %174 = tpu.reciprocal %168 {approx = true} : vector<4x8x1xf32> -> vector<4x8x1xf32>
    %175 = vector.broadcast %174 : vector<4x8x1xf32> to vector<4x8x8xf32>
    %176 = arith.mulf %173, %175 : vector<4x8x8xf32>
    %177 = arith.truncf %176 : vector<4x8x8xf32> to vector<4x8x8xbf16>
    %c0_72 = arith.constant 0 : index
    %c0_73 = arith.constant 0 : index
    %c0_74 = arith.constant 0 : index
    %178 = vector.load %arg16[%c0_72, %c0_73, %c0_74] : memref<4x8x32xbf16, #tpu.memory_space<vmem>>, vector<4x8x32xbf16>
    "tpu.trace_start"() <{level = 10 : i32, message = "hqd,hde->hqe"}> : () -> ()
    %cst_75 = arith.constant dense<0.000000e+00> : vector<4x8x32xf32>
    %179 = tpu.matmul %177, %178, %cst_75 {dimension_numbers = #tpu.dot_dimension_numbers<[2], [1], [1], [2], [0, 0, 0, 1, 1, 2], [0], [0]>} : vector<4x8x8xbf16>, vector<4x8x32xbf16>, vector<4x8x32xf32> -> vector<4x8x32xf32>
    "tpu.trace_stop"() : () -> ()
    %cst_76 = arith.constant dense<0.000000e+00> : vector<8x32xf32>
    %180 = vector.multi_reduction <add>, %179, %cst_76 [0] : vector<4x8x32xf32> to vector<8x32xf32>
    %c0_77 = arith.constant 0 : index
    %c0_78 = arith.constant 0 : index
    %181 = vector.load %arg17[%c0_77, %c0_78] : memref<1x32xf32, #tpu.memory_space<vmem>>, vector<1x32xf32>
    %182 = vector.broadcast %181 : vector<1x32xf32> to vector<8x32xf32>
    %183 = arith.addf %180, %182 : vector<8x32xf32>
    %184 = arith.addf %183, %183 : vector<8x32xf32>
    %185 = vector.extract_strided_slice %2 {offsets = [2, 0, 0], sizes = [1, 1, 32], strides = [1, 1, 1]} : vector<4x1x32xf32> to vector<1x1x32xf32>
    %186 = vector.shape_cast %185 : vector<1x1x32xf32> to vector<1x32xf32>
    %187 = vector.extract_strided_slice %3 {offsets = [2, 0, 0], sizes = [1, 1, 32], strides = [1, 1, 1]} : vector<4x1x32xf32> to vector<1x1x32xf32>
    %188 = vector.shape_cast %187 : vector<1x1x32xf32> to vector<1x32xf32>
    %cst_79 = arith.constant dense<0.000000e+00> : vector<8xf32>
    %189 = vector.multi_reduction <add>, %184, %cst_79 [1] : vector<8x32xf32> to vector<8xf32>
    %190 = vector.shape_cast %189 : vector<8xf32> to vector<8x1xf32>
    %cst_80 = arith.constant 3.200000e+01 : f32
    %191 = vector.broadcast %cst_80 : f32 to vector<8x1xf32>
    %192 = arith.divf %190, %191 : vector<8x1xf32>
    %193 = vector.broadcast %192 : vector<8x1xf32> to vector<8x32xf32>
    %194 = arith.subf %184, %193 : vector<8x32xf32>
    %195 = arith.mulf %194, %194 : vector<8x32xf32>
    %cst_81 = arith.constant dense<0.000000e+00> : vector<8xf32>
    %196 = vector.multi_reduction <add>, %195, %cst_81 [1] : vector<8x32xf32> to vector<8xf32>
    %197 = vector.shape_cast %196 : vector<8xf32> to vector<8x1xf32>
    %cst_82 = arith.constant 3.200000e+01 : f32
    %198 = vector.broadcast %cst_82 : f32 to vector<8x1xf32>
    %199 = arith.divf %197, %198 : vector<8x1xf32>
    %200 = vector.broadcast %192 : vector<8x1xf32> to vector<8x32xf32>
    %201 = arith.subf %184, %200 : vector<8x32xf32>
    %cst_83 = arith.constant 9.99999974E-6 : f32
    %202 = vector.broadcast %cst_83 : f32 to vector<8x1xf32>
    %203 = arith.addf %199, %202 : vector<8x1xf32>
    %204 = math.rsqrt %203 : vector<8x1xf32>
    %205 = vector.broadcast %204 : vector<8x1xf32> to vector<8x32xf32>
    %206 = arith.mulf %201, %205 : vector<8x32xf32>
    %207 = vector.broadcast %186 : vector<1x32xf32> to vector<8x32xf32>
    %208 = arith.mulf %206, %207 : vector<8x32xf32>
    %209 = vector.broadcast %188 : vector<1x32xf32> to vector<8x32xf32>
    %210 = arith.addf %208, %209 : vector<8x32xf32>
    %211 = arith.truncf %210 : vector<8x32xf32> to vector<8x32xbf16>
    %c0_84 = arith.constant 0 : index
    %c0_85 = arith.constant 0 : index
    %212 = vector.load %arg18[%c0_84, %c0_85] : memref<32x64xbf16, #tpu.memory_space<vmem>>, vector<32x64xbf16>
    %cst_86 = arith.constant dense<0.000000e+00> : vector<8x64xf32>
    %213 = tpu.matmul %211, %212, %cst_86 {dimension_numbers = #tpu.dot_dimension_numbers<[1], [0], [0], [1], [0, 0, 1, 1], [], []>} : vector<8x32xbf16>, vector<32x64xbf16>, vector<8x64xf32> -> vector<8x64xf32>
    %c0_87 = arith.constant 0 : index
    %c0_88 = arith.constant 0 : index
    %214 = vector.load %arg19[%c0_87, %c0_88] : memref<1x64xf32, #tpu.memory_space<vmem>>, vector<1x64xf32>
    %215 = vector.broadcast %214 : vector<1x64xf32> to vector<8x64xf32>
    %216 = arith.addf %213, %215 : vector<8x64xf32>
    %cst_89 = arith.constant 0.000000e+00 : f32
    %217 = vector.broadcast %cst_89 : f32 to vector<8x64xf32>
    %218 = arith.maximumf %216, %217 : vector<8x64xf32>
    %219 = arith.truncf %218 : vector<8x64xf32> to vector<8x64xbf16>
    %c0_90 = arith.constant 0 : index
    %c0_91 = arith.constant 0 : index
    %220 = vector.load %arg20[%c0_90, %c0_91] : memref<64x32xbf16, #tpu.memory_space<vmem>>, vector<64x32xbf16>
    %cst_92 = arith.constant dense<0.000000e+00> : vector<8x32xf32>
    %221 = tpu.matmul %219, %220, %cst_92 {dimension_numbers = #tpu.dot_dimension_numbers<[1], [0], [0], [1], [0, 0, 1, 1], [], []>} : vector<8x64xbf16>, vector<64x32xbf16>, vector<8x32xf32> -> vector<8x32xf32>
    %c0_93 = arith.constant 0 : index
    %c0_94 = arith.constant 0 : index
    %222 = vector.load %arg21[%c0_93, %c0_94] : memref<1x32xf32, #tpu.memory_space<vmem>>, vector<1x32xf32>
    %223 = vector.broadcast %222 : vector<1x32xf32> to vector<8x32xf32>
    %224 = arith.addf %221, %223 : vector<8x32xf32>
    %225 = arith.addf %224, %224 : vector<8x32xf32>
    %226 = vector.extract_strided_slice %2 {offsets = [3, 0, 0], sizes = [1, 1, 32], strides = [1, 1, 1]} : vector<4x1x32xf32> to vector<1x1x32xf32>
    %227 = vector.shape_cast %226 : vector<1x1x32xf32> to vector<1x32xf32>
    %228 = vector.extract_strided_slice %3 {offsets = [3, 0, 0], sizes = [1, 1, 32], strides = [1, 1, 1]} : vector<4x1x32xf32> to vector<1x1x32xf32>
    %229 = vector.shape_cast %228 : vector<1x1x32xf32> to vector<1x32xf32>
    %cst_95 = arith.constant dense<0.000000e+00> : vector<8xf32>
    %230 = vector.multi_reduction <add>, %225, %cst_95 [1] : vector<8x32xf32> to vector<8xf32>
    %231 = vector.shape_cast %230 : vector<8xf32> to vector<8x1xf32>
    %cst_96 = arith.constant 3.200000e+01 : f32
    %232 = vector.broadcast %cst_96 : f32 to vector<8x1xf32>
    %233 = arith.divf %231, %232 : vector<8x1xf32>
    %234 = vector.broadcast %233 : vector<8x1xf32> to vector<8x32xf32>
    %235 = arith.subf %225, %234 : vector<8x32xf32>
    %236 = arith.mulf %235, %235 : vector<8x32xf32>
    %cst_97 = arith.constant dense<0.000000e+00> : vector<8xf32>
    %237 = vector.multi_reduction <add>, %236, %cst_97 [1] : vector<8x32xf32> to vector<8xf32>
    %238 = vector.shape_cast %237 : vector<8xf32> to vector<8x1xf32>
    %cst_98 = arith.constant 3.200000e+01 : f32
    %239 = vector.broadcast %cst_98 : f32 to vector<8x1xf32>
    %240 = arith.divf %238, %239 : vector<8x1xf32>
    %241 = vector.broadcast %233 : vector<8x1xf32> to vector<8x32xf32>
    %242 = arith.subf %225, %241 : vector<8x32xf32>
    %cst_99 = arith.constant 9.99999974E-6 : f32
    %243 = vector.broadcast %cst_99 : f32 to vector<8x1xf32>
    %244 = arith.addf %240, %243 : vector<8x1xf32>
    %245 = math.rsqrt %244 : vector<8x1xf32>
    %246 = vector.broadcast %245 : vector<8x1xf32> to vector<8x32xf32>
    %247 = arith.mulf %242, %246 : vector<8x32xf32>
    %248 = vector.broadcast %227 : vector<1x32xf32> to vector<8x32xf32>
    %249 = arith.mulf %247, %248 : vector<8x32xf32>
    %250 = vector.broadcast %229 : vector<1x32xf32> to vector<8x32xf32>
    %251 = arith.addf %249, %250 : vector<8x32xf32>
    %c0_100 = arith.constant 0 : index
    %c0_101 = arith.constant 0 : index
    %c0_102 = arith.constant 0 : index
    %252 = vector.load %arg24[%c0_100, %c0_101, %c0_102] : memref<1x8x32xf32, #tpu.memory_space<vmem>>, vector<1x8x32xf32>
    %253 = vector.shape_cast %252 : vector<1x8x32xf32> to vector<8x32xf32>
    %254 = vector.shape_cast %251 : vector<8x32xf32> to vector<1x8x32xf32>
    tpu.vector_store %arg24[%c0_100, %c0_101, %c0_102], %254 {strides = array<i32>} : memref<1x8x32xf32, #tpu.memory_space<vmem>>, vector<1x8x32xf32>,
    return
  }
  func.func @transform_0(%arg0: i32, %arg1: i32) -> (i32, i32, i32) {
    %c0_i32 = arith.constant 0 : i32
    %c0_i32_0 = arith.constant 0 : i32
    %c0_i32_1 = arith.constant 0 : i32
    return %arg0, %c0_i32, %c0_i32_0 : i32, i32, i32
  }
  func.func @transform_1(%arg0: i32, %arg1: i32) -> (i32, i32, i32) {
    %c0_i32 = arith.constant 0 : i32
    %c0_i32_0 = arith.constant 0 : i32
    %c0_i32_1 = arith.constant 0 : i32
    return %arg0, %c0_i32, %c0_i32_0 : i32, i32, i32
  }
  func.func @transform_2(%arg0: i32, %arg1: i32) -> (i32, i32, i32) {
    %c0_i32 = arith.constant 0 : i32
    %c0_i32_0 = arith.constant 0 : i32
    return %arg0, %arg1, %c0_i32 : i32, i32, i32
  }
  func.func @transform_3(%arg0: i32, %arg1: i32) -> (i32, i32, i32) {
    %c0_i32 = arith.constant 0 : i32
    %c0_i32_0 = arith.constant 0 : i32
    %c0_i32_1 = arith.constant 0 : i32
    return %arg0, %c0_i32, %c0_i32_0 : i32, i32, i32
  }
  func.func @transform_4(%arg0: i32, %arg1: i32) -> (i32, i32) {
    %c0_i32 = arith.constant 0 : i32
    %c0_i32_0 = arith.constant 0 : i32
    %c0_i32_1 = arith.constant 0 : i32
    return %c0_i32, %c0_i32_0 : i32, i32
  }
  func.func @transform_5(%arg0: i32, %arg1: i32) -> (i32, i32) {
    %c0_i32 = arith.constant 0 : i32
    %c0_i32_0 = arith.constant 0 : i32
    %c0_i32_1 = arith.constant 0 : i32
    return %c0_i32, %c0_i32_0 : i32, i32
  }
  func.func @transform_6(%arg0: i32, %arg1: i32) -> (i32, i32) {
    %c0_i32 = arith.constant 0 : i32
    %c0_i32_0 = arith.constant 0 : i32
    %c0_i32_1 = arith.constant 0 : i32
    return %c0_i32, %c0_i32_0 : i32, i32
  }
  func.func @transform_7(%arg0: i32, %arg1: i32) -> (i32, i32) {
    %c0_i32 = arith.constant 0 : i32
    %c0_i32_0 = arith.constant 0 : i32
    %c0_i32_1 = arith.constant 0 : i32
    return %c0_i32, %c0_i32_0 : i32, i32
  }
  func.func @transform_8(%arg0: i32, %arg1: i32) -> (i32, i32, i32) {
    %c0_i32 = arith.constant 0 : i32
    %c0_i32_0 = arith.constant 0 : i32
    %c0_i32_1 = arith.constant 0 : i32
    %c0_i32_2 = arith.constant 0 : i32
    return %c0_i32, %c0_i32_0, %c0_i32_1 : i32, i32, i32
  }
  func.func @transform_9(%arg0: i32, %arg1: i32) -> (i32, i32) {
    %c0_i32 = arith.constant 0 : i32
    %c0_i32_0 = arith.constant 0 : i32
    %c0_i32_1 = arith.constant 0 : i32
    return %c0_i32, %c0_i32_0 : i32, i32
  }
  func.func @transform_10(%arg0: i32, %arg1: i32) -> (i32, i32) {
    %c0_i32 = arith.constant 0 : i32
    %c0_i32_0 = arith.constant 0 : i32
    %c0_i32_1 = arith.constant 0 : i32
    return %c0_i32, %c0_i32_0 : i32, i32
  }
  func.func @transform_11(%arg0: i32, %arg1: i32) -> (i32, i32) {
    %c0_i32 = arith.constant 0 : i32
    %c0_i32_0 = arith.constant 0 : i32
    %c0_i32_1 = arith.constant 0 : i32
    return %c0_i32, %c0_i32_0 : i32, i32
  }
  func.func @transform_12(%arg0: i32, %arg1: i32) -> (i32, i32) {
    %c0_i32 = arith.constant 0 : i32
    %c0_i32_0 = arith.constant 0 : i32
    %c0_i32_1 = arith.constant 0 : i32
    return %c0_i32, %c0_i32_0 : i32, i32
  }
  func.func @transform_13(%arg0: i32, %arg1: i32) -> (i32, i32) {
    %c0_i32 = arith.constant 0 : i32
    %c0_i32_0 = arith.constant 0 : i32
    %c0_i32_1 = arith.constant 0 : i32
    return %c0_i32, %c0_i32_0 : i32, i32
  }
  func.func @transform_14(%arg0: i32, %arg1: i32) -> (i32, i32, i32) {
    %c0_i32 = arith.constant 0 : i32
    %c0_i32_0 = arith.constant 0 : i32
    %c0_i32_1 = arith.constant 0 : i32
    %c0_i32_2 = arith.constant 0 : i32
    return %c0_i32, %c0_i32_0, %c0_i32_1 : i32, i32, i32
  }
  func.func @transform_15(%arg0: i32, %arg1: i32) -> (i32, i32) {
    %c0_i32 = arith.constant 0 : i32
    %c0_i32_0 = arith.constant 0 : i32
    %c0_i32_1 = arith.constant 0 : i32
    return %c0_i32, %c0_i32_0 : i32, i32
  }
  func.func @transform_16(%arg0: i32, %arg1: i32) -> (i32, i32) {
    %c0_i32 = arith.constant 0 : i32
    %c0_i32_0 = arith.constant 0 : i32
    %c0_i32_1 = arith.constant 0 : i32
    return %c0_i32, %c0_i32_0 : i32, i32
  }
  func.func @transform_17(%arg0: i32, %arg1: i32) -> (i32, i32) {
    %c0_i32 = arith.constant 0 : i32
    %c0_i32_0 = arith.constant 0 : i32
    %c0_i32_1 = arith.constant 0 : i32
    return %c0_i32, %c0_i32_0 : i32, i32
  }
  func.func @transform_18(%arg0: i32, %arg1: i32) -> (i32, i32) {
    %c0_i32 = arith.constant 0 : i32
    %c0_i32_0 = arith.constant 0 : i32
    %c0_i32_1 = arith.constant 0 : i32
    return %c0_i32, %c0_i32_0 : i32, i32
  }
  func.func @transform_19(%arg0: i32, %arg1: i32) -> (i32, i32) {
    %c0_i32 = arith.constant 0 : i32
    %c0_i32_0 = arith.constant 0 : i32
    %c0_i32_1 = arith.constant 0 : i32
    return %c0_i32, %c0_i32_0 : i32, i32
  }
  func.func @transform_20(%arg0: i32, %arg1: i32) -> (i32, i32, i32) {
    %c0_i32 = arith.constant 0 : i32
    %c0_i32_0 = arith.constant 0 : i32
    %c0_i32_1 = arith.constant 0 : i32
    %c0_i32_2 = arith.constant 0 : i32
    return %c0_i32, %c0_i32_0, %c0_i32_1 : i32, i32, i32
  }
  func.func @transform_21(%arg0: i32, %arg1: i32) -> (i32, i32, i32) {
    %c0_i32 = arith.constant 0 : i32
    %c0_i32_0 = arith.constant 0 : i32
    %c0_i32_1 = arith.constant 0 : i32
    %c0_i32_2 = arith.constant 0 : i32
    return %c0_i32, %c0_i32_0, %c0_i32_1 : i32, i32, i32
  }
  func.func @transform_22(%arg0: i32, %arg1: i32) -> (i32, i32, i32) {
    %c0_i32 = arith.constant 0 : i32
    %c0_i32_0 = arith.constant 0 : i32
    return %arg0, %arg1, %c0_i32 : i32, i32, i32
  }
}

</mosaic_0001>

<bundles_post_ra>
// kernel: tpu_custom_call.1
= control target key start
LH: loop header
LB: loop body
LE: loop exit
PB: predicated region body
PF: predicated region fallthrough
CT: control target
= control target key end

     0   :  { %s5139_s0 = inlined_call_operand.hbm [shape: bf16[2,8,32], index: 0, kind: input, shape index: {}]   ;;  %s5140_s1 = inlined_call_operand.hbm [shape: bf16[2,8,32], index: 1, kind: input, shape index: {}]   ;;  %s5141_s2 = inlined_call_operand.hbm [shape: s8[2,8,8], index: 2, kind: input, shape index: {}]   ;;  %s5142_s3 = inlined_call_operand.vmem [shape: s8[2,1,8], index: 3, kind: input, shape index: {}]   ;;  %s5143_s4 = inlined_call_operand.vmem [shape: bf16[32,32], index: 4, kind: input, shape index: {}]   ;;  %s5144_s5 = inlined_call_operand.hbm [shape: f32[1,32], index: 5, kind: input, shape index: {}]   ;;  %s5145_s6 = inlined_call_operand.vmem [shape: bf16[32,64], index: 6, kind: input, shape index: {}]   ;;  %s5146_s7 = inlined_call_operand.hbm [shape: f32[1,64], index: 7, kind: input, shape index: {}]   ;;  %s5147_s8 = inlined_call_operand.vmem [shape: bf16[4,8,32], index: 8, kind: input, shape index: {}]   ;;  %s5148_s9 = inlined_call_operand.hbm [shape: f32[1,32], index: 9, kind: input, shape index: {}]   ;;  %s5149_s10 = inlined_call_operand.vmem [shape: bf16[32,32], index: 10, kind: input, shape index: {}]   ;;  %s5150_s11 = inlined_call_operand.hbm [shape: f32[1,32], index: 11, kind: input, shape index: {}]   ;;  %s5151_s12 = inlined_call_operand.vmem [shape: bf16[32,64], index: 12, kind: input, shape index: {}]   ;;  %s5152_s13 = inlined_call_operand.hbm [shape: f32[1,64], index: 13, kind: input, shape index: {}]   ;;  %s5153_s14 = inlined_call_operand.hbm [shape: bf16[4,8,32], index: 14, kind: input, shape index: {}]   ;;  %s5154_s15 = inlined_call_operand.hbm [shape: f32[1,32], index: 15, kind: input, shape index: {}]   ;;  %s5155_s16 = inlined_call_operand.vmem [shape: bf16[32,64], index: 16, kind: input, shape index: {}]   ;;  %s5156_s17 = inlined_call_operand.hbm [shape: f32[1,64], index: 17, kind: input, shape index: {}]   ;;  %s5157_s18 = inlined_call_operand.vmem [shape: bf16[64,32], index: 18, kind: input, shape index: {}]   ;;  %s5158_s19 = inlined_call_operand.vmem [shape: f32[1,32], index: 19, kind: input, shape index: {}]   ;;  %s5159_s20 = inlined_call_operand.vmem [shape: f32[4,1,32], index: 20, kind: input, shape index: {}]   ;;  %s5160_s21 = inlined_call_operand.vmem [shape: f32[4,1,32], index: 21, kind: input, shape index: {}]   ;;  %s5161_s22 = inlined_call_operand.hbm [shape: f32[2,8,32], index: 22, kind: output, shape index: {}]  }
   0x1   :  { %5201 = sst [smem:[#allocation38_spill]] %s5139_s0 }
   0x2   :  { %5202 = sst [smem:[#allocation39_spill]] %s5140_s1 }
   0x3   :  { %5203 = sst [smem:[#allocation40_spill]] %s5141_s2 }
   0x4   :  { %5204 = sst [smem:[#allocation41_spill]] %s5142_s3 }
   0x5   :  { %5205 = sst [smem:[#allocation42_spill]] %s5143_s4 }
   0x6   :  { %5206 = sst [smem:[#allocation43_spill]] %s5144_s5 }
   0x7   :  { %5207 = sst [smem:[#allocation44_spill]] %s5145_s6 }
   0x8   :  { %5208 = sst [smem:[#allocation45_spill]] %s5146_s7 }
   0x9   :  { %5209 = sst [smem:[#allocation46_spill]] %s5147_s8 }
   0xa   :  { %5210 = sst [smem:[#allocation47_spill]] %s5148_s9 }
   0xb   :  { %5211 = sst [smem:[#allocation48_spill]] %s5149_s10 }
   0xc   :  { %5212 = sst [smem:[#allocation49_spill]] %s5150_s11 }
   0xd   :  { %5213 = sst [smem:[#allocation50_spill]] %s5151_s12 }
   0xe   :  { %5214 = sst [smem:[#allocation51_spill]] %s5152_s13 }
   0xf   :  { %5215 = sst [smem:[#allocation52_spill]] %s5154_s15 }
  0x10   :  { %5216 = sst [smem:[#allocation53_spill]] %s5155_s16 }
  0x11   :  { %5217 = sst [smem:[#allocation54_spill]] %s5157_s18 }
  0x12   :  { %5218 = sst [smem:[#allocation55_spill]] %s5158_s19 }
  0x13   :  { %5219 = sst [smem:[#allocation56_spill]] %s5159_s20 }
  0x14   :  { %5220 = sst [smem:[#allocation57_spill]] %s5160_s21 }
  0x15   :  { %5221 = sst [smem:[#allocation58_spill]] %s5161_s22 }
  0x16   :  { %27 = vsyncpa [#allocation5], 0 }
  0x17   :  { %29 = vsyncpa [#allocation5 + $0x1], 0 }
  0x18   :  { %30 = vsyncpa [#allocation8], 0 }
  0x19   :  { %32 = vsyncpa [#allocation8 + $0x1], 0 }
  0x1a   :  { %33 = vsyncpa [#allocation11], 0 }
  0x1b   :  { %34 = vsyncpa [#allocation14], 0 }
  0x1c   :  { %35 = vsyncpa [#allocation17], 0 }
  0x1d   :  { %36 = vsyncpa [#allocation20], 0 }
  0x1e   :  { %37 = vsyncpa [#allocation6], 0 }
  0x1f   :  { %39 = vsyncpa [#allocation6 + $0x1], 0  ;;  %s4321_s3 = smov 0   ;;  %s4323_s28 = smov 0  }
  0x20   :  { %s4325_s29 = smov 0   ;;  %s4327_s30 = smov 0  }
  0x21   :  { %s4329_s4 = smov 0   ;;  %s4331_s0 = smov 0  }
  0x22 LB: > { %5222 = sst [smem:[#allocation30_spill]] %s4160_s3  ;;  %s4352_s23 = sadd.s32 4294967295, %s4180_s0   ;;  %s4180_s0 = sphi %s4331_s0, %s45_s0   ;;  %s4176_s4 = sphi %s4329_s4, %s5298_s4   ;;  %s4172_s30 = sphi %s4327_s30, %s5297_s30   ;;  %s4168_s29 = sphi %s4325_s29, %s5296_s29   ;;  %s4164_s28 = sphi %s4323_s28, %s5295_s28   ;;  %s4160_s3 = sphi %s4321_s3, %s5294_s3  }
  0x23   : > { %5223 = sst [smem:[#allocation31_spill]] %s4168_s29  ;;  %p3166_p0 = scmp.ge.s32.totalorder %s4180_s0, 1 }
  0x24   : > { %5224 = sst [smem:[#allocation32_spill]] %s4172_s30  ;;  %p5173_p1 = scmp.eq.s32.totalorder %s4352_s23, 0 }
  0x25   : > { %5225 = sst [smem:[#allocation33_spill]] %s4180_s0  ;;  %p574_p2 = scmp.lt.s32.totalorder %s4180_s0, 3 }
  0x26   : > { %s4182_s5 = smov [#allocation10]   ;;  %s4183_s6 = smov [#allocation13]  }
  0x27   : > { %p4357_p3 = pnand %p3166_p0, %p574_p2  ;;  %s590_s24 = sshll.u32 %s4182_s5, 4  ;;  %s591_s24 = int_to_ptr.vmem [resolvable:$true] %s590_s24 }
  0x28   : > { %s618_s25 = sshll.u32 %s4183_s6, 4  ;;  %s4184_s2 = smov [#allocation16]   ;;  %s4370_s25 = int_to_ptr.vmem [resolvable:$true] %s618_s25 }
  0x29   : > { %s5226_s1 = scalar_select %p4357_p3, 1, 0 }
  0x2a   : > { %p3567_p5 = pneg %p4357_p3  ;;  %s646_s27 = sshll.u32 %s4184_s2, 4  ;;  %s4372_s27 = int_to_ptr.vmem [resolvable:$true] %s646_s27 }
  0x2b   : > { %s5228_s19 = sld [smem:[#allocation43_spill]] }
  0x2c   : > { %p4366_p6 = pnand %p3567_p5, %p5173_p1 }
  0x2e   : > { %s5227_s26 = scalar_select %p4366_p6, 1, 0 }
  0x2f   : > { %p4382_p8 = pneg %p4366_p6 }
  0x31   : > { %s3764_s18 = scalar_lea.hbm %s5228_s19, 16 }
  0x32   : > { %p3765_p7 = scmp.ne.s32.totalorder %s5228_s19, %s3764_s18  ;;  %p3771_p11 = scmp.lt.u32.totalorder %s3764_s18, %s5228_s19 }
  0x33   : > { %s5229_s6 = scalar_select %p4382_p8, 1, 0 }
  0x34   : > { %p3767_p9 = pnand %p4382_p8, %p3765_p7 }
  0x36   : > { %p3768_p10 = pneg %p3767_p9 }
  0x38   : > { %p3773_p12 = pnand %p3771_p11, %p3768_p10 }
  0x3a   : > { %3776 = shalt.err (!%p3773_p12)
}
  0x3b   : > { %s3777_s22 = scalar_lea.vmem %s591_s24, 16  ;;  %s3784_s16 = scalar_lea.vmem %s591_s24, 32 }
  0x3c   : > { %p3778_p13 = scmp.ne.s32.totalorder %s591_s24, %s3777_s22  ;;  %p3785_p5 = scmp.lt.s32.totalorder %s591_s24, %s591_s24 }
  0x3d   : > { %p3786_p4 = scmp.lt.s32.totalorder %s3784_s16, %s3777_s22 }
  0x3e   : > { %p3780_p0 = pnand %p3778_p13, %p4382_p8 }
  0x3f   : > { %p3787_p1 = por %p3786_p4, %p3785_p5 }
  0x40   : > { %p3781_p2 = pneg %p3780_p0 }
  0x42   : > { %p3788_p3 = pnand %p3787_p1, %p3781_p2 }
  0x44   : > { %3791 = shalt.err (!%p3788_p3)
}
  0x45   : > { %3570 = dma.hbm_to_vmem [thread:$0]  (!%p4366_p6), %s5228_s19, 16, %s591_s24, [#allocation11]  }
  0x46   : > { %s5230_s9 = sld [smem:[#allocation47_spill]] }
  0x4c   : > { %s3792_s2 = scalar_lea.hbm %s5230_s9, 16 }
  0x4d   : > { %p3793_p7 = scmp.ne.s32.totalorder %s5230_s9, %s3792_s2  ;;  %p3799_p1 = scmp.lt.u32.totalorder %s3792_s2, %s5230_s9 }
  0x4f   : > { %p3795_p9 = pnand %p3793_p7, %p4382_p8 }
  0x51   : > { %p3796_p4 = pneg %p3795_p9 }
  0x53   : > { %p3801_p3 = pnand %p3799_p1, %p3796_p4 }
  0x55   : > { %3804 = shalt.err (!%p3801_p3)
}
  0x56   : > { %s3805_s24 = scalar_lea.vmem %s4370_s25, 16  ;;  %s3812_s8 = scalar_lea.vmem %s4370_s25, 32 }
  0x57   : > { %p3806_p10 = scmp.ne.s32.totalorder %s4370_s25, %s3805_s24  ;;  %p3813_p13 = scmp.lt.s32.totalorder %s4370_s25, %s4370_s25 }
  0x58   : > { %p3814_p0 = scmp.lt.s32.totalorder %s3812_s8, %s3805_s24 }
  0x59   : > { %p3808_p11 = pnand %p3806_p10, %p4382_p8 }
  0x5a   : > { %p3815_p2 = por %p3814_p0, %p3813_p13 }
  0x5b   : > { %p3809_p12 = pneg %p3808_p11 }
  0x5d   : > { %p3816_p5 = pnand %p3815_p2, %p3809_p12 }
  0x5f   : > { %3819 = shalt.err (!%p3816_p5)
}
  0x60   : > { %3576 = dma.hbm_to_vmem [thread:$0]  (!%p4366_p6), %s5230_s9, 16, %s4370_s25, [#allocation14]  }
  0x61   : > { %s5231_s13 = sld [smem:[#allocation51_spill]] }
  0x67   : > { %s3820_s18 = scalar_lea.hbm %s5231_s13, 16 }
  0x68   : > { %p3821_p7 = scmp.ne.s32.totalorder %s5231_s13, %s3820_s18  ;;  %p3827_p1 = scmp.lt.u32.totalorder %s3820_s18, %s5231_s13 }
  0x6a   : > { %p3823_p9 = pnand %p3821_p7, %p4382_p8 }
  0x6c   : > { %p3824_p4 = pneg %p3823_p9 }
  0x6e   : > { %p3829_p3 = pnand %p3827_p1, %p3824_p4 }
  0x70   : > { %3832 = shalt.err (!%p3829_p3)
}
  0x71   : > { %s3833_s25 = scalar_lea.vmem %s4372_s27, 16  ;;  %s3840_s8 = scalar_lea.vmem %s4372_s27, 32 }
  0x72   : > { %p3834_p10 = scmp.ne.s32.totalorder %s4372_s27, %s3833_s25  ;;  %p3841_p13 = scmp.lt.s32.totalorder %s4372_s27, %s4372_s27 }
  0x73   : > { %p3842_p0 = scmp.lt.s32.totalorder %s3840_s8, %s3833_s25 }
  0x74   : > { %p3836_p11 = pnand %p3834_p10, %p4382_p8 }
  0x75   : > { %p3843_p2 = por %p3842_p0, %p3841_p13 }
  0x76   : > { %p3837_p12 = pneg %p3836_p11 }
  0x78   : > { %p3844_p5 = pnand %p3843_p2, %p3837_p12 }
  0x7a   : > { %3847 = shalt.err (!%p3844_p5)
}
  0x7b   : > { %3582 = dma.hbm_to_vmem [thread:$0]  (!%p4366_p6), %s5231_s13, 16, %s4372_s27, [#allocation17]  }
  0x7c   : > { %s4185_s5 = smov [#allocation19]   ;;  %s5232_s15 = sld [smem:[#allocation52_spill]] }
  0x7d   : > { %s670_s10 = sshll.u32 %s4185_s5, 4  ;;  %s671_s10 = int_to_ptr.vmem [resolvable:$true] %s670_s10 }
  0x82   : > { %s3848_s22 = scalar_lea.hbm %s5232_s15, 16 }
  0x83   : > { %p3849_p7 = scmp.ne.s32.totalorder %s5232_s15, %s3848_s22  ;;  %p3855_p1 = scmp.lt.u32.totalorder %s3848_s22, %s5232_s15 }
  0x85   : > { %p3851_p9 = pnand %p3849_p7, %p4382_p8 }
  0x87   : > { %p3852_p4 = pneg %p3851_p9 }
  0x89   : > { %p3857_p3 = pnand %p3855_p1, %p3852_p4 }
  0x8b   : > { %3860 = shalt.err (!%p3857_p3)
}
  0x8c   : > { %s3861_s27 = scalar_lea.vmem %s671_s10, 16  ;;  %s3868_s12 = scalar_lea.vmem %s671_s10, 32 }
  0x8d   : > { %p3862_p10 = scmp.ne.s32.totalorder %s671_s10, %s3861_s27  ;;  %p3869_p13 = scmp.lt.s32.totalorder %s671_s10, %s671_s10 }
  0x8e   : > { %p3870_p0 = scmp.lt.s32.totalorder %s3868_s12, %s3861_s27 }
  0x8f   : > { %p3864_p11 = pnand %p3862_p10, %p4382_p8 }
  0x90   : > { %p3871_p2 = por %p3870_p0, %p3869_p13 }
  0x91   : > { %p3865_p12 = pneg %p3864_p11 }
  0x93   : > { %p3872_p5 = pnand %p3871_p2, %p3865_p12 }
  0x95   : > { %3875 = shalt.err (!%p3872_p5)
}
  0x96   : > { %3588 = dma.hbm_to_vmem [thread:$0]  (!%p4366_p6), %s5232_s15, 16, %s671_s10, [#allocation20]  }
  0x97   : > { %s3165_s18 = sadd.s32 4294967294, %s4180_s0   ;;  %s57_s2 = sadd.s32 1, %s4176_s4 }
  0x98   : > { %p59_p7 = scmp.ge.s32.totalorder %s57_s2, 2  ;;  %s64_s22 = sadd.s32 1, %s4168_s29 }
  0x99   : > { %p71_p9 = scmp.ne.s32.totalorder %s4168_s29, %s4164_s28  ;;  %p72_p4 = scmp.eq.s32.totalorder %s4180_s0, 0 }
  0x9a   : > { %s5300_s2 = smov (%p59_p7, %s57_s2), 0  ;;  %p77_p3 = scmp.ne.s32.totalorder %s4164_s28, %s4160_s3 }
  0x9b   : > { %5233 = sst [smem:[#allocation34_spill]] %s5300_s2  ;;  %p4472_p1 = por %p72_p4, %p71_p9 }
  0x9c   : > { %s61_s10 = ssub.s32 %s4176_s4, %s5300_s2  ;;  %p561_p10 = scmp.eq.s32.totalorder %s4352_s23, 1 }
  0x9d   : > { %p62_p11 = scmp.eq.s32.totalorder %s61_s10, 0  ;;  %p5235_p12 = scmp.eq.s32.totalorder %s4352_s23, 0 }
  0x9e   : > { %p4487_p0 = por %p561_p10, %p71_p9  ;;  %p567_p2 = scmp.eq.s32.totalorder %s3165_s18, 1 }
  0x9f   : > { %p4483_p13 = por %p5235_p12, %p77_p3  ;;  %p3614_p7 = scmp.lt.s32.totalorder %s4180_s0, 2 }
  0xa0   : > { %s5237_s25 = scalar_select %p4487_p0, 1, 0 }
  0xa1   : > { %s5236_s24 = scalar_select %p4483_p13, 1, 0 }
  0xa2   : > { %5238 = sst [smem:[#allocation35_spill]] %s5237_s25  ;;  %p4494_p5 = por %p567_p2, %p77_p3 }
  0xa3   : > { %s4492_s8 = scalar_select %p62_p11, %s4168_s29, %s64_s22  }
  0xa4   : > { %s5240_s27 = scalar_select %p4494_p5, 1, 0 }
  0xa5   : > { %5239 = sst [smem:[#allocation36_spill]] %s4492_s8  ;;  %s4500_s12 = sand.u32 1, %s4168_s29  }
  0xa6   : > { %5241 = sst [smem:[#allocation37_spill]] %s5240_s27  ;;  %s5181_s30 = sshll.u32 %s4176_s4, 6 }
  0xa7   : > { %s5180_s5 = sshll.u32 %s4500_s12, 2  ;;  %p4506_p4 = pnand %p3614_p7, %p4472_p1 }
  0xa8   : > { %s725_s18 = sand.u32 1, %s4180_s0   ;;  %s5243_s13 = sld [smem:[#allocation39_spill]] }
  0xa9   : > { %s5242_s10 = scalar_select %p4506_p4, 1, 0 }
  0xaa   : > { %s729_s19 = scalar_lea.vmem [#allocation7], %s5180_s5  ;;  %s4522_s16 = scalar_lea.sflag [#allocation8], %s725_s18 }
  0xab   : > { %s736_s2 = sshll.u32 %s729_s19, 4  ;;  %p4528_p1 = pneg %p4506_p4  ;;  %s4520_s2 = int_to_ptr.vmem [resolvable:$true] %s736_s2 }
  0xad   : > { %s5244_s29 = scalar_select %p4528_p1, 1, 0 }
  0xae   : > { %s4516_s15 = scalar_lea.hbm %s5243_s13, %s5181_s30  ;;  %s3881_s5 = scalar_lea.hbm %s5243_s13, 128 }
  0xaf   : > { %s3876_s8 = scalar_lea.hbm %s4516_s15, 64  ;;  %p3882_p11 = scmp.lt.u32.totalorder %s4516_s15, %s5243_s13 }
  0xb0   : > { %p3877_p9 = scmp.ne.s32.totalorder %s4516_s15, %s3876_s8  ;;  %p3883_p12 = scmp.lt.u32.totalorder %s3881_s5, %s3876_s8 }
  0xb1   : > { %p3885_p7 = scmp.lt.u32.totalorder %s3876_s8, %s4516_s15 }
  0xb2   : > { %p3879_p3 = pnand %p4528_p1, %p3877_p9  ;;  %p3884_p2 = por %p3883_p12, %p3882_p11 }
  0xb4   : > { %p3880_p10 = pneg %p3879_p3  ;;  %p3886_p5 = por %p3885_p7, %p3884_p2 }
  0xb6   : > { %p3887_p0 = pnand %p3886_p5, %p3880_p10 }
  0xb8   : > { %3890 = shalt.err (!%p3887_p0)
}
  0xb9   : > { %s3891_s18 = scalar_lea.vmem %s4520_s2, 64  ;;  %s4186_s9 = smov [#allocation7]  }
  0xba   : > { %p3892_p9 = scmp.ne.s32.totalorder %s4520_s2, %s3891_s18  ;;  %s3896_s22 = sshll.u32 %s4186_s9, 4  ;;  %s3897_s22 = int_to_ptr.vmem [resolvable:$false] %s3896_s22 }
  0xbb   : > { %s3898_s30 = scalar_lea.vmem %s3897_s22, 128  ;;  %p3899_p6 = scmp.lt.s32.totalorder %s4520_s2, %s3897_s22 }
  0xbc   : > { %p3894_p3 = pnand %p3892_p9, %p4528_p1  ;;  %p3900_p8 = scmp.lt.s32.totalorder %s3898_s30, %s3891_s18 }
  0xbe   : > { %p3895_p13 = pneg %p3894_p3  ;;  %p3901_p11 = por %p3900_p8, %p3899_p6 }
  0xc0   : > { %p3902_p12 = pnand %p3901_p11, %p3895_p13 }
  0xc2   : > { %3905 = shalt.err (!%p3902_p12)
}
  0xc3   : > { %3598 = dma.hbm_to_vmem [thread:$0]  (!%p4506_p4), %s4516_s15, 64, %s4520_s2, %s4522_s16  }
  0xc4   : > { %s4187_s8 = smov [#allocation12]   ;;  %s4188_s19 = smov [#allocation15]  }
  0xc5   : > { %s604_s5 = sshll.u32 %s4187_s8, 4  ;;  %s632_s13 = sshll.u32 %s4188_s19, 4  ;;  %s605_s5 = int_to_ptr.vmem [resolvable:$true] %s604_s5  ;;  %s633_s13 = int_to_ptr.vmem [resolvable:$true] %s632_s13 }
  0xc6   : > { %s5245_s7 = sld [smem:[#allocation45_spill]]  ;;  %p5246_p8 = scmp.ne.s32.totalorder %s5229_s6, 0 }
  0xcc   : > { %s3906_s22 = scalar_lea.hbm %s5245_s7, 16 }
  0xcd   : > { %p3907_p6 = scmp.ne.s32.totalorder %s5245_s7, %s3906_s22  ;;  %p3913_p5 = scmp.lt.u32.totalorder %s3906_s22, %s5245_s7 }
  0xcf   : > { %p3909_p13 = pnand %p3907_p6, %p5246_p8 }
  0xd1   : > { %p3910_p0 = pneg %p3909_p13 }
  0xd3   : > { %p3915_p10 = pnand %p3913_p5, %p3910_p0 }
  0xd5   : > { %3918 = shalt.err (!%p3915_p10)
}
  0xd6   : > { %s3919_s15 = scalar_lea.vmem %s605_s5, 16  ;;  %s3926_s0 = scalar_lea.vmem %s605_s5, 32 }
  0xd7   : > { %p3920_p2 = scmp.ne.s32.totalorder %s605_s5, %s3919_s15  ;;  %p3927_p3 = scmp.lt.s32.totalorder %s605_s5, %s605_s5 }
  0xd8   : > { %p3928_p11 = scmp.lt.s32.totalorder %s3926_s0, %s3919_s15 }
  0xd9   : > { %p3922_p7 = pnand %p3920_p2, %p5246_p8 }
  0xda   : > { %p3929_p12 = por %p3928_p11, %p3927_p3 }
  0xdb   : > { %p3923_p9 = pneg %p3922_p7 }
  0xdd   : > { %p3930_p4 = pnand %p3929_p12, %p3923_p9 }
  0xdf   : > { %3933 = shalt.err (!%p3930_p4)
}
  0xe0   : > { %p5247_p6 = scmp.ne.s32.totalorder %s5227_s26, 0  ;;  %s5248_s11 = sld [smem:[#allocation49_spill]] }
  0xe2   : > { %3573 = dma.hbm_to_vmem [thread:$0]  (!%p5247_p6), %s5245_s7, 16, %s605_s5, [#allocation11]  }
  0xe6   : > { %s3934_s19 = scalar_lea.hbm %s5248_s11, 16 }
  0xe7   : > { %p3935_p13 = scmp.ne.s32.totalorder %s5248_s11, %s3934_s19  ;;  %p3941_p4 = scmp.lt.u32.totalorder %s3934_s19, %s5248_s11 }
  0xe9   : > { %p3937_p0 = pnand %p3935_p13, %p5246_p8 }
  0xeb   : > { %p3938_p5 = pneg %p3937_p0 }
  0xed   : > { %p3943_p10 = pnand %p3941_p4, %p3938_p5 }
  0xef   : > { %3946 = shalt.err (!%p3943_p10)
}
  0xf0   : > { %s3947_s15 = scalar_lea.vmem %s633_s13, 16  ;;  %s3954_s5 = scalar_lea.vmem %s633_s13, 32 }
  0xf1   : > { %p3948_p2 = scmp.ne.s32.totalorder %s633_s13, %s3947_s15  ;;  %p3955_p3 = scmp.lt.s32.totalorder %s633_s13, %s633_s13 }
  0xf2   : > { %p3956_p11 = scmp.lt.s32.totalorder %s3954_s5, %s3947_s15 }
  0xf3   : > { %p3950_p7 = pnand %p3948_p2, %p5246_p8 }
  0xf4   : > { %p3957_p12 = por %p3956_p11, %p3955_p3 }
  0xf5   : > { %p3951_p9 = pneg %p3950_p7 }
  0xf7   : > { %p3958_p1 = pnand %p3957_p12, %p3951_p9 }
  0xf9   : > { %3961 = shalt.err (!%p3958_p1)
}
  0xfa   : > { %3579 = dma.hbm_to_vmem [thread:$0]  (!%p5247_p6), %s5248_s11, 16, %s633_s13, [#allocation14]  }
  0xfb   : > { %s4189_s8 = smov [#allocation18]   ;;  %s3962_s9 = scalar_lea.hbm %s5153_s14, 256 }
  0xfc   : > { %s656_s3 = sshll.u32 %s4189_s8, 4  ;;  %p3963_p13 = scmp.ne.s32.totalorder %s5153_s14, %s3962_s9  ;;  %s657_s3 = int_to_ptr.vmem [resolvable:$true] %s656_s3 }
  0xfd   : > { %p3969_p5 = scmp.lt.u32.totalorder %s3962_s9, %s5153_s14 }
  0xfe   : > { %p3965_p1 = pnand %p3963_p13, %p5246_p8 }
 0x100   : > { %p3966_p0 = pneg %p3965_p1 }
 0x102   : > { %p3971_p4 = pnand %p3969_p5, %p3966_p0 }
 0x104   : > { %3974 = shalt.err (!%p3971_p4)
}
 0x105   : > { %s3975_s13 = scalar_lea.vmem %s657_s3, 256  ;;  %p3983_p9 = scmp.lt.s32.totalorder %s657_s3, %s657_s3 }
 0x106   : > { %p3976_p10 = scmp.ne.s32.totalorder %s657_s3, %s3975_s13  ;;  %p3984_p3 = scmp.lt.s32.totalorder %s3975_s13, %s3975_s13 }
 0x108   : > { %p3978_p2 = pnand %p3976_p10, %p5246_p8  ;;  %p3985_p11 = por %p3984_p3, %p3983_p9 }
 0x10a   : > { %p3979_p7 = pneg %p3978_p2 }
 0x10c   : > { %p3986_p12 = pnand %p3985_p11, %p3979_p7 }
 0x10e   : > { %3989 = shalt.err (!%p3986_p12)
}
 0x10f   : > { %s4190_s5 = smov 64   ;;  %s4191_s0 = smov 4  }
 0x110   : > { %3585 = dma.hbm_to_vmem [thread:$0]  (!%p5247_p6), %s5153_s14, 256, %s657_s3, [#allocation17], %s4190_s5, %s4190_s5, %s4191_s0  }
 0x111   : > { %s4192_s27 = smov [#allocation21]   ;;  %s5249_s9 = sshll.u32 %s4176_s4, 6 }
 0x112   : > { %s684_s19 = sshll.u32 %s4192_s27, 4  ;;  %s5250_s30 = sld [smem:[#allocation38_spill]]  ;;  %s685_s19 = int_to_ptr.vmem [resolvable:$true] %s684_s19 }
 0x113   : > { %s3990_s25 = scalar_lea.hbm %s5156_s17, 16 }
 0x114   : > { %p3991_p13 = scmp.ne.s32.totalorder %s5156_s17, %s3990_s25  ;;  %p3997_p5 = scmp.lt.u32.totalorder %s3990_s25, %s5156_s17 }
 0x116   : > { %p3993_p1 = pnand %p3991_p13, %p5246_p8 }
 0x118   : > { %s5251_s15 = smov %s5250_s30  ;;  %s4611_s13 = scalar_lea.hbm %s5250_s30, %s5249_s9 }
 0x119   : > { %p3994_p0 = pneg %p3993_p1 }
 0x11b   : > { %p3999_p4 = pnand %p3997_p5, %p3994_p0 }
 0x11d   : > { %4002 = shalt.err (!%p3999_p4)
}
 0x11e   : > { %s4003_s0 = scalar_lea.vmem %s685_s19, 16  ;;  %s4010_s7 = scalar_lea.vmem %s685_s19, 32 }
 0x11f   : > { %p4004_p10 = scmp.ne.s32.totalorder %s685_s19, %s4003_s0  ;;  %p4011_p9 = scmp.lt.s32.totalorder %s685_s19, %s685_s19 }
 0x120   : > { %p4012_p3 = scmp.lt.s32.totalorder %s4010_s7, %s4003_s0 }
 0x121   : > { %p4006_p2 = pnand %p4004_p10, %p5246_p8 }
 0x122   : > { %p4013_p11 = por %p4012_p3, %p4011_p9 }
 0x123   : > { %p4007_p7 = pneg %p4006_p2 }
 0x125   : > { %p4014_p12 = pnand %p4013_p11, %p4007_p7 }
 0x127   : > { %4017 = shalt.err (!%p4014_p12)
}
 0x128   : > { %3591 = dma.hbm_to_vmem [thread:$0]  (!%p5247_p6), %s5156_s17, 16, %s685_s19, [#allocation20]  }
 0x129   : > { %s5252_s21 = sshll.u32 %s4500_s12, 2  ;;  %s3180_s2 = sshll.u32 %s4500_s12, 1 }
 0x12a   : > { %s711_s6 = scalar_lea.vmem [#allocation4], %s5252_s21  ;;  %s708_s8 = scalar_lea.sflag [#allocation5], %s4500_s12 }
 0x12b   : > { %s718_s25 = sshll.u32 %s711_s6, 4  ;;  %s4018_s27 = scalar_lea.hbm %s4611_s13, 64  ;;  %s719_s25 = int_to_ptr.vmem [resolvable:$true] %s718_s25 }
 0x12c   : > { %p4019_p8 = scmp.ne.s32.totalorder %s4611_s13, %s4018_s27  ;;  %p5253_p13 = scmp.ne.s32.totalorder %s5244_s29, 0 }
 0x12d   : > { %s4023_s22 = scalar_lea.hbm %s5251_s15, 128  ;;  %p4024_p5 = scmp.lt.u32.totalorder %s4611_s13, %s5251_s15 }
 0x12e   : > { %p4021_p1 = pnand %p4019_p8, %p5253_p13  ;;  %p4025_p6 = scmp.lt.u32.totalorder %s4023_s22, %s4018_s27 }
 0x12f   : > { %p4027_p10 = scmp.lt.u32.totalorder %s4018_s27, %s4611_s13 }
 0x130   : > { %p4022_p0 = pneg %p4021_p1  ;;  %p4026_p4 = por %p4025_p6, %p4024_p5 }
 0x132   : > { %p4028_p2 = por %p4027_p10, %p4026_p4 }
 0x134   : > { %p4029_p7 = pnand %p4028_p2, %p4022_p0 }
 0x136   : > { %4032 = shalt.err (!%p4029_p7)
}
 0x137   : > { %s4033_s19 = scalar_lea.vmem %s719_s25, 64  ;;  %s4193_s3 = smov [#allocation4]  }
 0x138   : > { %p4034_p9 = scmp.ne.s32.totalorder %s719_s25, %s4033_s19  ;;  %s4038_s5 = sshll.u32 %s4193_s3, 4  ;;  %s4039_s5 = int_to_ptr.vmem [resolvable:$false] %s4038_s5 }
 0x139   : > { %s4040_s0 = scalar_lea.vmem %s4039_s5, 128  ;;  %p4041_p12 = scmp.lt.s32.totalorder %s719_s25, %s4039_s5 }
 0x13a   : > { %p4036_p3 = pnand %p4034_p9, %p5253_p13  ;;  %p4042_p8 = scmp.lt.s32.totalorder %s4040_s0, %s4033_s19 }
 0x13c   : > { %p4037_p11 = pneg %p4036_p3  ;;  %p4043_p1 = por %p4042_p8, %p4041_p12 }
 0x13e   : > { %p4044_p5 = pnand %p4043_p1, %p4037_p11 }
 0x140   : > { %4047 = shalt.err (!%p4044_p5)
}
 0x141   : > { %p5254_p6 = scmp.ne.s32.totalorder %s5242_s10, 0  ;;  %s3181_s7 = sshll.u32 %s4176_s4, 5 }
 0x142   : > { %s747_s11 = scalar_lea.vmem [#allocation9], %s3180_s2  ;;  %s5255_s27 = sld [smem:[#allocation40_spill]] }
 0x143   : > { %3595 = dma.hbm_to_vmem [thread:$0]  (!%p5254_p6), %s4611_s13, 64, %s719_s25, %s708_s8  }
 0x144   : > { %s755_s20 = sshll.u32 %s747_s11, 4  ;;  %s756_s20 = int_to_ptr.vmem [resolvable:$true] %s755_s20 }
 0x148   : > { %s753_s26 = scalar_lea.hbm %s5255_s27, %s3181_s7  ;;  %s4053_s30 = scalar_lea.hbm %s5255_s27, 64 }
 0x149   : > { %s4048_s9 = scalar_lea.hbm %s753_s26, 32  ;;  %p4054_p2 = scmp.lt.u32.totalorder %s753_s26, %s5255_s27 }
 0x14a   : > { %p4049_p0 = scmp.ne.s32.totalorder %s753_s26, %s4048_s9  ;;  %p4055_p7 = scmp.lt.u32.totalorder %s4053_s30, %s4048_s9 }
 0x14b   : > { %p4057_p3 = scmp.lt.u32.totalorder %s4048_s9, %s753_s26 }
 0x14c   : > { %p4051_p4 = pnand %p4049_p0, %p5253_p13  ;;  %p4056_p9 = por %p4055_p7, %p4054_p2 }
 0x14e   : > { %p4052_p10 = pneg %p4051_p4  ;;  %p4058_p11 = por %p4057_p3, %p4056_p9 }
 0x150   : > { %p4059_p12 = pnand %p4058_p11, %p4052_p10 }
 0x152   : > { %4062 = shalt.err (!%p4059_p12)
}
 0x153   : > { %s4063_s12 = scalar_lea.vmem %s756_s20, 32  ;;  %s4194_s25 = smov [#allocation9]  }
 0x154   : > { %p4064_p8 = scmp.ne.s32.totalorder %s756_s20, %s4063_s12  ;;  %s4068_s2 = sshll.u32 %s4194_s25, 4  ;;  %s4069_s2 = int_to_ptr.vmem [resolvable:$false] %s4068_s2 }
 0x155   : > { %s4070_s8 = scalar_lea.vmem %s4069_s2, 64  ;;  %p4071_p0 = scmp.lt.s32.totalorder %s756_s20, %s4069_s2 }
 0x156   : > { %p4066_p1 = pnand %p4064_p8, %p5253_p13  ;;  %p4072_p4 = scmp.lt.s32.totalorder %s4070_s8, %s4063_s12 }
 0x158   : > { %p4067_p5 = pneg %p4066_p1  ;;  %p4073_p6 = por %p4072_p4, %p4071_p0 }
 0x15a   : > { %p4074_p2 = pnand %p4073_p6, %p4067_p5 }
 0x15c   : > { %4077 = shalt.err (!%p4074_p2)
}
 0x15d   : > { %p5256_p7 = scmp.ne.s32.totalorder %s5242_s10, 0  ;;  %p5257_p10 = scmp.ne.s32.totalorder %s5226_s1, 0 }
 0x15e   : > { %s4674_s29 = sand.u32 (!%p5257_p10), 1, %s4164_s28   ;;  %p5258_p13 = scmp.ne.s32.totalorder (!%p5257_p10), %s5236_s24, 0 }
 0x15f   : > { %3601 = dma.hbm_to_vmem [thread:$0]  (!%p5256_p7), %s753_s26, 32, %s756_s20, %s4522_s16  }
 0x160   : > { %770 = sbr.rel (%p5257_p10) target bundleno = 4416 (0x1140), region = 108  ;;  %s3183_s3 = sshll.u32 (!%p5257_p10), %s4674_s29, 2 }
 0x161   : > { %s773_s5 = scalar_lea.sflag (!%p5257_p10), [#allocation5], %s4674_s29  ;;  %s776_s0 = scalar_lea.vmem (!%p5257_p10), [#allocation4], %s3183_s3 }
 0x167   : > { %4131 = dma.done.wait (%p5258_p13), %s773_s5, 64  }
 0x168   : > { %4133 = vsyncadd (%p5258_p13), %s773_s5, 4294967232  ;;  %s781_s10 = sand.u32 1, %s4352_s23   ;;  %s4683_s1 = scalar_lea.vmem [#allocation7], %s3183_s3 }
 0x169   : > { %s782_s16 = scalar_lea.sflag [#allocation8], %s781_s10 }
 0x16a   : > { %4135 = dma.done.wait (%p5258_p13), %s782_s16, 96  }
 0x16b   : > { %4137 = vsyncadd (%p5258_p13), %s782_s16, 4294967200  ;;  %s3185_s7 = sshll.u32 %s4674_s29, 1  ;;  %p5259_p6 = scmp.eq.s32.totalorder %s4352_s23, 0 }
 0x16c   : > { %s4690_s11 = scalar_lea.vmem [#allocation9], %s3185_s7 }
 0x16d   : > { %4139 = dma.done.wait (%p5259_p6), [#allocation11], 32   ;;  %p5260_p9 = pmov %p5259_p6 }
 0x16e   : > { %p5261_p3 = pmov %p5259_p6 }
 0x16f   : > { %4141 = vsyncadd (%p5260_p9), [#allocation11], 4294967264 }
 0x170   : > { %4143 = dma.done.wait (%p5261_p3), [#allocation14], 32   ;;  %p5262_p11 = pmov %p5261_p3 }
 0x171   : > { %p5263_p12 = pmov %p5261_p3 }
 0x172   : > { %4145 = vsyncadd (%p5262_p11), [#allocation14], 4294967264 }
 0x173   : > { %4147 = dma.done.wait (%p5263_p12), [#allocation17], 272   ;;  %p5264_p8 = pmov %p5261_p3 }
 0x174   : > { %p5265_p1 = pmov %p5261_p3 }
 0x175   : > { %4149 = vsyncadd (%p5264_p8), [#allocation17], 4294967024 }
 0x176   : > { %4151 = dma.done.wait (%p5265_p1), [#allocation20], 32   ;;  %p5266_p5 = pmov %p5265_p1 }
 0x177   : > { %vm921_vm0 = vcmask 261120   ;;  %v919_v0 = vld [vmem:[%s776_s0] sm:$0xf]  ;;  %s5267_s20 = sld [smem:[#allocation44_spill]]  ;;  %v4195_v17 = vmov 0.0   ;;  %vm4196_vm1 = vmmov 0  }
 0x178   : > { %4153 = vsyncadd (%p5266_p5), [#allocation20], 4294967264  ;;  %v1169_v1 = vld [vmem:[%s776_s0] sm:$0xf]  ;;  %v920_v2 = vunpack.c.l.bf16 %v919_v0  ;;  %3331 = vmatprep.subr.bf16.mxu0 %v4195_v17  ;;  %3339 = vmatprep.subr.bf16.mxu1 %v4195_v17  ;;  %s5268_s22 = sld [smem:[#allocation56_spill]]  ;;  %s5269_s19 = sld [smem:[#allocation57_spill]] }
 0x179   : > { %v1170_v3 = vunpack.c.l.bf16 %v1169_v1  ;;  %3335 = vmatprep.mubr.msk.bf16.mxu0 %vm4196_vm1, %v4195_v17  ;;  %3343 = vmatprep.mubr.msk.bf16.mxu1 %vm4196_vm1, %v4195_v17  ;;  %s5270_s25 = sld [smem:[#allocation42_spill]]  ;;  %v1018_v41 = vld [vmem:[%s4683_s1] sm:$0xf]  ;;  %v3195_v42 = vld [vmem:[#allocation12] ss:$0 sm:$0xff]  ;;  %vm1086_vm2 = vcmask 60416  }
 0x17a   : > { %v922_v4 = vsel %vm921_vm0, %v920_v2, 0.0  ;;  %s5271_s0 = sld [smem:[#allocation50_spill]]  ;;  %s4197_s23 = smov 112   ;;  %v3205_v49 = vld [vmem:[#allocation10] ss:$0 sm:$0xff]  ;;  %vm1290_vm3 = vcmask 64512  }
 0x17b   : > { %v1172_v5 = vsel %vm921_vm0, %v1170_v3, 0.0  ;;  %923 = vadd.xlane.f32.xlu0 %v922_v4  ;;  %s4198_s1 = smov 120   ;;  %s4199_s24 = smov 104   ;;  %v3199_v58 = vld [vmem:[#allocation16] ss:$0 sm:$0xff]  ;;  %vm1549_vm6 = vcmask 1043456  }
 0x17c   : > { %s4202_s21 = smov 80   ;;  %s4203_s6 = smov 72   ;;  %vm2866_vm10 = vcmask 523264  }
 0x17d   : > { %v3692_v16 = vld [vmem:[%s5267_s20] sm:$0xff]   ;;  %v3693_v18 = vld [vmem:[%s5267_s20 + $0x8] sm:$0xff]   ;;  %s4204_s26 = smov 96   ;;  %s5275_s30 = sld [smem:[#allocation46_spill]] }
 0x17e   : > { %3332 = vmatpush3.bf16.msra.mxu0 %v3692_v16  ;;  %v3261_v26 = vld [vmem:[%s5268_s22] ss:$0 sm:$0xff]  ;;  %v1475_v16 = vld [vmem:[%s4690_s11] sm:$0x3]  ;;  %s4201_s11 = smov 88   ;;  %s5277_s9 = sld [smem:[#allocation48_spill]] }
 0x17f   : > { %1173 = vadd.xlane.f32.xlu0 %v1172_v5  ;;  %3333 = vmatprep.subr.bf16.mxu0 %v4195_v17  ;;  %v3262_v28 = vld [vmem:[%s5269_s19] ss:$0 sm:$0xff]  ;;  %v3695_v36 = vld [vmem:[%s5270_s25 + $0x8] sm:$0xff]   ;;  %vm1476_vm4 = vnez %v1475_v16  ;;  %s5278_s5 = sld [smem:[#allocation32_spill]]  ;;  %s5281_s12 = sld [smem:[#allocation54_spill]] }
 0x180   : > { %v3694_v33 = vld [vmem:[%s5270_s25] sm:$0xff]   ;;  %s5272_s10 = smov %s5271_s0  ;;  %s5282_s18 = sld [smem:[#allocation55_spill]] }
 0x181   : > { %v3696_v39 = vld [vmem:[%s5271_s0] sm:$0xff]   ;;  %v3697_v40 = vld [vmem:[%s5272_s10 + $0x8] sm:$0xff]   ;;  %s5279_s0 = sld [smem:[#allocation41_spill]] }
 0x182   : > { %3334 = vmatpush3.bf16.msra.mxu0 %v3693_v18  ;;  %3340 = vmatpush3.bf16.msra.mxu1 %v3696_v39  ;;  %v4200_v18 = vmov 0   ;;  %s5283_s2 = sld [smem:[#allocation35_spill]] }
 0x183   : > { %3347 = vmatprep.subr.bf16.mxu0 %v4195_v17  ;;  %3341 = vmatprep.subr.bf16.mxu1 %v4195_v17  ;;  %s5276_s13 = smov %s5275_s30 }
 0x185   : > { %p900_p0 = scmp.lt.s32.totalorder %s5278_s5, 1 }
 0x186   : > { %3342 = vmatpush3.bf16.msra.mxu1 %v3697_v40 }
 0x187   : > { %3355 = vmatprep.subr.bf16.mxu1 %v4195_v17 }
 0x188   : > { %p5285_p2 = scmp.ne.s32.totalorder %s5283_s2, 0 }
 0x189   : > { %3344 = vmatmul.mubr.msk.bf16.vlgmr.msra.gmra.mrb[0].mxu1 %vm921_vm0, %v1018_v41 }
 0x18a   : > { %3357 = vmatprep.mubr.msk.bf16.mxu1 %vm4196_vm1, %v4195_v17 }
 0x208   : > { %v924_v6 = vpop.xlane.xlu0 %923 }
 0x209   : > { %v926_v7 = vmul.f32 0.03125, %v924_v6 }
 0x20b   : > { %v927_v8 = vsub.f32 %v920_v2, %v926_v7 }
 0x20c   : > { %v1174_v9 = vpop.xlane.xlu0 %1173 }
 0x20d   : > { %v1176_v10 = vmul.f32 0.03125, %v1174_v9  ;;  %v928_v11 = vmul.f32 %v927_v8, %v927_v8 }
 0x20f   : > { %v1177_v12 = vsub.f32 %v1170_v3, %v1176_v10  ;;  %v929_v13 = vsel %vm921_vm0, %v928_v11, 0.0 }
 0x210   : > { %930 = vadd.xlane.f32.xlu1 %v929_v13 }
 0x211   : > { %v1178_v14 = vmul.f32 %v1177_v12, %v1177_v12 }
 0x213   : > { %v1179_v15 = vsel %vm921_vm0, %v1178_v14, 0.0 }
 0x214   : > { %1180 = vadd.xlane.f32.xlu1 %v1179_v15 }
 0x25c   : > { %v1079_v59 = vpop.f32.mrb[0].mxu1 }
 0x25d   : > { %v1080_v60 = vadd.f32 %v3199_v58, %v1079_v59  ;;  %v3345_v61 = vpop.f32.mrb[1].mxu1 }
 0x25e   : > { %v1082_v62 = vpop.f32.mrb[2].mxu1 }
 0x25f   : > { %v4776_v63 = vpack.c.bf16 %v1080_v60, %v1080_v60  ;;  %v3346_v0 = vpop.f32.mrb[3].mxu1 }
 0x261   : > { %1096 = vst.msk [vmem:[#allocation3] sm:$0xf] %vm1086_vm2, %v4776_v63 }
 0x29d   : > { %v931_v19 = vpop.xlane.xlu1 %930 }
 0x29e   : > { %v932_v20 = vmul.f32 0.03125, %v931_v19  ;;  %v1477_v19 = vsel %vm1476_vm4, 16843009, %v4200_v18 }
 0x2a0   : > { %v933_v21 = vadd.f32 1e-05, %v932_v20  ;;  %v1478_v20 = vunpack.c.0.s8 %v1477_v19 }
 0x2a1   : > { %v1181_v22 = vpop.xlane.xlu1 %1180 }
 0x2a2   : > { %3706 = vrsqrt.f32 %v933_v21  ;;  %v1182_v23 = vmul.f32 0.03125, %v1181_v22  ;;  %vm4800_vm5 = vcmp.ne.s32.totalorder %v1478_v20, 0  ;;  %v1748_v21 = vld [vmem:[%s5275_s30 + $0x4] sm:$0xf]  ;;  %s3194_s30 = sshll.u32 %s4674_s29, 3 }
 0x2a4   : > { %v1183_v24 = vadd.f32 1e-05, %v1182_v23 }
 0x2a6   : > { %3708 = vrsqrt.f32 %v1183_v24 }
 0x2ac   : > { %v3707_v25 = vpop.eup %3706 }
 0x2ad   : > { %v935_v27 = vmul.f32 %v3707_v25, %v927_v8 }
 0x2af   : > { %v942_v29 = vmul.f32 %v3261_v26, %v935_v27 }
 0x2b0   : > { %v3709_v30 = vpop.eup %3708 }
 0x2b1   : > { %v1185_v31 = vmul.f32 %v3709_v30, %v1177_v12  ;;  %v949_v32 = vadd.f32 %v3262_v28, %v942_v29 }
 0x2b3   : > { %v950_v34 = vpack.c.bf16 %v949_v32, %v949_v32  ;;  %v1192_v35 = vmul.f32 %v3261_v26, %v1185_v31 }
 0x2b5   : > { %3336 = vmatmul.mubr.msk.bf16.vlgmr.msra.gmra.mrb[0].mxu0 %vm921_vm0, %v950_v34  ;;  %v1199_v37 = vadd.f32 %v3262_v28, %v1192_v35 }
 0x2b6   : > { %3348 = vmatpush3.bf16.msra.mxu0 %v3694_v33  ;;  %3351 = vmatprep.mubr.msk.bf16.mxu0 %vm4196_vm1, %v4195_v17 }
 0x2b7   : > { %3349 = vmatprep.subr.bf16.mxu0 %v4195_v17  ;;  %v1200_v38 = vpack.c.bf16 %v1199_v37, %v1199_v37 }
 0x2ba   : > { %3350 = vmatpush3.bf16.msra.mxu0 %v3695_v36 }
 0x2bb   : > { %3361 = vmatprep.subr.bf16.mxu0 %v4195_v17 }
 0x2bd   : > { %3352 = vmatmul.mubr.msk.bf16.vlgmr.msra.gmra.mrb[4].mxu0 %vm921_vm0, %v1200_v38 }
 0x2be   : > { %3363 = vmatprep.mubr.msk.bf16.mxu0 %vm4196_vm1, %v4195_v17 }
 0x388   : > { %v1011_v43 = vpop.f32.mrb[0].mxu0 }
 0x389   : > { %v1012_v44 = vadd.f32 %v3195_v42, %v1011_v43  ;;  %v3337_v45 = vpop.f32.mrb[1].mxu0 }
 0x38a   : > { %v1014_v46 = vpop.f32.mrb[2].mxu0 }
 0x38b   : > { %v4758_v47 = vpack.c.bf16 %v1012_v44, %v1012_v44  ;;  %v3338_v48 = vpop.f32.mrb[3].mxu0 }
 0x38d   : > { %1087 = vst.msk [vmem:[#allocation2] sm:$0xf] %vm1086_vm2, %v4758_v47  ;;  %1125 = vrot.lane.b32.xlu1 %v4758_v47, %s4197_s23  ;;  %1105 = vrot.lane.b32.xlu0 %v4758_v47, %s4198_s1 }
 0x390   : > { %v1261_v50 = vpop.f32.mrb[4].mxu0 }
 0x391   : > { %v1262_v51 = vadd.f32 %v3205_v49, %v1261_v50  ;;  %1145 = vrot.lane.b32.xlu1 %v4758_v47, %s4199_s24  ;;  %v3353_v52 = vpop.f32.mrb[5].mxu0 }
 0x392   : > { %v1264_v53 = vpop.f32.mrb[6].mxu0 }
 0x393   : > { %1271 = vrot.lane.b32.xlu0 %v1262_v51, %s4197_s23  ;;  %v3354_v54 = vpop.f32.mrb[7].mxu0  ;;  %v1277_v57 = vpack.c.bf16 %v1262_v51, %v1262_v51 }
 0x394   : > { %v1281_v55 = vld [vmem:[#allocation2] sm:$0xf] }
 0x395   : > { %1268 = vrot.lane.b32.xlu1 %v1262_v51, %s4198_s1  ;;  %v1295_v56 = vsel %vm1290_vm3, %v1281_v55, 0 }
 0x396   : > { %3356 = vmatpush3.bf16.xpose.msra.mxu1 %v1295_v56 }
 0x397   : > { %3367 = vmatprep.subr.bf16.mxu1 %v4195_v17 }
 0x399   : > { %1274 = vrot.lane.b32.xlu1 %v1262_v51, %s4199_s24 }
 0x39d   : > { %3358 = vmatmul.mubr.msk.bf16.vlgmr.msra.gmra.mrb[4].mxu1 %vm1290_vm3, %v1277_v57 }
 0x39e   : > { %3369 = vmatprep.mubr.msk.bf16.mxu1 %vm4196_vm1, %v4195_v17 }
 0x3ff   : > { %v1126_v1 = vpop.permute.xlu1 %1125  ;;  %v1106_v2 = vpop.permute.xlu0 %1105 }
 0x400   : > { %1129 = vst.msk [vmem:[#allocation2 + $0x8] sm:$0xf] %vm1086_vm2, %v1126_v1  ;;  %1109 = vst.msk [vmem:[#allocation2 + $0x4] sm:$0xf] %vm1086_vm2, %v1106_v2 }
 0x403   : > { %v1146_v3 = vpop.permute.xlu1 %1145 }
 0x404   : > { %1149 = vst.msk [vmem:[#allocation2 + $0xc] sm:$0xf] %vm1086_vm2, %v1146_v3 }
 0x405   : > { %v1272_v8 = vpop.permute.xlu0 %1271 }
 0x406   : > { %v1279_v11 = vpack.c.bf16 %v1272_v8, %v1272_v8 }
 0x407   : > { %v1282_v4 = vld [vmem:[#allocation2 + $0x4] sm:$0xf]  ;;  %v1283_v5 = vld [vmem:[#allocation2 + $0x8] sm:$0xf]  ;;  %v1269_v9 = vpop.permute.xlu1 %1268 }
 0x408   : > { %v1341_v6 = vsel %vm1290_vm3, %v1282_v4, 0  ;;  %v1387_v7 = vsel %vm1290_vm3, %v1283_v5, 0  ;;  %v1278_v12 = vpack.c.bf16 %v1269_v9, %v1269_v9 }
 0x409   : > { %3362 = vmatpush3.bf16.xpose.msra.mxu0 %v1341_v6  ;;  %3368 = vmatpush3.bf16.xpose.msra.mxu1 %v1387_v7 }
 0x40a   : > { %3373 = vmatprep.subr.bf16.mxu0 %v4195_v17  ;;  %3379 = vmatprep.subr.bf16.mxu1 %v4195_v17 }
 0x40b   : > { %v1284_v10 = vld [vmem:[#allocation2 + $0xc] sm:$0xf]  ;;  %v1275_v14 = vpop.permute.xlu1 %1274 }
 0x40c   : > { %v1433_v13 = vsel %vm1290_vm3, %v1284_v10, 0  ;;  %v1280_v15 = vpack.c.bf16 %v1275_v14, %v1275_v14 }
 0x410   : > { %3364 = vmatmul.mubr.msk.bf16.vlgmr.msra.gmra.mrb[8].mxu0 %vm1290_vm3, %v1278_v12  ;;  %3370 = vmatmul.mubr.msk.bf16.vlgmr.msra.gmra.mrb[8].mxu1 %vm1290_vm3, %v1279_v11 }
 0x411   : > { %3374 = vmatpush3.bf16.xpose.msra.mxu0 %v1433_v13  ;;  %3375 = vmatprep.mubr.msk.bf16.mxu0 %vm4196_vm1, %v4195_v17 }
 0x412   : > { %3385 = vmatprep.subr.bf16.mxu0 %v4195_v17  ;;  %3381 = vmatprep.mubr.msk.bf16.mxu1 %vm4196_vm1, %v4195_v17 }
 0x418   : > { %3376 = vmatmul.mubr.msk.bf16.vlgmr.msra.gmra.mrb[12].mxu0 %vm1290_vm3, %v1280_v15 }
 0x419   : > { %3387 = vmatprep.mubr.msk.bf16.mxu0 %vm4196_vm1, %v4195_v17 }
 0x470   : > { %v1331_v22 = vpop.f32.mrb[4].mxu1 }
 0x471   : > { %v1482_v23 = vsel %vm4800_vm5, %v1331_v22, -1e+09  ;;  %v3359_v24 = vpop.f32.mrb[5].mxu1  ;;  %v1801_v22 = vsel %vm1549_vm6, %v1748_v21, 0 }
 0x472   : > { %v1334_v25 = vpop.f32.mrb[6].mxu1  ;;  %v1486_v26 = vsel %vm1290_vm3, %v1482_v23, -inf }
 0x473   : > { %1487 = vmax.xlane.f32.xlu0 %v1486_v26  ;;  %v3360_v27 = vpop.f32.mrb[7].mxu1 }
 0x4e3   : > { %v1377_v28 = vpop.f32.mrb[8].mxu0  ;;  %v1423_v29 = vpop.f32.mrb[8].mxu1 }
 0x4e4   : > { %v1483_v30 = vsel %vm4800_vm5, %v1377_v28, -1e+09  ;;  %v1484_v31 = vsel %vm4800_vm5, %v1423_v29, -1e+09  ;;  %v3365_v32 = vpop.f32.mrb[9].mxu0  ;;  %v3371_v33 = vpop.f32.mrb[9].mxu1 }
 0x4e5   : > { %v1380_v34 = vpop.f32.mrb[10].mxu0  ;;  %v1426_v35 = vpop.f32.mrb[10].mxu1  ;;  %v1492_v36 = vsel %vm1290_vm3, %v1484_v31, -inf  ;;  %v1489_v37 = vsel %vm1290_vm3, %v1483_v30, -inf }
 0x4e6   : > { %1493 = vmax.xlane.f32.xlu0 %v1492_v36  ;;  %v3372_v38 = vpop.f32.mrb[11].mxu1  ;;  %1490 = vmax.xlane.f32.xlu1 %v1489_v37  ;;  %v3366_v39 = vpop.f32.mrb[11].mxu0 }
 0x4eb   : > { %v1469_v40 = vpop.f32.mrb[12].mxu0 }
 0x4ec   : > { %v1485_v41 = vsel %vm4800_vm5, %v1469_v40, -1e+09  ;;  %v3377_v42 = vpop.f32.mrb[13].mxu0 }
 0x4ed   : > { %v1472_v43 = vpop.f32.mrb[14].mxu0  ;;  %v1495_v44 = vsel %vm1290_vm3, %v1485_v41, -inf }
 0x4ee   : > { %1496 = vmax.xlane.f32.xlu0 %v1495_v44  ;;  %v3378_v45 = vpop.f32.mrb[15].mxu0 }
 0x4f7   : > { %1110 = vrot.lane.b32.xlu1 %v4758_v47, %s4201_s11 }
 0x4fb   : > { %1130 = vrot.lane.b32.xlu1 %v4758_v47, %s4202_s21 }
 0x4ff   : > { %1150 = vrot.lane.b32.xlu1 %v4758_v47, %s4203_s6 }
 0x500   : > { %v4824_v46 = vpop.xlane.xlu0 %1487 }
 0x501   : > { %v1510_v48 = vsub.f32 %v1482_v23, %v4824_v46  ;;  %v1747_v23 = vld [vmem:[%s5276_s13] sm:$0xf]  ;;  %v1498_v26 = vsub.f32 -inf, %v4824_v46 }
 0x502   : > { %v1755_v24 = vsel %vm1549_vm6, %v1747_v23, 0 }
 0x503   : > { %v1514_v49 = vmul.f32 1.442695, %v1510_v48  ;;  %v1502_v28 = vmul.f32 1.442695, %v1498_v26 }
 0x504   : > { %1091 = vrot.lane.b32.xlu0 %v4758_v47, %s4204_s26 }
 0x505   : > { %3710 = vpow2.f32 %v1514_v49 }
 0x50f   : > { %v3711_v50 = vpop.eup %3710 }
 0x510   : > { %v1526_v51 = vsel %vm1290_vm3, %v3711_v50, 0.0  ;;  %v1542_v13 = vpack.c.bf16 %v3711_v50, %v3711_v50 }
 0x523   : > { %1527 = vadd.xlane.f32.xlu0 %v1526_v51 }
 0x573   : > { %v4828_v52 = vpop.xlane.xlu0 %1493  ;;  %v4830_v53 = vpop.xlane.xlu1 %1490 }
 0x574   : > { %v1512_v54 = vsub.f32 %v1484_v31, %v4828_v52  ;;  %v1511_v55 = vsub.f32 %v1483_v30, %v4830_v53  ;;  %v1499_v25 = vsub.f32 -inf, %v4830_v53  ;;  %v1500_v30 = vsub.f32 -inf, %v4828_v52 }
 0x576   : > { %v1518_v56 = vmul.f32 1.442695, %v1512_v54  ;;  %v1516_v47 = vmul.f32 1.442695, %v1511_v55  ;;  %v1504_v27 = vmul.f32 1.442695, %v1499_v25 }
 0x577   : > { %v1111_v57 = vpop.permute.xlu1 %1110  ;;  %v1506_v32 = vmul.f32 1.442695, %v1500_v30  ;;  %v1750_v55 = vld [vmem:[%s5276_s13 + $0xc] sm:$0xf] }
 0x578   : > { %1114 = vst.msk [vmem:[#allocation2 + $0x14] sm:$0xf] %vm1086_vm2, %v1111_v57  ;;  %3712 = vpow2.f32 %v1518_v56 }
 0x579   : > { %3714 = vpow2.f32 %v1516_v47 }
 0x57b   : > { %v1131_v58 = vpop.permute.xlu1 %1130  ;;  %v4835_v59 = vpop.xlane.xlu0 %1496 }
 0x57c   : > { %1134 = vst.msk [vmem:[#allocation2 + $0x18] sm:$0xf] %vm1086_vm2, %v1131_v58  ;;  %v1513_v60 = vsub.f32 %v1485_v41, %v4835_v59  ;;  %v1501_v29 = vsub.f32 -inf, %v4835_v59 }
 0x57e   : > { %v1520_v61 = vmul.f32 1.442695, %v1513_v60  ;;  %v1508_v31 = vmul.f32 1.442695, %v1501_v29  ;;  %v1893_v60 = vsel %vm1549_vm6, %v1750_v55, 0 }
 0x57f   : > { %v1151_v62 = vpop.permute.xlu1 %1150  ;;  %v1092_v0 = vpop.permute.xlu0 %1091  ;;  %v1287_v1 = vld [vmem:[#allocation2 + $0x14] sm:$0xf] }
 0x580   : > { %1154 = vst.msk [vmem:[#allocation2 + $0x1c] sm:$0xf] %vm1086_vm2, %v1151_v62  ;;  %1095 = vst.msk [vmem:[#allocation2 + $0x10] sm:$0xf] %vm1086_vm2, %v1092_v0  ;;  %v1597_v2 = vsel %vm1549_vm6, %v1287_v1, 0  ;;  %3716 = vpow2.f32 %v1520_v61 }
 0x581   : > { %3386 = vmatpush3.bf16.msra.mxu0 %v1597_v2  ;;  %3718 = vpow2.f32 %v1504_v27  ;;  %v1749_v1 = vld [vmem:[%s5276_s13 + $0x8] sm:$0xf] }
 0x582   : > { %3397 = vmatprep.subr.bf16.mxu0 %v4195_v17  ;;  %v3713_v3 = vpop.eup %3712  ;;  %3720 = vpow2.f32 %v1502_v28 }
 0x583   : > { %v1532_v4 = vsel %vm1290_vm3, %v3713_v3, 0.0  ;;  %v3715_v5 = vpop.eup %3714  ;;  %v1288_v12 = vld [vmem:[#allocation2 + $0x18] sm:$0xf]  ;;  %v1544_v20 = vpack.c.bf16 %v3713_v3, %v3713_v3  ;;  %3722 = vpow2.f32 %v1508_v31 }
 0x584   : > { %1533 = vadd.xlane.f32.xlu0 %v1532_v4  ;;  %v1529_v6 = vsel %vm1290_vm3, %v3715_v5, 0.0  ;;  %v1543_v7 = vpack.c.bf16 %v3715_v5, %v3715_v5  ;;  %v1643_v16 = vsel %vm1549_vm6, %v1288_v12, 0  ;;  %3724 = vpow2.f32 %v1506_v32 }
 0x585   : > { %1530 = vadd.xlane.f32.xlu1 %v1529_v6 }
 0x586   : > { %3388 = vmatmul.mubr.msk.bf16.vlgmr.msra.gmra.mrb[16].mxu0 %vm1290_vm3, %v1543_v7 }
 0x587   : > { %v1286_v8 = vld [vmem:[#allocation2 + $0x10] sm:$0xf]  ;;  %v1289_v9 = vld [vmem:[#allocation2 + $0x1c] sm:$0xf]  ;;  %3399 = vmatprep.mubr.msk.bf16.mxu0 %vm4196_vm1, %v4195_v17 }
 0x588   : > { %v1551_v10 = vsel %vm1549_vm6, %v1286_v8, 0  ;;  %v1689_v11 = vsel %vm1549_vm6, %v1289_v9, 0  ;;  %v1847_v8 = vsel %vm1549_vm6, %v1749_v1, 0 }
 0x589   : > { %3380 = vmatpush3.bf16.msra.mxu1 %v1551_v10  ;;  %3398 = vmatpush3.bf16.msra.mxu0 %v1689_v11 }
 0x58a   : > { %3391 = vmatprep.subr.bf16.mxu1 %v4195_v17  ;;  %v3717_v14 = vpop.eup %3716  ;;  %3409 = vmatprep.subr.bf16.mxu0 %v4195_v17 }
 0x58b   : > { %v1535_v15 = vsel %vm1290_vm3, %v3717_v14, 0.0  ;;  %v1545_v19 = vpack.c.bf16 %v3717_v14, %v3717_v14  ;;  %v3719_v33 = vpop.eup %3718 }
 0x58c   : > { %3382 = vmatmul.mubr.msk.bf16.vlgmr.msra.gmra.mrb[12].mxu1 %vm1290_vm3, %v1542_v13  ;;  %1536 = vadd.xlane.f32.xlu0 %v1535_v15  ;;  %v1523_v36 = vmul.f32 0.0, %v3719_v33  ;;  %v3721_v37 = vpop.eup %3720 }
 0x58d   : > { %3392 = vmatpush3.bf16.msra.mxu1 %v1643_v16  ;;  %3393 = vmatprep.mubr.msk.bf16.mxu1 %vm4196_vm1, %v4195_v17  ;;  %v1522_v40 = vmul.f32 0.0, %v3721_v37  ;;  %v3723_v41 = vpop.eup %3722 }
 0x58e   : > { %3403 = vmatprep.subr.bf16.mxu1 %v4195_v17  ;;  %3400 = vmatmul.mubr.msk.bf16.vlgmr.msra.gmra.mrb[20].mxu0 %vm1290_vm3, %v1545_v19  ;;  %v1525_v44 = vmul.f32 0.0, %v3723_v41  ;;  %v3725_v45 = vpop.eup %3724  ;;  %v2059_v19 = vld [vmem:[#allocation3] sm:$0xf] }
 0x58f   : > { %3411 = vmatprep.mubr.msk.bf16.mxu0 %vm4196_vm1, %v4195_v17  ;;  %3410 = vmatpush3.bf16.msra.mxu0 %v1801_v22  ;;  %v1524_v48 = vmul.f32 0.0, %v3725_v45 }
 0x590   : > { %3421 = vmatprep.subr.bf16.mxu0 %v4195_v17 }
 0x594   : > { %3394 = vmatmul.mubr.msk.bf16.vlgmr.msra.gmra.mrb[16].mxu1 %vm1290_vm3, %v1544_v20 }
 0x595   : > { %3405 = vmatprep.mubr.msk.bf16.mxu1 %vm4196_vm1, %v4195_v17  ;;  %3404 = vmatpush3.bf16.msra.mxu1 %v1755_v24  ;;  %v2072_v24 = vsel %vm1290_vm3, %v2059_v19, 0 }
 0x596   : > { %3415 = vmatprep.subr.bf16.mxu1 %v4195_v17 }
 0x5b0   : > { %v1528_v34 = vpop.xlane.xlu0 %1527 }
 0x5b1   : > { %v1538_v42 = vadd.f32 %v1528_v34, %v1522_v40 }
 0x611   : > { %v1534_v39 = vpop.xlane.xlu0 %1533 }
 0x612   : > { %v1531_v35 = vpop.xlane.xlu1 %1530  ;;  %v1540_v49 = vadd.f32 %v1534_v39, %v1524_v48 }
 0x613   : > { %v1539_v38 = vadd.f32 %v1531_v35, %v1523_v36 }
 0x615   : > { %3726 = vrcp.f32 %v1539_v38 }
 0x616   : > { %3728 = vrcp.f32 %v1538_v42 }
 0x619   : > { %v1537_v43 = vpop.xlane.xlu0 %1536 }
 0x61a   : > { %v1541_v46 = vadd.f32 %v1537_v43, %v1525_v44 }
 0x61c   : > { %3730 = vrcp.f32 %v1541_v46 }
 0x61d   : > { %3732 = vrcp.f32 %v1540_v49  ;;  %v3221_v49 = vld [vmem:[#allocation13] ss:$0 sm:$0xff] }
 0x61f   : > { %v3727_v53 = vpop.eup %3726 }
 0x620   : > { %v3729_v62 = vpop.eup %3728 }
 0x626   : > { %v3731_v9 = vpop.eup %3730 }
 0x627   : > { %v3733_v20 = vpop.eup %3732 }
 0x659   : > { %v1633_v50 = vpop.f32.mrb[16].mxu0 }
 0x65a   : > { %v1732_v51 = vadd.f32 %v1633_v50, %v1523_v36  ;;  %v3389_v52 = vpop.f32.mrb[17].mxu0 }
 0x65b   : > { %v1636_v54 = vpop.f32.mrb[18].mxu0 }
 0x65c   : > { %v1740_v56 = vmul.f32 %v3727_v53, %v1732_v51  ;;  %v3390_v47 = vpop.f32.mrb[19].mxu0 }
 0x65e   : > { %v1744_v58 = vpack.c.bf16 %v1740_v56, %v1740_v56 }
 0x65f   : > { %v1587_v57 = vpop.f32.mrb[12].mxu1 }
 0x660   : > { %v1731_v59 = vadd.f32 %v1587_v57, %v1522_v40  ;;  %v3383_v61 = vpop.f32.mrb[13].mxu1  ;;  %3412 = vmatmul.mubr.msk.bf16.vlgmr.msra.gmra.mrb[24].mxu0 %vm1290_vm3, %v1744_v58 }
 0x661   : > { %v1590_v0 = vpop.f32.mrb[14].mxu1  ;;  %3422 = vmatpush3.bf16.msra.mxu0 %v1893_v60  ;;  %v1725_v4 = vpop.f32.mrb[20].mxu0  ;;  %3423 = vmatprep.mubr.msk.bf16.mxu0 %vm4196_vm1, %v4195_v17  ;;  %v3699_v60 = vld [vmem:[%s5277_s9 + $0x8] sm:$0xff]  }
 0x662   : > { %v1739_v2 = vmul.f32 %v3729_v62, %v1731_v59  ;;  %v3384_v3 = vpop.f32.mrb[15].mxu1  ;;  %v1734_v6 = vadd.f32 %v1725_v4, %v1525_v44  ;;  %v3401_v7 = vpop.f32.mrb[21].mxu0  ;;  %3435 = vmatprep.subr.bf16.mxu0 %v4195_v17  ;;  %v3698_v59 = vld [vmem:[%s5277_s9] sm:$0xff]  }
 0x663   : > { %v1728_v10 = vpop.f32.mrb[22].mxu0  ;;  %v3222_v4 = vld [vmem:[%s5268_s22 + $0x1] ss:$0 sm:$0xff] }
 0x664   : > { %v1743_v5 = vpack.c.bf16 %v1739_v2, %v1739_v2  ;;  %v1742_v11 = vmul.f32 %v3731_v9, %v1734_v6  ;;  %v3402_v12 = vpop.f32.mrb[23].mxu0  ;;  %v3223_v6 = vld [vmem:[%s5269_s19 + $0x1] ss:$0 sm:$0xff] }
 0x665   : > { %v3224_v12 = vld [vmem:[#allocation15] ss:$0 sm:$0xff] }
 0x666   : > { %3406 = vmatmul.mubr.msk.bf16.vlgmr.msra.gmra.mrb[20].mxu1 %vm1290_vm3, %v1743_v5  ;;  %v1746_v14 = vpack.c.bf16 %v1742_v11, %v1742_v11 }
 0x667   : > { %v1679_v13 = vpop.f32.mrb[16].mxu1  ;;  %3416 = vmatpush3.bf16.msra.mxu1 %v1847_v8  ;;  %3417 = vmatprep.mubr.msk.bf16.mxu1 %vm4196_vm1, %v4195_v17 }
 0x668   : > { %v1733_v15 = vadd.f32 %v1679_v13, %v1524_v48  ;;  %v3395_v16 = vpop.f32.mrb[17].mxu1  ;;  %3427 = vmatprep.subr.bf16.mxu1 %v4195_v17  ;;  %3424 = vmatmul.mubr.msk.bf16.vlgmr.msra.gmra.mrb[28].mxu0 %vm1290_vm3, %v1746_v14 }
 0x669   : > { %v1682_v21 = vpop.f32.mrb[18].mxu1  ;;  %3437 = vmatprep.mubr.msk.bf16.mxu0 %vm4196_vm1, %v4195_v17 }
 0x66a   : > { %v1741_v22 = vmul.f32 %v3733_v20, %v1733_v15  ;;  %v3396_v23 = vpop.f32.mrb[19].mxu1  ;;  %3436 = vmatpush3.bf16.xpose.msra.mxu0 %v2072_v24 }
 0x66b   : > { %3447 = vmatprep.subr.bf16.mxu0 %v4195_v17 }
 0x66c   : > { %v1745_v25 = vpack.c.bf16 %v1741_v22, %v1741_v22 }
 0x66e   : > { %3418 = vmatmul.mubr.msk.bf16.vlgmr.msra.gmra.mrb[24].mxu1 %vm1290_vm3, %v1745_v25 }
 0x66f   : > { %3431 = vmatprep.mubr.msk.bf16.mxu1 %vm4196_vm1, %v4195_v17  ;;  %3428 = vmatpush3.bf16.msra.mxu1 %v3698_v59 }
 0x670   : > { %3429 = vmatprep.subr.bf16.mxu1 %v4195_v17 }
 0x673   : > { %3430 = vmatpush3.bf16.msra.mxu1 %v3699_v60 }
 0x674   : > { %3441 = vmatprep.subr.bf16.mxu1 %v4195_v17 }
 0x733   : > { %v1837_v26 = vpop.f32.mrb[24].mxu0 }
 0x734   : > { %v3413_v27 = vpop.f32.mrb[25].mxu0  ;;  %v1936_v31 = vsel %vm921_vm0, %v1837_v26, 0.0 }
 0x735   : > { %v1840_v28 = vpop.f32.mrb[26].mxu0 }
 0x736   : > { %v3414_v29 = vpop.f32.mrb[27].mxu0 }
 0x739   : > { %v1791_v30 = vpop.f32.mrb[20].mxu1 }
 0x73a   : > { %v1935_v32 = vsel %vm921_vm0, %v1791_v30, 0.0  ;;  %v3407_v33 = vpop.f32.mrb[21].mxu1 }
 0x73b   : > { %v1937_v34 = vadd.f32 %v1936_v31, %v1935_v32  ;;  %v1794_v35 = vpop.f32.mrb[22].mxu1  ;;  %v1929_v37 = vpop.f32.mrb[28].mxu0  ;;  %v937_v33 = vlaneseq }
 0x73c   : > { %v3408_v36 = vpop.f32.mrb[23].mxu1  ;;  %v3425_v38 = vpop.f32.mrb[29].mxu0  ;;  %v1940_v46 = vsel %vm921_vm0, %v1929_v37, 0.0 }
 0x73d   : > { %v1932_v39 = vpop.f32.mrb[30].mxu0  ;;  %v938_v35 = vshrl.u32 %v937_v33, 7 }
 0x73e   : > { %v3426_v40 = vpop.f32.mrb[31].mxu0 }
 0x73f   : > { %v939_v36 = vsub.s32 0, %v938_v35 }
 0x741   : > { %v1883_v41 = vpop.f32.mrb[24].mxu1 }
 0x742   : > { %v1938_v42 = vsel %vm921_vm0, %v1883_v41, 0.0  ;;  %v3419_v43 = vpop.f32.mrb[25].mxu1 }
 0x743   : > { %v1939_v44 = vadd.f32 %v1938_v42, %v1937_v34  ;;  %v1886_v45 = vpop.f32.mrb[26].mxu1 }
 0x744   : > { %v3420_v48 = vpop.f32.mrb[27].mxu1 }
 0x745   : > { %v1941_v50 = vadd.f32 %v1940_v46, %v1939_v44 }
 0x747   : > { %v1949_v51 = vadd.f32 %v3221_v49, %v1941_v50 }
 0x749   : > { %v1950_v52 = vadd.f32 %v1949_v51, %v1949_v51 }
 0x74b   : > { %v1951_v53 = vsel %vm921_vm0, %v1950_v52, 0.0 }
 0x74c   : > { %1952 = vadd.xlane.f32.xlu0 %v1951_v53 }
 0x762   : > { %1115 = vrot.lane.b32.xlu0 %v4776_v63, %s4198_s1 }
 0x7d9   : > { %v1953_v54 = vpop.xlane.xlu0 %1952 }
 0x7da   : > { %v1954_v55 = vmul.f32 0.03125, %v1953_v54 }
 0x7dc   : > { %v1955_v56 = vsub.f32 %v1950_v52, %v1954_v55 }
 0x7dd   : > { %v1116_v47 = vpop.permute.xlu0 %1115 }
 0x7de   : > { %1119 = vst.msk [vmem:[#allocation3 + $0x4] sm:$0xf] %vm1086_vm2, %v1116_v47  ;;  %v1956_v57 = vmul.f32 %v1955_v56, %v1955_v56 }
 0x7e0   : > { %v1957_v58 = vsel %vm921_vm0, %v1956_v57, 0.0 }
 0x7e1   : > { %1958 = vadd.xlane.f32.xlu1 %v1957_v58 }
 0x7e5   : > { %v2060_v9 = vld [vmem:[#allocation3 + $0x4] sm:$0xf] }
 0x7e6   : > { %v2118_v11 = vsel %vm1290_vm3, %v2060_v9, 0 }
 0x7f2   : > { %1135 = vrot.lane.b32.xlu1 %v4776_v63, %s4197_s23 }
 0x7f6   : > { %1155 = vrot.lane.b32.xlu1 %v4776_v63, %s4199_s24 }
 0x86e   : > { %v1959_v61 = vpop.xlane.xlu1 %1958 }
 0x86f   : > { %v1960_v62 = vmul.f32 0.03125, %v1959_v61 }
 0x871   : > { %v1961_v0 = vadd.f32 1e-05, %v1960_v62 }
 0x872   : > { %v1136_v1 = vpop.permute.xlu1 %1135 }
 0x873   : > { %3734 = vrsqrt.f32 %v1961_v0  ;;  %1139 = vst.msk [vmem:[#allocation3 + $0x8] sm:$0xf] %vm1086_vm2, %v1136_v1 }
 0x876   : > { %v1156_v2 = vpop.permute.xlu1 %1155 }
 0x877   : > { %1159 = vst.msk [vmem:[#allocation3 + $0xc] sm:$0xf] %vm1086_vm2, %v1156_v2 }
 0x87a   : > { %v2061_v19 = vld [vmem:[#allocation3 + $0x8] sm:$0xf] }
 0x87b   : > { %v2164_v22 = vsel %vm1290_vm3, %v2061_v19, 0 }
 0x87d   : > { %v3735_v3 = vpop.eup %3734 }
 0x87e   : > { %v1963_v5 = vmul.f32 %v3735_v3, %v1955_v56  ;;  %v2062_v25 = vld [vmem:[#allocation3 + $0xc] sm:$0xf] }
 0x87f   : > { %v2210_v28 = vsel %vm1290_vm3, %v2062_v25, 0 }
 0x880   : > { %v1970_v7 = vmul.f32 %v3222_v4, %v1963_v5 }
 0x882   : > { %v1977_v8 = vadd.f32 %v3223_v6, %v1970_v7 }
 0x884   : > { %v1978_v10 = vpack.c.bf16 %v1977_v8, %v1977_v8 }
 0x886   : > { %3432 = vmatmul.mubr.msk.bf16.vlgmr.msra.gmra.mrb[28].mxu1 %vm921_vm0, %v1978_v10 }
 0x887   : > { %3442 = vmatpush3.bf16.xpose.msra.mxu1 %v2118_v11  ;;  %3443 = vmatprep.mubr.msk.bf16.mxu1 %vm4196_vm1, %v4195_v17 }
 0x888   : > { %3453 = vmatprep.subr.bf16.mxu1 %v4195_v17 }
 0x959   : > { %v2039_v13 = vpop.f32.mrb[28].mxu1 }
 0x95a   : > { %v2040_v14 = vadd.f32 %v3224_v12, %v2039_v13  ;;  %v3433_v15 = vpop.f32.mrb[29].mxu1 }
 0x95b   : > { %v2042_v16 = vpop.f32.mrb[30].mxu1 }
 0x95c   : > { %v2055_v20 = vpack.c.bf16 %v2040_v14, %v2040_v14  ;;  %2049 = vrot.lane.b32.xlu0 %v2040_v14, %s4197_s23  ;;  %2046 = vrot.lane.b32.xlu1 %v2040_v14, %s4198_s1  ;;  %v3434_v21 = vpop.f32.mrb[31].mxu1  ;;  %s901_s23 = scalar_select %p900_p0, %s5278_s5, 1 }
 0x95e   : > { %3438 = vmatmul.mubr.msk.bf16.vlgmr.msra.gmra.mrb[32].mxu0 %vm1290_vm3, %v2055_v20  ;;  %s902_s16 = scalar_lea.vmem %s5279_s0, %s901_s23  ;;  %s899_s0 = scalar_lea.vmem [#allocation22], %s3194_s30 }
 0x95f   : > { %3448 = vmatpush3.bf16.xpose.msra.mxu0 %v2164_v22  ;;  %3449 = vmatprep.mubr.msk.bf16.mxu0 %vm4196_vm1, %v4195_v17  ;;  %v2252_v31 = vld [vmem:[%s902_s16] sm:$0x1]  ;;  %s2954_s16 = sshll.u32 %s899_s0, 4  ;;  %s5091_s16 = int_to_ptr.vmem [resolvable:$true] %s2954_s16 }
 0x960   : > { %2052 = vrot.lane.b32.xlu1 %v2040_v14, %s4199_s24  ;;  %3459 = vmatprep.subr.bf16.mxu0 %v4195_v17  ;;  %vm2253_vm7 = vnez %v2252_v31  ;;  %s3256_s24 = sshll.u32 %s5278_s5, 7  ;;  %s4078_s8 = scalar_lea.vmem %s5091_s16, 128 }
 0x961   : > { %v2254_v32 = vsel %vm2253_vm7, 16843009, %v4200_v18  ;;  %p4079_p4 = scmp.ne.s32.totalorder %s5091_s16, %s4078_s8  ;;  %s4205_s5 = smov [#allocation22]  }
 0x962   : > { %v2255_v34 = vunpack.c.0.s8 %v2254_v32  ;;  %s4082_s30 = sshll.u32 %s4205_s5, 4  ;;  %s4083_s30 = int_to_ptr.vmem [resolvable:$false] %s4082_s30 }
 0x963   : > { %p4080_p7 = pnand %p4079_p4, %p5285_p2  ;;  %s4084_s3 = scalar_lea.vmem %s4083_s30, 256 }
 0x964   : > { %vm2256_vm8 = vcmp.ne.s32.totalorder %v2255_v34, 0  ;;  %p4085_p13 = scmp.lt.s32.totalorder %s5091_s16, %s4083_s30  ;;  %p4086_p6 = scmp.lt.s32.totalorder %s4084_s3, %s4078_s8 }
 0x965   : > { %v2257_v37 = vsel %vm2256_vm8, 1, %v4200_v18  ;;  %p4081_p10 = pneg %p4080_p7 }
 0x966   : > { %v2261_v38 = vrot.slane %v2257_v37, %v939_v36  ;;  %v2528_v36 = vld [vmem:[#allocation18 + $0x4] sm:$0xf]  ;;  %p4087_p9 = por %p4086_p6, %p4085_p13 }
 0x967   : > { %v2581_v37 = vsel %vm1549_vm6, %v2528_v36, 0 }
 0x968   : > { %vm2262_vm9 = vcmp.eq.s32.totalorder %v2261_v38, 1  ;;  %v2527_v38 = vld [vmem:[#allocation18] sm:$0xf]  ;;  %p4088_p3 = pnand %p4087_p9, %p4081_p10 }
 0x9ce   : > { %v2047_v23 = vpop.permute.xlu1 %2046  ;;  %v2050_v24 = vpop.permute.xlu0 %2049 }
 0x9cf   : > { %v2056_v26 = vpack.c.bf16 %v2047_v23, %v2047_v23  ;;  %v2057_v27 = vpack.c.bf16 %v2050_v24, %v2050_v24 }
 0x9d1   : > { %3444 = vmatmul.mubr.msk.bf16.vlgmr.msra.gmra.mrb[32].mxu1 %vm1290_vm3, %v2056_v26  ;;  %3450 = vmatmul.mubr.msk.bf16.vlgmr.msra.gmra.mrb[36].mxu0 %vm1290_vm3, %v2057_v27 }
 0x9d2   : > { %3454 = vmatpush3.bf16.xpose.msra.mxu1 %v2210_v28  ;;  %3455 = vmatprep.mubr.msk.bf16.mxu1 %vm4196_vm1, %v4195_v17  ;;  %v2053_v29 = vpop.permute.xlu1 %2052 }
 0x9d3   : > { %3465 = vmatprep.subr.bf16.mxu1 %v4195_v17  ;;  %3461 = vmatprep.mubr.msk.bf16.mxu0 %vm4196_vm1, %v4195_v17  ;;  %v2058_v30 = vpack.c.bf16 %v2053_v29, %v2053_v29 }
 0x9d9   : > { %3456 = vmatmul.mubr.msk.bf16.vlgmr.msra.gmra.mrb[36].mxu1 %vm1290_vm3, %v2058_v30 }
 0x9da   : > { %3467 = vmatprep.mubr.msk.bf16.mxu1 %vm4196_vm1, %v4195_v17 }
 0xa31   : > { %v2108_v39 = vpop.f32.mrb[32].mxu0 }
 0xa32   : > { %v2263_v40 = vsel %vm2262_vm9, %v2108_v39, -1e+09  ;;  %v3439_v41 = vpop.f32.mrb[33].mxu0  ;;  %v2535_v39 = vsel %vm1549_vm6, %v2527_v38, 0 }
 0xa33   : > { %v2111_v42 = vpop.f32.mrb[34].mxu0  ;;  %v2267_v43 = vsel %vm1290_vm3, %v2263_v40, -inf }
 0xa34   : > { %2268 = vmax.xlane.f32.xlu0 %v2267_v43  ;;  %v3440_v44 = vpop.f32.mrb[35].mxu0 }
 0xaa4   : > { %v2154_v45 = vpop.f32.mrb[32].mxu1  ;;  %v2200_v46 = vpop.f32.mrb[36].mxu0 }
 0xaa5   : > { %v2264_v48 = vsel %vm2262_vm9, %v2154_v45, -1e+09  ;;  %v2265_v49 = vsel %vm2262_vm9, %v2200_v46, -1e+09  ;;  %v3445_v50 = vpop.f32.mrb[33].mxu1  ;;  %v3451_v51 = vpop.f32.mrb[37].mxu0 }
 0xaa6   : > { %v2157_v18 = vpop.f32.mrb[34].mxu1  ;;  %v2203_v52 = vpop.f32.mrb[38].mxu0  ;;  %v2270_v53 = vsel %vm1290_vm3, %v2264_v48, -inf  ;;  %v2273_v54 = vsel %vm1290_vm3, %v2265_v49, -inf }
 0xaa7   : > { %2271 = vmax.xlane.f32.xlu1 %v2270_v53  ;;  %v3446_v55 = vpop.f32.mrb[35].mxu1  ;;  %2274 = vmax.xlane.f32.xlu0 %v2273_v54  ;;  %v3452_v56 = vpop.f32.mrb[39].mxu0 }
 0xaac   : > { %v2246_v47 = vpop.f32.mrb[36].mxu1 }
 0xaad   : > { %v2266_v57 = vsel %vm2262_vm9, %v2246_v47, -1e+09  ;;  %v3457_v58 = vpop.f32.mrb[37].mxu1 }
 0xaae   : > { %v2249_v59 = vpop.f32.mrb[38].mxu1  ;;  %v2276_v60 = vsel %vm1290_vm3, %v2266_v57, -inf }
 0xaaf   : > { %v3458_v61 = vpop.f32.mrb[39].mxu1  ;;  %2277 = vmax.xlane.f32.xlu0 %v2276_v60 }
 0xab8   : > { %1120 = vrot.lane.b32.xlu1 %v4776_v63, %s4201_s11 }
 0xabc   : > { %1140 = vrot.lane.b32.xlu1 %v4776_v63, %s4202_s21 }
 0xac0   : > { %1160 = vrot.lane.b32.xlu1 %v4776_v63, %s4203_s6  ;;  %s5280_s6 = sld [smem:[#allocation53_spill]] }
 0xac1   : > { %v4978_v62 = vpop.xlane.xlu0 %2268 }
 0xac2   : > { %v2291_v0 = vsub.f32 %v2263_v40, %v4978_v62  ;;  %v2279_v42 = vsub.f32 -inf, %v4978_v62 }
 0xac4   : > { %v2295_v1 = vmul.f32 1.442695, %v2291_v0  ;;  %v2283_v44 = vmul.f32 1.442695, %v2279_v42 }
 0xac5   : > { %1100 = vrot.lane.b32.xlu0 %v4776_v63, %s4204_s26  ;;  %s5284_s26 = sld [smem:[#allocation58_spill]] }
 0xac6   : > { %3736 = vpow2.f32 %v2295_v1 }
 0xacb   : > { %s5089_s7 = scalar_lea.hbm %s5284_s26, %s3256_s24 }
 0xad0   : > { %v3737_v2 = vpop.eup %3736 }
 0xad1   : > { %v2307_v3 = vsel %vm1290_vm3, %v3737_v2, 0.0  ;;  %v2323_v30 = vpack.c.bf16 %v3737_v2, %v3737_v2 }
 0xae4   : > { %2308 = vadd.xlane.f32.xlu0 %v2307_v3 }
 0xb34   : > { %v4982_v4 = vpop.xlane.xlu1 %2271  ;;  %v4984_v5 = vpop.xlane.xlu0 %2274 }
 0xb35   : > { %v2292_v6 = vsub.f32 %v2264_v48, %v4982_v4  ;;  %v2293_v7 = vsub.f32 %v2265_v49, %v4984_v5  ;;  %v2280_v40 = vsub.f32 -inf, %v4982_v4  ;;  %v2281_v46 = vsub.f32 -inf, %v4984_v5  ;;  %v2530_v5 = vld [vmem:[#allocation18 + $0xc] sm:$0xf] }
 0xb37   : > { %v2297_v8 = vmul.f32 1.442695, %v2292_v6  ;;  %v2299_v63 = vmul.f32 1.442695, %v2293_v7  ;;  %v2285_v41 = vmul.f32 1.442695, %v2280_v40 }
 0xb38   : > { %v1121_v9 = vpop.permute.xlu1 %1120  ;;  %v2287_v49 = vmul.f32 1.442695, %v2281_v46 }
 0xb39   : > { %1124 = vst.msk [vmem:[#allocation3 + $0x14] sm:$0xf] %vm1086_vm2, %v1121_v9  ;;  %3738 = vpow2.f32 %v2297_v8 }
 0xb3a   : > { %3740 = vpow2.f32 %v2299_v63  ;;  %v2673_v63 = vsel %vm1549_vm6, %v2530_v5, 0  ;;  %v3700_v5 = vld [vmem:[%s5280_s6] sm:$0xff]  }
 0xb3c   : > { %v1141_v10 = vpop.permute.xlu1 %1140  ;;  %v2278_v11 = vpop.xlane.xlu0 %2277 }
 0xb3d   : > { %1144 = vst.msk [vmem:[#allocation3 + $0x18] sm:$0xf] %vm1086_vm2, %v1141_v10  ;;  %v2294_v12 = vsub.f32 %v2266_v57, %v2278_v11  ;;  %v2282_v43 = vsub.f32 -inf, %v2278_v11 }
 0xb3f   : > { %v2301_v13 = vmul.f32 1.442695, %v2294_v12  ;;  %v2289_v45 = vmul.f32 1.442695, %v2282_v43 }
 0xb40   : > { %v1161_v14 = vpop.permute.xlu1 %1160  ;;  %v1101_v15 = vpop.permute.xlu0 %1100  ;;  %v2065_v16 = vld [vmem:[#allocation3 + $0x14] sm:$0xf] }
 0xb41   : > { %1164 = vst.msk [vmem:[#allocation3 + $0x1c] sm:$0xf] %vm1086_vm2, %v1161_v14  ;;  %1104 = vst.msk [vmem:[#allocation3 + $0x10] sm:$0xf] %vm1086_vm2, %v1101_v15  ;;  %v2377_v19 = vsel %vm1549_vm6, %v2065_v16, 0  ;;  %3742 = vpow2.f32 %v2301_v13 }
 0xb42   : > { %3466 = vmatpush3.bf16.msra.mxu1 %v2377_v19  ;;  %3744 = vpow2.f32 %v2285_v41  ;;  %v2529_v15 = vld [vmem:[#allocation18 + $0x8] sm:$0xf] }
 0xb43   : > { %3477 = vmatprep.subr.bf16.mxu1 %v4195_v17  ;;  %v3739_v20 = vpop.eup %3738  ;;  %3746 = vpow2.f32 %v2283_v44 }
 0xb44   : > { %v2310_v21 = vsel %vm1290_vm3, %v3739_v20, 0.0  ;;  %v2324_v22 = vpack.c.bf16 %v3739_v20, %v3739_v20  ;;  %v3741_v23 = vpop.eup %3740  ;;  %v2066_v29 = vld [vmem:[#allocation3 + $0x18] sm:$0xf]  ;;  %3748 = vpow2.f32 %v2289_v45 }
 0xb45   : > { %2311 = vadd.xlane.f32.xlu1 %v2310_v21  ;;  %v2313_v24 = vsel %vm1290_vm3, %v3741_v23, 0.0  ;;  %v2423_v33 = vsel %vm1549_vm6, %v2066_v29, 0  ;;  %v2325_v35 = vpack.c.bf16 %v3741_v23, %v3741_v23  ;;  %3750 = vpow2.f32 %v2287_v49 }
 0xb46   : > { %3468 = vmatmul.mubr.msk.bf16.vlgmr.msra.gmra.mrb[40].mxu1 %vm1290_vm3, %v2324_v22  ;;  %2314 = vadd.xlane.f32.xlu0 %v2313_v24 }
 0xb47   : > { %3479 = vmatprep.mubr.msk.bf16.mxu1 %vm4196_vm1, %v4195_v17 }
 0xb48   : > { %v2064_v25 = vld [vmem:[#allocation3 + $0x10] sm:$0xf]  ;;  %v2067_v26 = vld [vmem:[#allocation3 + $0x1c] sm:$0xf] }
 0xb49   : > { %v2331_v27 = vsel %vm1549_vm6, %v2064_v25, 0  ;;  %v2469_v28 = vsel %vm1549_vm6, %v2067_v26, 0 }
 0xb4a   : > { %3460 = vmatpush3.bf16.msra.mxu0 %v2331_v27  ;;  %3478 = vmatpush3.bf16.msra.mxu1 %v2469_v28  ;;  %v2627_v27 = vsel %vm1549_vm6, %v2529_v15, 0 }
 0xb4b   : > { %3471 = vmatprep.subr.bf16.mxu0 %v4195_v17  ;;  %3489 = vmatprep.subr.bf16.mxu1 %v4195_v17  ;;  %v3743_v31 = vpop.eup %3742 }
 0xb4c   : > { %v2316_v32 = vsel %vm1290_vm3, %v3743_v31, 0.0  ;;  %v2326_v34 = vpack.c.bf16 %v3743_v31, %v3743_v31  ;;  %v3745_v48 = vpop.eup %3744 }
 0xb4d   : > { %3462 = vmatmul.mubr.msk.bf16.vlgmr.msra.gmra.mrb[40].mxu0 %vm1290_vm3, %v2323_v30  ;;  %2317 = vadd.xlane.f32.xlu0 %v2316_v32  ;;  %v2304_v18 = vmul.f32 0.0, %v3745_v48  ;;  %v3747_v53 = vpop.eup %3746 }
 0xb4e   : > { %3472 = vmatpush3.bf16.msra.mxu0 %v2423_v33  ;;  %3480 = vmatmul.mubr.msk.bf16.vlgmr.msra.gmra.mrb[44].mxu1 %vm1290_vm3, %v2326_v34  ;;  %v3749_v55 = vpop.eup %3748  ;;  %v2303_v56 = vmul.f32 0.0, %v3747_v53 }
 0xb4f   : > { %3473 = vmatprep.mubr.msk.bf16.mxu0 %vm4196_vm1, %v4195_v17  ;;  %3491 = vmatprep.mubr.msk.bf16.mxu1 %vm4196_vm1, %v4195_v17  ;;  %v2306_v58 = vmul.f32 0.0, %v3749_v55  ;;  %v3751_v60 = vpop.eup %3750 }
 0xb50   : > { %3483 = vmatprep.subr.bf16.mxu0 %v4195_v17  ;;  %3490 = vmatpush3.bf16.msra.mxu1 %v2581_v37  ;;  %v2305_v61 = vmul.f32 0.0, %v3751_v60 }
 0xb51   : > { %3501 = vmatprep.subr.bf16.mxu1 %v4195_v17 }
 0xb55   : > { %3474 = vmatmul.mubr.msk.bf16.vlgmr.msra.gmra.mrb[44].mxu0 %vm1290_vm3, %v2325_v35 }
 0xb56   : > { %3485 = vmatprep.mubr.msk.bf16.mxu0 %vm4196_vm1, %v4195_v17  ;;  %3484 = vmatpush3.bf16.msra.mxu0 %v2535_v39 }
 0xb57   : > { %3495 = vmatprep.subr.bf16.mxu0 %v4195_v17 }
 0xb71   : > { %v2309_v50 = vpop.xlane.xlu0 %2308 }
 0xb72   : > { %v2319_v57 = vadd.f32 %v2309_v50, %v2303_v56 }
 0xbd2   : > { %v2312_v51 = vpop.xlane.xlu1 %2311 }
 0xbd3   : > { %v2320_v52 = vadd.f32 %v2312_v51, %v2304_v18  ;;  %v2315_v54 = vpop.xlane.xlu0 %2314 }
 0xbd4   : > { %v2321_v3 = vadd.f32 %v2315_v54, %v2305_v61 }
 0xbd5   : > { %3752 = vrcp.f32 %v2320_v52 }
 0xbd6   : > { %3754 = vrcp.f32 %v2319_v57 }
 0xbda   : > { %v2318_v47 = vpop.xlane.xlu0 %2317 }
 0xbdb   : > { %v2322_v59 = vadd.f32 %v2318_v47, %v2306_v58 }
 0xbdd   : > { %3756 = vrcp.f32 %v2322_v59 }
 0xbde   : > { %3758 = vrcp.f32 %v2321_v3 }
 0xbdf   : > { %v3753_v2 = vpop.eup %3752 }
 0xbe0   : > { %v3755_v12 = vpop.eup %3754 }
 0xbe7   : > { %v3757_v22 = vpop.eup %3756 }
 0xbe8   : > { %v3759_v32 = vpop.eup %3758 }
 0xc19   : > { %v2413_v62 = vpop.f32.mrb[40].mxu1 }
 0xc1a   : > { %v2512_v0 = vadd.f32 %v2413_v62, %v2304_v18  ;;  %v3469_v1 = vpop.f32.mrb[41].mxu1 }
 0xc1b   : > { %v2416_v4 = vpop.f32.mrb[42].mxu1 }
 0xc1c   : > { %v2520_v6 = vmul.f32 %v3753_v2, %v2512_v0  ;;  %v3470_v7 = vpop.f32.mrb[43].mxu1 }
 0xc1d   : > { %v3702_v7 = vld [vmem:[%s5281_s12] sm:$0xff]  }
 0xc1e   : > { %v2524_v8 = vpack.c.bf16 %v2520_v6, %v2520_v6  ;;  %v3701_v6 = vld [vmem:[%s5280_s6 + $0x8] sm:$0xff]  }
 0xc20   : > { %v2367_v9 = vpop.f32.mrb[40].mxu0  ;;  %3492 = vmatmul.mubr.msk.bf16.vlgmr.msra.gmra.mrb[48].mxu1 %vm1290_vm3, %v2524_v8  ;;  %v3703_v8 = vld [vmem:[%s5281_s12 + $0x8] sm:$0xff]  }
 0xc21   : > { %v2511_v10 = vadd.f32 %v2367_v9, %v2303_v56  ;;  %v3463_v11 = vpop.f32.mrb[41].mxu0  ;;  %v2505_v13 = vpop.f32.mrb[44].mxu1  ;;  %3502 = vmatpush3.bf16.msra.mxu1 %v2673_v63  ;;  %3503 = vmatprep.mubr.msk.bf16.mxu1 %vm4196_vm1, %v4195_v17 }
 0xc22   : > { %v2370_v14 = vpop.f32.mrb[42].mxu0  ;;  %v2514_v19 = vadd.f32 %v2505_v13, %v2306_v58  ;;  %v3481_v20 = vpop.f32.mrb[45].mxu1  ;;  %3515 = vmatprep.subr.bf16.mxu1 %v4195_v17  ;;  %v3240_v58 = vld [vmem:[#allocation19] ss:$0 sm:$0xff] }
 0xc23   : > { %v2519_v16 = vmul.f32 %v3755_v12, %v2511_v10  ;;  %v3464_v21 = vpop.f32.mrb[43].mxu0  ;;  %v2508_v23 = vpop.f32.mrb[46].mxu1  ;;  %v3241_v12 = vld [vmem:[%s5268_s22 + $0x2] ss:$0 sm:$0xff]  ;;  %v3704_v20 = vld [vmem:[%s5281_s12 + $0x10] sm:$0xff]  }
 0xc24   : > { %v2522_v25 = vmul.f32 %v3757_v22, %v2514_v19  ;;  %v3482_v26 = vpop.f32.mrb[47].mxu1  ;;  %v3242_v14 = vld [vmem:[%s5269_s19 + $0x2] ss:$0 sm:$0xff]  ;;  %v3705_v21 = vld [vmem:[%s5281_s12 + $0x18] sm:$0xff]   ;;  %v3243_v22 = vld [vmem:[#allocation21] ss:$0 sm:$0xff] }
 0xc25   : > { %v2523_v24 = vpack.c.bf16 %v2519_v16, %v2519_v16 }
 0xc26   : > { %v2526_v28 = vpack.c.bf16 %v2522_v25, %v2522_v25 }
 0xc27   : > { %3486 = vmatmul.mubr.msk.bf16.vlgmr.msra.gmra.mrb[48].mxu0 %vm1290_vm3, %v2523_v24 }
 0xc28   : > { %v2459_v29 = vpop.f32.mrb[44].mxu0  ;;  %3496 = vmatpush3.bf16.msra.mxu0 %v2627_v27  ;;  %3497 = vmatprep.mubr.msk.bf16.mxu0 %vm4196_vm1, %v4195_v17 }
 0xc29   : > { %v2513_v30 = vadd.f32 %v2459_v29, %v2305_v61  ;;  %3504 = vmatmul.mubr.msk.bf16.vlgmr.msra.gmra.mrb[52].mxu1 %vm1290_vm3, %v2526_v28  ;;  %v3475_v31 = vpop.f32.mrb[45].mxu0  ;;  %3507 = vmatprep.subr.bf16.mxu0 %v4195_v17 }
 0xc2a   : > { %v2462_v33 = vpop.f32.mrb[46].mxu0  ;;  %3523 = vmatprep.mubr.msk.bf16.mxu1 %vm4196_vm1, %v4195_v17  ;;  %3516 = vmatpush3.bf16.msra.mxu1 %v3702_v7 }
 0xc2b   : > { %v2521_v34 = vmul.f32 %v3759_v32, %v2513_v30  ;;  %v3476_v35 = vpop.f32.mrb[47].mxu0  ;;  %3517 = vmatprep.subr.bf16.mxu1 %v4195_v17  ;;  %v3247_v30 = vld [vmem:[%s5282_s18] ss:$0 sm:$0xff]  ;;  %s2940_s18 = scalar_lea.sflag [#allocation6], %s4674_s29 }
 0xc2d   : > { %v2525_v36 = vpack.c.bf16 %v2521_v34, %v2521_v34 }
 0xc2e   : > { %3518 = vmatpush3.bf16.msra.mxu1 %v3703_v8 }
 0xc2f   : > { %3498 = vmatmul.mubr.msk.bf16.vlgmr.msra.gmra.mrb[52].mxu0 %vm1290_vm3, %v2525_v36  ;;  %3519 = vmatprep.subr.bf16.mxu1 %v4195_v17 }
 0xc30   : > { %3511 = vmatprep.mubr.msk.bf16.mxu0 %vm4196_vm1, %v4195_v17  ;;  %3508 = vmatpush3.bf16.msra.mxu0 %v3700_v5 }
 0xc31   : > { %3509 = vmatprep.subr.bf16.mxu0 %v4195_v17 }
 0xc32   : > { %3520 = vmatpush3.bf16.msra.mxu1 %v3704_v20 }
 0xc33   : > { %3521 = vmatprep.subr.bf16.mxu1 %v4195_v17 }
 0xc34   : > { %3510 = vmatpush3.bf16.msra.mxu0 %v3701_v6 }
 0xc36   : > { %3522 = vmatpush3.bf16.msra.mxu1 %v3705_v21 }
 0xcf3   : > { %v2617_v37 = vpop.f32.mrb[48].mxu1 }
 0xcf4   : > { %v3493_v38 = vpop.f32.mrb[49].mxu1  ;;  %v2716_v42 = vsel %vm921_vm0, %v2617_v37, 0.0 }
 0xcf5   : > { %v2620_v39 = vpop.f32.mrb[50].mxu1 }
 0xcf6   : > { %v3494_v40 = vpop.f32.mrb[51].mxu1 }
 0xcfa   : > { %v2571_v41 = vpop.f32.mrb[48].mxu0 }
 0xcfb   : > { %v2715_v43 = vsel %vm921_vm0, %v2571_v41, 0.0  ;;  %v3487_v44 = vpop.f32.mrb[49].mxu0 }
 0xcfc   : > { %v2717_v45 = vadd.f32 %v2716_v42, %v2715_v43  ;;  %v2709_v46 = vpop.f32.mrb[52].mxu1  ;;  %v2574_v48 = vpop.f32.mrb[50].mxu0 }
 0xcfd   : > { %v3505_v49 = vpop.f32.mrb[53].mxu1  ;;  %v3488_v50 = vpop.f32.mrb[51].mxu0  ;;  %v2720_v47 = vsel %vm921_vm0, %v2709_v46, 0.0  ;;  %v3253_v46 = vld [vmem:[%s5268_s22 + $0x3] ss:$0 sm:$0xff] }
 0xcfe   : > { %v2712_v51 = vpop.f32.mrb[54].mxu1  ;;  %v3254_v49 = vld [vmem:[%s5269_s19 + $0x3] ss:$0 sm:$0xff] }
 0xcff   : > { %v3506_v18 = vpop.f32.mrb[55].mxu1 }
 0xd02   : > { %v2663_v52 = vpop.f32.mrb[52].mxu0 }
 0xd03   : > { %v2718_v53 = vsel %vm921_vm0, %v2663_v52, 0.0  ;;  %v3499_v54 = vpop.f32.mrb[53].mxu0 }
 0xd04   : > { %v2719_v55 = vadd.f32 %v2718_v53, %v2717_v45  ;;  %v2666_v56 = vpop.f32.mrb[54].mxu0 }
 0xd05   : > { %v3500_v57 = vpop.f32.mrb[55].mxu0 }
 0xd06   : > { %v2721_v59 = vadd.f32 %v2720_v47, %v2719_v55 }
 0xd08   : > { %v2729_v60 = vadd.f32 %v3240_v58, %v2721_v59 }
 0xd0a   : > { %v2730_v61 = vadd.f32 %v2729_v60, %v2729_v60 }
 0xd0c   : > { %v2731_v62 = vsel %vm921_vm0, %v2730_v61, 0.0 }
 0xd0d   : > { %2732 = vadd.xlane.f32.xlu0 %v2731_v62 }
 0xd9a   : > { %v2733_v0 = vpop.xlane.xlu0 %2732 }
 0xd9b   : > { %v2734_v1 = vmul.f32 0.03125, %v2733_v0 }
 0xd9d   : > { %v2735_v2 = vsub.f32 %v2730_v61, %v2734_v1 }
 0xd9f   : > { %v2736_v3 = vmul.f32 %v2735_v2, %v2735_v2 }
 0xda1   : > { %v2737_v4 = vsel %vm921_vm0, %v2736_v3, 0.0 }
 0xda2   : > { %2738 = vadd.xlane.f32.xlu1 %v2737_v4 }
 0xe2f   : > { %v2739_v63 = vpop.xlane.xlu1 %2738 }
 0xe30   : > { %v2740_v9 = vmul.f32 0.03125, %v2739_v63 }
 0xe32   : > { %v2741_v10 = vadd.f32 1e-05, %v2740_v9 }
 0xe34   : > { %3760 = vrsqrt.f32 %v2741_v10 }
 0xe3e   : > { %v3761_v11 = vpop.eup %3760 }
 0xe3f   : > { %v2743_v13 = vmul.f32 %v3761_v11, %v2735_v2 }
 0xe41   : > { %v2750_v15 = vmul.f32 %v3241_v12, %v2743_v13 }
 0xe43   : > { %v2757_v16 = vadd.f32 %v3242_v14, %v2750_v15 }
 0xe45   : > { %v2758_v19 = vpack.c.bf16 %v2757_v16, %v2757_v16 }
 0xe47   : > { %3512 = vmatmul.mubr.msk.bf16.vlgmr.msra.gmra.mrb[56].mxu0 %vm921_vm0, %v2758_v19 }
 0xf1a   : > { %v2819_v23 = vpop.f32.mrb[56].mxu0 }
 0xf1b   : > { %v2820_v24 = vadd.f32 %v3243_v22, %v2819_v23  ;;  %v3513_v25 = vpop.f32.mrb[57].mxu0 }
 0xf1c   : > { %v2822_v26 = vpop.f32.mrb[58].mxu0 }
 0xf1d   : > { %v2825_v27 = vmax.f32 %v2820_v24, 0.0  ;;  %v3514_v28 = vpop.f32.mrb[59].mxu0 }
 0xf1f   : > { %v2826_v29 = vpack.c.bf16 %v2825_v27, %v2825_v27 }
 0xf21   : > { %3524 = vmatmul.mubr.msk.bf16.vlgmr.msra.gmra.mrb[56].mxu1 %vm2866_vm10, %v2826_v29 }
 0xff4   : > { %v2904_v17 = vpop.f32.mrb[56].mxu1 }
 0xff5   : > { %v2905_v31 = vadd.f32 %v3247_v30, %v2904_v17  ;;  %v3525_v32 = vpop.f32.mrb[57].mxu1 }
 0xff6   : > { %v2907_v33 = vpop.f32.mrb[58].mxu1 }
 0xff7   : > { %v2910_v34 = vadd.f32 %v2905_v31, %v2905_v31  ;;  %v3526_v35 = vpop.f32.mrb[59].mxu1 }
 0xff9   : > { %v2911_v36 = vsel %vm921_vm0, %v2910_v34, 0.0 }
 0xffa   : > { %2912 = vadd.xlane.f32.xlu0 %v2911_v36 }
0x1087   : > { %v2913_v37 = vpop.xlane.xlu0 %2912 }
0x1088   : > { %v2914_v38 = vmul.f32 0.03125, %v2913_v37 }
0x108a   : > { %v2915_v39 = vsub.f32 %v2910_v34, %v2914_v38 }
0x108c   : > { %v2916_v40 = vmul.f32 %v2915_v39, %v2915_v39 }
0x108e   : > { %v2917_v41 = vsel %vm921_vm0, %v2916_v40, 0.0 }
0x108f   : > { %2918 = vadd.xlane.f32.xlu1 %v2917_v41 }
0x111c   : > { %v2919_v42 = vpop.xlane.xlu1 %2918 }
0x111d   : > { %v2920_v43 = vmul.f32 0.03125, %v2919_v42 }
0x111f   : > { %v2921_v44 = vadd.f32 1e-05, %v2920_v43 }
0x1121   : > { %3762 = vrsqrt.f32 %v2921_v44 }
0x112b   : > { %v3763_v45 = vpop.eup %3762 }
0x112c   : > { %v2923_v48 = vmul.f32 %v3763_v45, %v2915_v39 }
0x112e   : > { %v2930_v50 = vmul.f32 %v3253_v46, %v2923_v48 }
0x1130   : > { %v2937_v51 = vadd.f32 %v3254_v49, %v2930_v50 }
0x1132   : > { %2938 = vst.msk [vmem:[%s899_s0] sm:$0xff] %vm921_vm0, %v2937_v51 }
0x1133   : > { %4091 = shalt.err (!%p4088_p3)
}
0x1134   : > { %s4092_s29 = scalar_lea.hbm %s5089_s7, 128  ;;  %s4096_s24 = scalar_lea.hbm %s5284_s26, 256 }
0x1135   : > { %p4093_p11 = scmp.ne.s32.totalorder %s5089_s7, %s4092_s29  ;;  %p4097_p1 = scmp.lt.u32.totalorder %s5089_s7, %s5284_s26 }
0x1136   : > { %p4098_p5 = scmp.lt.u32.totalorder %s4096_s24, %s4092_s29  ;;  %p4100_p4 = scmp.lt.u32.totalorder %s4092_s29, %s5089_s7 }
0x1137   : > { %p4094_p12 = pnand %p4093_p11, %p5285_p2 }
0x1138   : > { %p4099_p0 = por %p4098_p5, %p4097_p1 }
0x1139   : > { %p4095_p8 = pneg %p4094_p12 }
0x113a   : > { %p4101_p7 = por %p4100_p4, %p4099_p0 }
0x113c   : > { %p4102_p10 = pnand %p4101_p7, %p4095_p8 }
0x113e   : > { %4105 = shalt.err (!%p4102_p10)
}
0x113f   : > { %3565 = dma.vmem_to_hbm [thread:$0]  (%p5285_p2), %s5091_s16, 128, %s5089_s7, %s2940_s18  }
0x1140 PF: > { %s5286_s21 = sld [smem:[#allocation30_spill]]  ;;  %s5287_s8 = sld [smem:[#allocation37_spill]] }
0x1141   : > { %s5288_s5 = sld [smem:[#allocation33_spill]] }
0x1146   : > { %s2966_s30 = sand.u32 1, %s5286_s21   ;;  %p5289_p13 = scmp.ne.s32.totalorder %s5287_s8, 0 }
0x1147   : > { %p5290_p6 = scmp.ge.s32.totalorder %s5288_s5, 2  ;;  %s2967_s3 = scalar_lea.sflag [#allocation6], %s2966_s30 }
0x1149   : > { %p3603_p9 = pnand %p5290_p6, %p5289_p13 }
0x114b   : > { %4155 = dma.done.wait (!%p3603_p9), %s2967_s3, 128  }
0x114c   : > { %4157 = vsyncadd (!%p3603_p9), %s2967_s3, 4294967168  ;;  %s45_s0 = sadd.s32 1, %s5288_s5   ;;  %s5291_s29 = sld [smem:[#allocation31_spill]] }
0x114d   : > { %p42_p3 = scmp.ge.s32.totalorder %s45_s0, 4   ;;  %s5292_s2 = sld [smem:[#allocation36_spill]] }
0x114e   : > { %s5293_s23 = sld [smem:[#allocation34_spill]]  ;;  %s5294_s3 = smov %s4164_s28 }
0x114f   : > { %s5297_s30 = smov %s4176_s4  ;;  %44 = sbr.rel (!%p42_p3) target bundleno = 34 (0x22), region = 233 }
0x1152   : > { %s5295_s28 = smov %s5291_s29 }
0x1153   : > { %s5296_s29 = smov %s5292_s2 }
0x1154   : > { %s5298_s4 = smov %s5293_s23 }
0x1156   :  { %2972 = vsyncpa [#allocation5], 1 }
0x1157   :  { %2974 = vsyncpa [#allocation5 + $0x1], 1 }
0x1158   :  { %2975 = vsyncpa [#allocation8], 1 }
0x1159   :  { %2977 = vsyncpa [#allocation8 + $0x1], 1 }
0x115a   :  { %2978 = vsyncpa [#allocation11], 1 }
0x115b   :  { %2979 = vsyncpa [#allocation14], 1 }
0x115c   :  { %2980 = vsyncpa [#allocation17], 1 }
0x115d   :  { %2981 = vsyncpa [#allocation20], 1 }
0x115e   :  { %2982 = vsyncpa [#allocation6], 1 }
0x115f   :  { %2984 = vsyncpa [#allocation6 + $0x1], 1 }

</bundles_post_ra>
